<compile_context>
chip_gen: v7x
topology: tpu7x:2x2x1
jax: 0.10.0
libtpu: 0.0.40
codegen_flags: <defaults>
</compile_context>

<pallas_src>
import functools

import jax
import jax.numpy as jnp
from jax import lax
from jax.experimental import pallas as pl
from jax.experimental.pallas import tpu as pltpu


def _round_up(x, m):
    return (x + m - 1) // m * m


_TAPS = tuple((di, dj) for di in range(3) for dj in range(3))
_C1, _C2, _C3, _HID = 32, 64, 128, 512


# ---------------------------------------------------------------------------
# Static geometry
# ---------------------------------------------------------------------------
def _derive_cfg(h, w, batch_tile):
    ho1, wo1 = h - 2, w - 2                    # conv1 (valid)
    hp1, wp1 = ho1 // 2, wo1 // 2              # MaxPool2d(2), floor
    ho2, wo2 = hp1 - 2, wp1 - 2                # conv2 (valid)
    hp2, wp2 = ho2 // 2, wo2 // 2              # MaxPool2d(2), floor
    ph3, pw3 = hp2 + 2, wp2 + 2                # conv3 input incl. padding=1 ring
    ho3, wo3 = hp2, wp2                        # conv3 output (== input, pad=1)
    assert ho1 >= 2 and wo1 >= 2 and hp1 >= 3 and wp1 >= 3 and hp2 >= 1 and wp2 >= 1, (
        "input spatial size too small for this architecture")
    return dict(
        h=h, w=w, bt=batch_tile,
        # row-major flattened (row*W + col) buffers; the "+2" tail rows absorb the
        # reads issued for wrap-around (discarded) conv output rows.
        r_in=_round_up(h * w + 2, 8),
        hp1=hp1, wp1=wp1, m1=ho1 * w,
        a2r=_round_up(hp1 * wp1 + 2, 8),
        hp2=hp2, wp2=wp2, m2=ho2 * wp1,
        a3r=_round_up(ph3 * pw3 + 2, 8),
        pw3=pw3, ho3=ho3, wo3=wo3, m3=ho3 * pw3,
    )


# ---------------------------------------------------------------------------
# Fused kernel
# ---------------------------------------------------------------------------
def _make_fused_kernel(cfg):
    h, w, bt = cfg["h"], cfg["w"], cfg["bt"]
    m1, hp1, wp1 = cfg["m1"], cfg["hp1"], cfg["wp1"]
    w2w = cfg["wp1"]                      # block-2 input full width
    m2, hp2, wp2 = cfg["m2"], cfg["hp2"], cfg["wp2"]
    pw3, m3, ho3, wo3 = cfg["pw3"], cfg["m3"], cfg["ho3"], cfg["wo3"]
    a2r, a3r = cfg["a2r"], cfg["a3r"]
    inv_gap = 1.0 / float(ho3 * wo3)

    def conv3x3_taps(load_slab, w_ref, cin, m):
        """Tap-accumulated 3x3 conv: acc += slab(di,dj) @ w[(di,dj)]  (9 MXU matmuls)."""
        acc = None
        for t, (di, dj) in enumerate(_TAPS):
            slab = load_slab(di, dj, m)                      # (m, cin) bf16
            w_t = w_ref[pl.ds(t * cin, cin), :]              # (cin, cout) bf16
            d = jnp.dot(slab, w_t, preferred_element_type=jnp.float32)
            acc = d if acc is None else acc + d
        return acc                                           # (m, cout) f32

    def kernel(x_ref, w1_ref, s1_ref, b1_ref, w2_ref, s2_ref, b2_ref,
               w3_ref, s3_ref, b3_ref, fc1w_ref, fc1b_ref, fc2w_ref, fc2b_ref,
               logits_ref, feat_ref,
               y1_scr, pbuf1, a2_scr, pbuf2, a3_scr):
        # Folded-BN scale / bias, loaded once per grid step (hoisted out of loops).
        s1 = s1_ref[...]; t1 = b1_ref[...]
        s2 = s2_ref[...]; t2 = b2_ref[...]
        s3 = s3_ref[...]; t3 = b3_ref[...]

        # Zero the staging buffers once per step: the block-3 buffer supplies the
        # padding=1 ring, and the tail rows of both buffers are only read by
        # wrap-around conv output rows that are discarded downstream.
        a2_scr[...] = jnp.zeros((a2r, _C1), jnp.bfloat16)
        a3_scr[...] = jnp.zeros((a3r, _C2), jnp.bfloat16)

        def image_body(b, carry):
            # ---- block 1: Conv3x3(3->32, valid) + BN + ReLU (full-width rows) ----
            acc1 = conv3x3_taps(
                lambda di, dj, m: x_ref[b, pl.ds(di * w + dj, m), :],
                w1_ref, 3, m1)
            y1_scr[...] = jnp.maximum(acc1 * s1 + t1, 0.0)   # (m1, 32) f32

            # ---- MaxPool2d(2): full-row vertical max, 2 stride-2 column reads ----
            for r in range(hp1):
                top = y1_scr[pl.ds((2 * r) * w, w), :]
                bot = y1_scr[pl.ds((2 * r + 1) * w, w), :]
                pbuf1[...] = jnp.maximum(top, bot)
                pooled = jnp.maximum(pbuf1[pl.ds(0, wp1, stride=2), :],
                                     pbuf1[pl.ds(1, wp1, stride=2), :])
                a2_scr[pl.ds(r * wp1, wp1), :] = pooled.astype(jnp.bfloat16)

            # ---- block 2: Conv3x3(32->64, valid) + BN + ReLU ----
            acc2 = conv3x3_taps(
                lambda di, dj, m: a2_scr[pl.ds(di * w2w + dj, m), :],
                w2_ref, _C1, m2)
            y2 = jnp.maximum(acc2 * s2 + t2, 0.0)            # (m2, 64) f32

            # ---- MaxPool2d(2) into the zero-padded block-3 staging (padding=1) ----
            for r in range(hp2):
                top = y2[(2 * r) * w2w:(2 * r) * w2w + w2w, :]
                bot = y2[(2 * r + 1) * w2w:(2 * r + 1) * w2w + w2w, :]
                pbuf2[pl.ds(0, w2w), :] = jnp.maximum(top, bot)
                pooled = jnp.maximum(pbuf2[pl.ds(0, wp2, stride=2), :],
                                     pbuf2[pl.ds(1, wp2, stride=2), :])
                a3_scr[pl.ds((r + 1) * pw3 + 1, wp2), :] = pooled.astype(jnp.bfloat16)

            # ---- block 3: Conv3x3(64->128, pad=1) + BN + ReLU + AdaptiveAvgPool ----
            acc3 = conv3x3_taps(
                lambda di, dj, m: a3_scr[pl.ds(di * pw3 + dj, m), :],
                w3_ref, _C2, m3)
            y3 = jnp.maximum(acc3 * s3 + t3, 0.0)            # (m3, 128) f32
            gsum = jnp.sum(y3[0:wo3, :], axis=0, keepdims=True)
            for i in range(1, ho3):
                gsum = gsum + jnp.sum(y3[i * pw3:i * pw3 + wo3, :],
                                      axis=0, keepdims=True)
            feat_ref[pl.ds(b, 1), :] = gsum * jnp.float32(inv_gap)
            return carry

        lax.fori_loop(0, bt, image_body, 0)

        # ---- classifier on the whole batch tile: Linear(128,512)+ReLU+Linear ----
        f = feat_ref[...].astype(jnp.bfloat16)               # (bt, 128)
        hcls = jnp.dot(f, fc1w_ref[...],
                       preferred_element_type=jnp.float32) + fc1b_ref[...]
        hcls = jnp.maximum(hcls, 0.0).astype(jnp.bfloat16)
        logits_ref[...] = jnp.dot(hcls, fc2w_ref[...],
                                  preferred_element_type=jnp.float32) + fc2b_ref[...]

    return kernel


# ---------------------------------------------------------------------------
# Forward pass (single pallas_call)
# ---------------------------------------------------------------------------
@functools.partial(jax.jit, static_argnames=("num_classes", "batch_tile"))
def mnist_cnn_forward(x_nchw, params, num_classes=10, batch_tile=8):
    n, cin, h, w = x_nchw.shape
    assert cin == 3, "MNIST_CNNModel expects 3 input channels"
    bt = min(batch_tile, n)
    cfg = _derive_cfg(h, w, bt)
    n_pad = _round_up(n, bt)
    r_in = cfg["r_in"]
    ncp = params["fc2_w"].shape[1]                # 128-lane padded class dim

    # NCHW -> NHWC bf16, flatten spatial row-major, pad rows + batch.
    x = jnp.transpose(x_nchw, (0, 2, 3, 1)).astype(jnp.bfloat16)
    x = x.reshape(n, h * w, cin)
    x = jnp.pad(x, ((0, n_pad - n), (0, r_in - h * w), (0, 0)))

    def resident(shape):                          # VMEM-resident constant block
        return pl.BlockSpec(shape, lambda i: (0,) * len(shape))

    in_specs = [
        pl.BlockSpec((bt, r_in, cin), lambda i: (i, 0, 0)),
        resident((9 * 3, _C1)), resident((1, _C1)), resident((1, _C1)),
        resident((9 * _C1, _C2)), resident((1, _C2)), resident((1, _C2)),
        resident((9 * _C2, _C3)), resident((1, _C3)), resident((1, _C3)),
        resident((_C3, _HID)), resident((1, _HID)),
        resident((_HID, ncp)), resident((1, ncp)),
    ]
    out_specs = (pl.BlockSpec((bt, ncp), lambda i: (i, 0)),
                 pl.BlockSpec((bt, _C3), lambda i: (i, 0)))
    out_shape = (jax.ShapeDtypeStruct((n_pad, ncp), jnp.float32),
                 jax.ShapeDtypeStruct((n_pad, _C3), jnp.float32))
    scratch_shapes = [
        pltpu.VMEM((cfg["m1"], _C1), jnp.float32),                 # y1_scr
        pltpu.VMEM((w, _C1), jnp.float32),                         # pbuf1
        pltpu.VMEM((cfg["a2r"], _C1), jnp.bfloat16),               # a2_scr
        pltpu.VMEM((_round_up(cfg["wp1"], 8), _C2), jnp.float32),  # pbuf2
        pltpu.VMEM((cfg["a3r"], _C2), jnp.bfloat16),               # a3_scr
    ]

    logits_pad, feats_pad = pl.pallas_call(
        _make_fused_kernel(cfg),
        grid=(n_pad // bt,),
        out_shape=out_shape,
        in_specs=in_specs,
        out_specs=out_specs,
        scratch_shapes=scratch_shapes,
        compiler_params=pltpu.CompilerParams(
            dimension_semantics=("parallel",)),
    )(x,
      params["w1"], params["s1"].reshape(1, _C1), params["b1"].reshape(1, _C1),
      params["w2"], params["s2"].reshape(1, _C2), params["b2"].reshape(1, _C2),
      params["w3"], params["s3"].reshape(1, _C3), params["b3"].reshape(1, _C3),
      params["fc1_w"], params["fc1_b"].reshape(1, _HID),
      params["fc2_w"], params["fc2_b"].reshape(1, ncp))

    return logits_pad[:n, :num_classes], feats_pad[:n, :]


# ---------------------------------------------------------------------------
# Parameter helpers (plain JAX)
# ---------------------------------------------------------------------------
def conv_w_to_mat(w):
    # PyTorch Conv2d weight (Cout, Cin, kh, kw) -> (kh*kw*Cin, Cout); tap t = di*3+dj
    # occupies rows [t*Cin, (t+1)*Cin), matching the in-kernel tap slicing.
    cout, cin, kh, kw = w.shape
    return jnp.transpose(w, (2, 3, 1, 0)).reshape(kh * kw * cin, cout)


def fold_bn(gamma, beta, mean, var, conv_bias, eps=1e-5):
    scale = gamma / jnp.sqrt(var + eps)
    bias = (conv_bias - mean) * scale + beta
    return scale, bias


def init_params(key, num_classes=10):
    ks = jax.random.split(key, 22)
    p = {}

    def conv_block(i, cin, cout, k0):
        w = 0.1 * jax.random.normal(ks[k0], (cout, cin, 3, 3), jnp.float32)
        cb = 0.05 * jax.random.normal(ks[k0 + 1], (cout,), jnp.float32)
        gamma = 1.0 + 0.1 * jax.random.normal(ks[k0 + 2], (cout,), jnp.float32)
        beta = 0.05 * jax.random.normal(ks[k0 + 3], (cout,), jnp.float32)
        mean = 0.01 * jax.random.normal(ks[k0 + 4], (cout,), jnp.float32)
        var = jax.random.uniform(ks[k0 + 5], (cout,), jnp.float32, 0.5, 1.5)
        s, b = fold_bn(gamma, beta, mean, var, cb)
        p[f"w{i}"] = conv_w_to_mat(w).astype(jnp.bfloat16)   # bf16 MXU operand
        p[f"s{i}"] = s.astype(jnp.float32)
        p[f"b{i}"] = b.astype(jnp.float32)

    conv_block(1, 3, _C1, 0)
    conv_block(2, _C1, _C2, 6)
    conv_block(3, _C2, _C3, 12)

    flatten_dim = _C3                                         # GAP -> 128 features
    fc1_w = 0.05 * jax.random.normal(ks[18], (_HID, flatten_dim), jnp.float32)
    p["fc1_w"] = fc1_w.T.astype(jnp.bfloat16)                 # (128, 512) bf16
    p["fc1_b"] = 0.05 * jax.random.normal(ks[19], (_HID,), jnp.float32)
    fc2_w = 0.05 * jax.random.normal(ks[20], (num_classes, _HID), jnp.float32)
    fc2_b = 0.05 * jax.random.normal(ks[21], (num_classes,), jnp.float32)
    # zero-pad the class dim to 128 lanes (lane-dense store); sliced back in JAX.
    ncls_pad = _round_up(max(num_classes, 1), 128)
    p["fc2_w"] = (jnp.zeros((_HID, ncls_pad), jnp.float32)
                  .at[:, :num_classes].set(fc2_w.T)).astype(jnp.bfloat16)
    p["fc2_b"] = jnp.zeros((ncls_pad,), jnp.float32).at[:num_classes].set(fc2_b)
    return p


if __name__ == "__main__":
    key = jax.random.PRNGKey(0)
    k_x, k_p = jax.random.split(key)

    num_classes = 10
    # small input consistent with the module: NCHW, 3 input channels
    x = jax.random.normal(k_x, (2, 3, 16, 16), jnp.float32)
    params = init_params(k_p, num_classes)

    logits, features = mnist_cnn_forward(x, params, num_classes=num_classes)
    jax.block_until_ready((logits, features))

    assert logits.shape == (2, num_classes)
    assert features.shape == (2, 128)
    print("KERNEL_OK")
</pallas_src>

<mosaic_0001>
module attributes {stable_mosaic.version = 11 : i64} {
  func.func @kernel(%arg0: i32, %arg1: memref<2x264x3xbf16, #tpu.memory_space<vmem>>, %arg2: memref<27x32xbf16, #tpu.memory_space<vmem>>, %arg3: memref<1x32xf32, #tpu.memory_space<vmem>>, %arg4: memref<1x32xf32, #tpu.memory_space<vmem>>, %arg5: memref<288x64xbf16, #tpu.memory_space<vmem>>, %arg6: memref<1x64xf32, #tpu.memory_space<vmem>>, %arg7: memref<1x64xf32, #tpu.memory_space<vmem>>, %arg8: memref<576x128xbf16, #tpu.memory_space<vmem>>, %arg9: memref<1x128xf32, #tpu.memory_space<vmem>>, %arg10: memref<1x128xf32, #tpu.memory_space<vmem>>, %arg11: memref<128x512xbf16, #tpu.memory_space<vmem>>, %arg12: memref<1x512xf32, #tpu.memory_space<vmem>>, %arg13: memref<512x128xbf16, #tpu.memory_space<vmem>>, %arg14: memref<1x128xf32, #tpu.memory_space<vmem>>, %arg15: memref<2x128xf32, #tpu.memory_space<vmem>>, %arg16: memref<2x128xf32, #tpu.memory_space<vmem>>, %arg17: memref<224x32xf32, #tpu.memory_space<vmem>>, %arg18: memref<16x32xf32, #tpu.memory_space<vmem>>, %arg19: memref<56x32xbf16, #tpu.memory_space<vmem>>, %arg20: memref<8x64xf32, #tpu.memory_space<vmem>>, %arg21: memref<24x64xbf16, #tpu.memory_space<vmem>>) attributes {dimension_semantics = [#tpu.dimension_semantics<parallel>], iteration_bounds = array<i64: 1>, scalar_prefetch = 0 : i64, scratch_operands = 5 : i64, tpu.core_type = #tpu.core_type<tc>, window_params = [{transform_indices = @transform_0, window_bounds = array<i64: 2, 264, 3>}, {pipeline_mode = #tpu.pipeline_mode<synchronous>, transform_indices = @transform_1, window_bounds = array<i64: 27, 32>}, {pipeline_mode = #tpu.pipeline_mode<synchronous>, transform_indices = @transform_2, window_bounds = array<i64: 1, 32>}, {pipeline_mode = #tpu.pipeline_mode<synchronous>, transform_indices = @transform_3, window_bounds = array<i64: 1, 32>}, {pipeline_mode = #tpu.pipeline_mode<synchronous>, transform_indices = @transform_4, window_bounds = array<i64: 288, 64>}, {pipeline_mode = #tpu.pipeline_mode<synchronous>, transform_indices = @transform_5, window_bounds = array<i64: 1, 64>}, {pipeline_mode = #tpu.pipeline_mode<synchronous>, transform_indices = @transform_6, window_bounds = array<i64: 1, 64>}, {pipeline_mode = #tpu.pipeline_mode<synchronous>, transform_indices = @transform_7, window_bounds = array<i64: 576, 128>}, {pipeline_mode = #tpu.pipeline_mode<synchronous>, transform_indices = @transform_8, window_bounds = array<i64: 1, 128>}, {pipeline_mode = #tpu.pipeline_mode<synchronous>, transform_indices = @transform_9, window_bounds = array<i64: 1, 128>}, {pipeline_mode = #tpu.pipeline_mode<synchronous>, transform_indices = @transform_10, window_bounds = array<i64: 128, 512>}, {pipeline_mode = #tpu.pipeline_mode<synchronous>, transform_indices = @transform_11, window_bounds = array<i64: 1, 512>}, {pipeline_mode = #tpu.pipeline_mode<synchronous>, transform_indices = @transform_12, window_bounds = array<i64: 512, 128>}, {pipeline_mode = #tpu.pipeline_mode<synchronous>, transform_indices = @transform_13, window_bounds = array<i64: 1, 128>}, {transform_indices = @transform_14, window_bounds = array<i64: 2, 128>}, {transform_indices = @transform_15, window_bounds = array<i64: 2, 128>}]} {
    %c0 = arith.constant 0 : index
    %c0_0 = arith.constant 0 : index
    %0 = vector.load %arg3[%c0, %c0_0] : memref<1x32xf32, #tpu.memory_space<vmem>>, vector<1x32xf32>
    %c0_1 = arith.constant 0 : index
    %c0_2 = arith.constant 0 : index
    %1 = vector.load %arg4[%c0_1, %c0_2] : memref<1x32xf32, #tpu.memory_space<vmem>>, vector<1x32xf32>
    %c0_3 = arith.constant 0 : index
    %c0_4 = arith.constant 0 : index
    %2 = vector.load %arg6[%c0_3, %c0_4] : memref<1x64xf32, #tpu.memory_space<vmem>>, vector<1x64xf32>
    %c0_5 = arith.constant 0 : index
    %c0_6 = arith.constant 0 : index
    %3 = vector.load %arg7[%c0_5, %c0_6] : memref<1x64xf32, #tpu.memory_space<vmem>>, vector<1x64xf32>
    %c0_7 = arith.constant 0 : index
    %c0_8 = arith.constant 0 : index
    %4 = vector.load %arg9[%c0_7, %c0_8] : memref<1x128xf32, #tpu.memory_space<vmem>>, vector<1x128xf32>
    %c0_9 = arith.constant 0 : index
    %c0_10 = arith.constant 0 : index
    %5 = vector.load %arg10[%c0_9, %c0_10] : memref<1x128xf32, #tpu.memory_space<vmem>>, vector<1x128xf32>
    %cst = arith.constant 0.000000e+00 : bf16
    %6 = vector.broadcast %cst : bf16 to vector<56x32xbf16>
    %c0_11 = arith.constant 0 : index
    %c0_12 = arith.constant 0 : index
    %7 = vector.load %arg19[%c0_11, %c0_12] : memref<56x32xbf16, #tpu.memory_space<vmem>>, vector<56x32xbf16>
    tpu.vector_store %arg19[%c0_11, %c0_12], %6 {strides = array<i32>} : memref<56x32xbf16, #tpu.memory_space<vmem>>, vector<56x32xbf16>,
    %cst_13 = arith.constant 0.000000e+00 : bf16
    %8 = vector.broadcast %cst_13 : bf16 to vector<24x64xbf16>
    %c0_14 = arith.constant 0 : index
    %c0_15 = arith.constant 0 : index
    %9 = vector.load %arg21[%c0_14, %c0_15] : memref<24x64xbf16, #tpu.memory_space<vmem>>, vector<24x64xbf16>
    tpu.vector_store %arg21[%c0_14, %c0_15], %8 {strides = array<i32>} : memref<24x64xbf16, #tpu.memory_space<vmem>>, vector<24x64xbf16>,
    %c0_i32 = arith.constant 0 : i32
    %c2_i32 = arith.constant 2 : i32
    %10 = arith.addi %c0_i32, %c2_i32 : i32
    %c1_i32 = arith.constant 1 : i32
    scf.for %arg22 = %c0_i32 to %10 step %c1_i32  : i32 {
      %27 = arith.index_cast %arg22 : i32 to index
      %c0_32 = arith.constant 0 : index
      %c0_33 = arith.constant 0 : index
      %28 = vector.load %arg1[%27, %c0_32, %c0_33] : memref<2x264x3xbf16, #tpu.memory_space<vmem>>, vector<1x224x3xbf16>
      %29 = vector.shape_cast %28 : vector<1x224x3xbf16> to vector<224x3xbf16>
      %c0_34 = arith.constant 0 : index
      %c0_35 = arith.constant 0 : index
      %30 = vector.load %arg2[%c0_34, %c0_35] : memref<27x32xbf16, #tpu.memory_space<vmem>>, vector<3x32xbf16>
      %cst_36 = arith.constant dense<0.000000e+00> : vector<224x32xf32>
      %31 = tpu.matmul %29, %30, %cst_36 {dimension_numbers = #tpu.dot_dimension_numbers<[1], [0], [0], [1], [0, 0, 1, 1], [], []>} : vector<224x3xbf16>, vector<3x32xbf16>, vector<224x32xf32> -> vector<224x32xf32>
      %32 = arith.index_cast %arg22 : i32 to index
      %c1 = arith.constant 1 : index
      %c0_37 = arith.constant 0 : index
      %33 = vector.load %arg1[%32, %c1, %c0_37] : memref<2x264x3xbf16, #tpu.memory_space<vmem>>, vector<1x224x3xbf16>
      %34 = vector.shape_cast %33 : vector<1x224x3xbf16> to vector<224x3xbf16>
      %c3 = arith.constant 3 : index
      %c0_38 = arith.constant 0 : index
      %35 = vector.load %arg2[%c3, %c0_38] : memref<27x32xbf16, #tpu.memory_space<vmem>>, vector<3x32xbf16>
      %cst_39 = arith.constant dense<0.000000e+00> : vector<224x32xf32>
      %36 = tpu.matmul %34, %35, %cst_39 {dimension_numbers = #tpu.dot_dimension_numbers<[1], [0], [0], [1], [0, 0, 1, 1], [], []>} : vector<224x3xbf16>, vector<3x32xbf16>, vector<224x32xf32> -> vector<224x32xf32>
      %37 = arith.addf %31, %36 : vector<224x32xf32>
      %38 = arith.index_cast %arg22 : i32 to index
      %c2 = arith.constant 2 : index
      %c0_40 = arith.constant 0 : index
      %39 = vector.load %arg1[%38, %c2, %c0_40] : memref<2x264x3xbf16, #tpu.memory_space<vmem>>, vector<1x224x3xbf16>
      %40 = vector.shape_cast %39 : vector<1x224x3xbf16> to vector<224x3xbf16>
      %c6 = arith.constant 6 : index
      %c0_41 = arith.constant 0 : index
      %41 = vector.load %arg2[%c6, %c0_41] : memref<27x32xbf16, #tpu.memory_space<vmem>>, vector<3x32xbf16>
      %cst_42 = arith.constant dense<0.000000e+00> : vector<224x32xf32>
      %42 = tpu.matmul %40, %41, %cst_42 {dimension_numbers = #tpu.dot_dimension_numbers<[1], [0], [0], [1], [0, 0, 1, 1], [], []>} : vector<224x3xbf16>, vector<3x32xbf16>, vector<224x32xf32> -> vector<224x32xf32>
      %43 = arith.addf %37, %42 : vector<224x32xf32>
      %44 = arith.index_cast %arg22 : i32 to index
      %c16 = arith.constant 16 : index
      %c0_43 = arith.constant 0 : index
      %45 = vector.load %arg1[%44, %c16, %c0_43] : memref<2x264x3xbf16, #tpu.memory_space<vmem>>, vector<1x224x3xbf16>
      %46 = vector.shape_cast %45 : vector<1x224x3xbf16> to vector<224x3xbf16>
      %c9 = arith.constant 9 : index
      %c0_44 = arith.constant 0 : index
      %47 = vector.load %arg2[%c9, %c0_44] : memref<27x32xbf16, #tpu.memory_space<vmem>>, vector<3x32xbf16>
      %cst_45 = arith.constant dense<0.000000e+00> : vector<224x32xf32>
      %48 = tpu.matmul %46, %47, %cst_45 {dimension_numbers = #tpu.dot_dimension_numbers<[1], [0], [0], [1], [0, 0, 1, 1], [], []>} : vector<224x3xbf16>, vector<3x32xbf16>, vector<224x32xf32> -> vector<224x32xf32>
      %49 = arith.addf %43, %48 : vector<224x32xf32>
      %50 = arith.index_cast %arg22 : i32 to index
      %c17 = arith.constant 17 : index
      %c0_46 = arith.constant 0 : index
      %51 = vector.load %arg1[%50, %c17, %c0_46] : memref<2x264x3xbf16, #tpu.memory_space<vmem>>, vector<1x224x3xbf16>
      %52 = vector.shape_cast %51 : vector<1x224x3xbf16> to vector<224x3xbf16>
      %c12 = arith.constant 12 : index
      %c0_47 = arith.constant 0 : index
      %53 = vector.load %arg2[%c12, %c0_47] : memref<27x32xbf16, #tpu.memory_space<vmem>>, vector<3x32xbf16>
      %cst_48 = arith.constant dense<0.000000e+00> : vector<224x32xf32>
      %54 = tpu.matmul %52, %53, %cst_48 {dimension_numbers = #tpu.dot_dimension_numbers<[1], [0], [0], [1], [0, 0, 1, 1], [], []>} : vector<224x3xbf16>, vector<3x32xbf16>, vector<224x32xf32> -> vector<224x32xf32>
      %55 = arith.addf %49, %54 : vector<224x32xf32>
      %56 = arith.index_cast %arg22 : i32 to index
      %c18 = arith.constant 18 : index
      %c0_49 = arith.constant 0 : index
      %57 = vector.load %arg1[%56, %c18, %c0_49] : memref<2x264x3xbf16, #tpu.memory_space<vmem>>, vector<1x224x3xbf16>
      %58 = vector.shape_cast %57 : vector<1x224x3xbf16> to vector<224x3xbf16>
      %c15 = arith.constant 15 : index
      %c0_50 = arith.constant 0 : index
      %59 = vector.load %arg2[%c15, %c0_50] : memref<27x32xbf16, #tpu.memory_space<vmem>>, vector<3x32xbf16>
      %cst_51 = arith.constant dense<0.000000e+00> : vector<224x32xf32>
      %60 = tpu.matmul %58, %59, %cst_51 {dimension_numbers = #tpu.dot_dimension_numbers<[1], [0], [0], [1], [0, 0, 1, 1], [], []>} : vector<224x3xbf16>, vector<3x32xbf16>, vector<224x32xf32> -> vector<224x32xf32>
      %61 = arith.addf %55, %60 : vector<224x32xf32>
      %62 = arith.index_cast %arg22 : i32 to index
      %c32 = arith.constant 32 : index
      %c0_52 = arith.constant 0 : index
      %63 = vector.load %arg1[%62, %c32, %c0_52] : memref<2x264x3xbf16, #tpu.memory_space<vmem>>, vector<1x224x3xbf16>
      %64 = vector.shape_cast %63 : vector<1x224x3xbf16> to vector<224x3xbf16>
      %c18_53 = arith.constant 18 : index
      %c0_54 = arith.constant 0 : index
      %65 = vector.load %arg2[%c18_53, %c0_54] : memref<27x32xbf16, #tpu.memory_space<vmem>>, vector<3x32xbf16>
      %cst_55 = arith.constant dense<0.000000e+00> : vector<224x32xf32>
      %66 = tpu.matmul %64, %65, %cst_55 {dimension_numbers = #tpu.dot_dimension_numbers<[1], [0], [0], [1], [0, 0, 1, 1], [], []>} : vector<224x3xbf16>, vector<3x32xbf16>, vector<224x32xf32> -> vector<224x32xf32>
      %67 = arith.addf %61, %66 : vector<224x32xf32>
      %68 = arith.index_cast %arg22 : i32 to index
      %c33 = arith.constant 33 : index
      %c0_56 = arith.constant 0 : index
      %69 = vector.load %arg1[%68, %c33, %c0_56] : memref<2x264x3xbf16, #tpu.memory_space<vmem>>, vector<1x224x3xbf16>
      %70 = vector.shape_cast %69 : vector<1x224x3xbf16> to vector<224x3xbf16>
      %c21 = arith.constant 21 : index
      %c0_57 = arith.constant 0 : index
      %71 = vector.load %arg2[%c21, %c0_57] : memref<27x32xbf16, #tpu.memory_space<vmem>>, vector<3x32xbf16>
      %cst_58 = arith.constant dense<0.000000e+00> : vector<224x32xf32>
      %72 = tpu.matmul %70, %71, %cst_58 {dimension_numbers = #tpu.dot_dimension_numbers<[1], [0], [0], [1], [0, 0, 1, 1], [], []>} : vector<224x3xbf16>, vector<3x32xbf16>, vector<224x32xf32> -> vector<224x32xf32>
      %73 = arith.addf %67, %72 : vector<224x32xf32>
      %74 = arith.index_cast %arg22 : i32 to index
      %c34 = arith.constant 34 : index
      %c0_59 = arith.constant 0 : index
      %75 = vector.load %arg1[%74, %c34, %c0_59] : memref<2x264x3xbf16, #tpu.memory_space<vmem>>, vector<1x224x3xbf16>
      %76 = vector.shape_cast %75 : vector<1x224x3xbf16> to vector<224x3xbf16>
      %c24 = arith.constant 24 : index
      %c0_60 = arith.constant 0 : index
      %77 = vector.load %arg2[%c24, %c0_60] : memref<27x32xbf16, #tpu.memory_space<vmem>>, vector<3x32xbf16>
      %cst_61 = arith.constant dense<0.000000e+00> : vector<224x32xf32>
      %78 = tpu.matmul %76, %77, %cst_61 {dimension_numbers = #tpu.dot_dimension_numbers<[1], [0], [0], [1], [0, 0, 1, 1], [], []>} : vector<224x3xbf16>, vector<3x32xbf16>, vector<224x32xf32> -> vector<224x32xf32>
      %79 = arith.addf %73, %78 : vector<224x32xf32>
      %80 = vector.broadcast %0 : vector<1x32xf32> to vector<224x32xf32>
      %81 = arith.mulf %79, %80 : vector<224x32xf32>
      %82 = vector.broadcast %1 : vector<1x32xf32> to vector<224x32xf32>
      %83 = arith.addf %81, %82 : vector<224x32xf32>
      %cst_62 = arith.constant 0.000000e+00 : f32
      %84 = vector.broadcast %cst_62 : f32 to vector<224x32xf32>
      %85 = arith.maximumf %83, %84 : vector<224x32xf32>
      %c0_63 = arith.constant 0 : index
      %c0_64 = arith.constant 0 : index
      %86 = vector.load %arg17[%c0_63, %c0_64] : memref<224x32xf32, #tpu.memory_space<vmem>>, vector<224x32xf32>
      tpu.vector_store %arg17[%c0_63, %c0_64], %85 {strides = array<i32>} : memref<224x32xf32, #tpu.memory_space<vmem>>, vector<224x32xf32>,
      %c0_65 = arith.constant 0 : index
      %c0_66 = arith.constant 0 : index
      %87 = vector.load %arg17[%c0_65, %c0_66] : memref<224x32xf32, #tpu.memory_space<vmem>>, vector<16x32xf32>
      %c16_67 = arith.constant 16 : index
      %c0_68 = arith.constant 0 : index
      %88 = vector.load %arg17[%c16_67, %c0_68] : memref<224x32xf32, #tpu.memory_space<vmem>>, vector<16x32xf32>
      %89 = arith.maximumf %87, %88 : vector<16x32xf32>
      %c0_69 = arith.constant 0 : index
      %c0_70 = arith.constant 0 : index
      %90 = vector.load %arg18[%c0_69, %c0_70] : memref<16x32xf32, #tpu.memory_space<vmem>>, vector<16x32xf32>
      tpu.vector_store %arg18[%c0_69, %c0_70], %89 {strides = array<i32>} : memref<16x32xf32, #tpu.memory_space<vmem>>, vector<16x32xf32>,
      %c0_71 = arith.constant 0 : index
      %c0_72 = arith.constant 0 : index
      %91 = tpu.strided_load %arg18[%c0_71, %c0_72] {strides = array<i32: 2, 1>} : memref<16x32xf32, #tpu.memory_space<vmem>>, vector<7x32xf32>
      %c1_73 = arith.constant 1 : index
      %c0_74 = arith.constant 0 : index
      %92 = tpu.strided_load %arg18[%c1_73, %c0_74] {strides = array<i32: 2, 1>} : memref<16x32xf32, #tpu.memory_space<vmem>>, vector<7x32xf32>
      %93 = arith.maximumf %91, %92 : vector<7x32xf32>
      %94 = arith.truncf %93 : vector<7x32xf32> to vector<7x32xbf16>
      %c0_75 = arith.constant 0 : index
      %c0_76 = arith.constant 0 : index
      %95 = vector.load %arg19[%c0_75, %c0_76] : memref<56x32xbf16, #tpu.memory_space<vmem>>, vector<7x32xbf16>
      tpu.vector_store %arg19[%c0_75, %c0_76], %94 {strides = array<i32>} : memref<56x32xbf16, #tpu.memory_space<vmem>>, vector<7x32xbf16>,
      %c32_77 = arith.constant 32 : index
      %c0_78 = arith.constant 0 : index
      %96 = vector.load %arg17[%c32_77, %c0_78] : memref<224x32xf32, #tpu.memory_space<vmem>>, vector<16x32xf32>
      %c48 = arith.constant 48 : index
      %c0_79 = arith.constant 0 : index
      %97 = vector.load %arg17[%c48, %c0_79] : memref<224x32xf32, #tpu.memory_space<vmem>>, vector<16x32xf32>
      %98 = arith.maximumf %96, %97 : vector<16x32xf32>
      %c0_80 = arith.constant 0 : index
      %c0_81 = arith.constant 0 : index
      %99 = vector.load %arg18[%c0_80, %c0_81] : memref<16x32xf32, #tpu.memory_space<vmem>>, vector<16x32xf32>
      tpu.vector_store %arg18[%c0_80, %c0_81], %98 {strides = array<i32>} : memref<16x32xf32, #tpu.memory_space<vmem>>, vector<16x32xf32>,
      %c0_82 = arith.constant 0 : index
      %c0_83 = arith.constant 0 : index
      %100 = tpu.strided_load %arg18[%c0_82, %c0_83] {strides = array<i32: 2, 1>} : memref<16x32xf32, #tpu.memory_space<vmem>>, vector<7x32xf32>
      %c1_84 = arith.constant 1 : index
      %c0_85 = arith.constant 0 : index
      %101 = tpu.strided_load %arg18[%c1_84, %c0_85] {strides = array<i32: 2, 1>} : memref<16x32xf32, #tpu.memory_space<vmem>>, vector<7x32xf32>
      %102 = arith.maximumf %100, %101 : vector<7x32xf32>
      %103 = arith.truncf %102 : vector<7x32xf32> to vector<7x32xbf16>
      %c7 = arith.constant 7 : index
      %c0_86 = arith.constant 0 : index
      %104 = vector.load %arg19[%c7, %c0_86] : memref<56x32xbf16, #tpu.memory_space<vmem>>, vector<7x32xbf16>
      tpu.vector_store %arg19[%c7, %c0_86], %103 {strides = array<i32>} : memref<56x32xbf16, #tpu.memory_space<vmem>>, vector<7x32xbf16>,
      %c64 = arith.constant 64 : index
      %c0_87 = arith.constant 0 : index
      %105 = vector.load %arg17[%c64, %c0_87] : memref<224x32xf32, #tpu.memory_space<vmem>>, vector<16x32xf32>
      %c80 = arith.constant 80 : index
      %c0_88 = arith.constant 0 : index
      %106 = vector.load %arg17[%c80, %c0_88] : memref<224x32xf32, #tpu.memory_space<vmem>>, vector<16x32xf32>
      %107 = arith.maximumf %105, %106 : vector<16x32xf32>
      %c0_89 = arith.constant 0 : index
      %c0_90 = arith.constant 0 : index
      %108 = vector.load %arg18[%c0_89, %c0_90] : memref<16x32xf32, #tpu.memory_space<vmem>>, vector<16x32xf32>
      tpu.vector_store %arg18[%c0_89, %c0_90], %107 {strides = array<i32>} : memref<16x32xf32, #tpu.memory_space<vmem>>, vector<16x32xf32>,
      %c0_91 = arith.constant 0 : index
      %c0_92 = arith.constant 0 : index
      %109 = tpu.strided_load %arg18[%c0_91, %c0_92] {strides = array<i32: 2, 1>} : memref<16x32xf32, #tpu.memory_space<vmem>>, vector<7x32xf32>
      %c1_93 = arith.constant 1 : index
      %c0_94 = arith.constant 0 : index
      %110 = tpu.strided_load %arg18[%c1_93, %c0_94] {strides = array<i32: 2, 1>} : memref<16x32xf32, #tpu.memory_space<vmem>>, vector<7x32xf32>
      %111 = arith.maximumf %109, %110 : vector<7x32xf32>
      %112 = arith.truncf %111 : vector<7x32xf32> to vector<7x32xbf16>
      %c14 = arith.constant 14 : index
      %c0_95 = arith.constant 0 : index
      %113 = vector.load %arg19[%c14, %c0_95] : memref<56x32xbf16, #tpu.memory_space<vmem>>, vector<7x32xbf16>
      tpu.vector_store %arg19[%c14, %c0_95], %112 {strides = array<i32>} : memref<56x32xbf16, #tpu.memory_space<vmem>>, vector<7x32xbf16>,
      %c96 = arith.constant 96 : index
      %c0_96 = arith.constant 0 : index
      %114 = vector.load %arg17[%c96, %c0_96] : memref<224x32xf32, #tpu.memory_space<vmem>>, vector<16x32xf32>
      %c112 = arith.constant 112 : index
      %c0_97 = arith.constant 0 : index
      %115 = vector.load %arg17[%c112, %c0_97] : memref<224x32xf32, #tpu.memory_space<vmem>>, vector<16x32xf32>
      %116 = arith.maximumf %114, %115 : vector<16x32xf32>
      %c0_98 = arith.constant 0 : index
      %c0_99 = arith.constant 0 : index
      %117 = vector.load %arg18[%c0_98, %c0_99] : memref<16x32xf32, #tpu.memory_space<vmem>>, vector<16x32xf32>
      tpu.vector_store %arg18[%c0_98, %c0_99], %116 {strides = array<i32>} : memref<16x32xf32, #tpu.memory_space<vmem>>, vector<16x32xf32>,
      %c0_100 = arith.constant 0 : index
      %c0_101 = arith.constant 0 : index
      %118 = tpu.strided_load %arg18[%c0_100, %c0_101] {strides = array<i32: 2, 1>} : memref<16x32xf32, #tpu.memory_space<vmem>>, vector<7x32xf32>
      %c1_102 = arith.constant 1 : index
      %c0_103 = arith.constant 0 : index
      %119 = tpu.strided_load %arg18[%c1_102, %c0_103] {strides = array<i32: 2, 1>} : memref<16x32xf32, #tpu.memory_space<vmem>>, vector<7x32xf32>
      %120 = arith.maximumf %118, %119 : vector<7x32xf32>
      %121 = arith.truncf %120 : vector<7x32xf32> to vector<7x32xbf16>
      %c21_104 = arith.constant 21 : index
      %c0_105 = arith.constant 0 : index
      %122 = vector.load %arg19[%c21_104, %c0_105] : memref<56x32xbf16, #tpu.memory_space<vmem>>, vector<7x32xbf16>
      tpu.vector_store %arg19[%c21_104, %c0_105], %121 {strides = array<i32>} : memref<56x32xbf16, #tpu.memory_space<vmem>>, vector<7x32xbf16>,
      %c128 = arith.constant 128 : index
      %c0_106 = arith.constant 0 : index
      %123 = vector.load %arg17[%c128, %c0_106] : memref<224x32xf32, #tpu.memory_space<vmem>>, vector<16x32xf32>
      %c144 = arith.constant 144 : index
      %c0_107 = arith.constant 0 : index
      %124 = vector.load %arg17[%c144, %c0_107] : memref<224x32xf32, #tpu.memory_space<vmem>>, vector<16x32xf32>
      %125 = arith.maximumf %123, %124 : vector<16x32xf32>
      %c0_108 = arith.constant 0 : index
      %c0_109 = arith.constant 0 : index
      %126 = vector.load %arg18[%c0_108, %c0_109] : memref<16x32xf32, #tpu.memory_space<vmem>>, vector<16x32xf32>
      tpu.vector_store %arg18[%c0_108, %c0_109], %125 {strides = array<i32>} : memref<16x32xf32, #tpu.memory_space<vmem>>, vector<16x32xf32>,
      %c0_110 = arith.constant 0 : index
      %c0_111 = arith.constant 0 : index
      %127 = tpu.strided_load %arg18[%c0_110, %c0_111] {strides = array<i32: 2, 1>} : memref<16x32xf32, #tpu.memory_space<vmem>>, vector<7x32xf32>
      %c1_112 = arith.constant 1 : index
      %c0_113 = arith.constant 0 : index
      %128 = tpu.strided_load %arg18[%c1_112, %c0_113] {strides = array<i32: 2, 1>} : memref<16x32xf32, #tpu.memory_space<vmem>>, vector<7x32xf32>
      %129 = arith.maximumf %127, %128 : vector<7x32xf32>
      %130 = arith.truncf %129 : vector<7x32xf32> to vector<7x32xbf16>
      %c28 = arith.constant 28 : index
      %c0_114 = arith.constant 0 : index
      %131 = vector.load %arg19[%c28, %c0_114] : memref<56x32xbf16, #tpu.memory_space<vmem>>, vector<7x32xbf16>
      tpu.vector_store %arg19[%c28, %c0_114], %130 {strides = array<i32>} : memref<56x32xbf16, #tpu.memory_space<vmem>>, vector<7x32xbf16>,
      %c160 = arith.constant 160 : index
      %c0_115 = arith.constant 0 : index
      %132 = vector.load %arg17[%c160, %c0_115] : memref<224x32xf32, #tpu.memory_space<vmem>>, vector<16x32xf32>
      %c176 = arith.constant 176 : index
      %c0_116 = arith.constant 0 : index
      %133 = vector.load %arg17[%c176, %c0_116] : memref<224x32xf32, #tpu.memory_space<vmem>>, vector<16x32xf32>
      %134 = arith.maximumf %132, %133 : vector<16x32xf32>
      %c0_117 = arith.constant 0 : index
      %c0_118 = arith.constant 0 : index
      %135 = vector.load %arg18[%c0_117, %c0_118] : memref<16x32xf32, #tpu.memory_space<vmem>>, vector<16x32xf32>
      tpu.vector_store %arg18[%c0_117, %c0_118], %134 {strides = array<i32>} : memref<16x32xf32, #tpu.memory_space<vmem>>, vector<16x32xf32>,
      %c0_119 = arith.constant 0 : index
      %c0_120 = arith.constant 0 : index
      %136 = tpu.strided_load %arg18[%c0_119, %c0_120] {strides = array<i32: 2, 1>} : memref<16x32xf32, #tpu.memory_space<vmem>>, vector<7x32xf32>
      %c1_121 = arith.constant 1 : index
      %c0_122 = arith.constant 0 : index
      %137 = tpu.strided_load %arg18[%c1_121, %c0_122] {strides = array<i32: 2, 1>} : memref<16x32xf32, #tpu.memory_space<vmem>>, vector<7x32xf32>
      %138 = arith.maximumf %136, %137 : vector<7x32xf32>
      %139 = arith.truncf %138 : vector<7x32xf32> to vector<7x32xbf16>
      %c35 = arith.constant 35 : index
      %c0_123 = arith.constant 0 : index
      %140 = vector.load %arg19[%c35, %c0_123] : memref<56x32xbf16, #tpu.memory_space<vmem>>, vector<7x32xbf16>
      tpu.vector_store %arg19[%c35, %c0_123], %139 {strides = array<i32>} : memref<56x32xbf16, #tpu.memory_space<vmem>>, vector<7x32xbf16>,
      %c192 = arith.constant 192 : index
      %c0_124 = arith.constant 0 : index
      %141 = vector.load %arg17[%c192, %c0_124] : memref<224x32xf32, #tpu.memory_space<vmem>>, vector<16x32xf32>
      %c208 = arith.constant 208 : index
      %c0_125 = arith.constant 0 : index
      %142 = vector.load %arg17[%c208, %c0_125] : memref<224x32xf32, #tpu.memory_space<vmem>>, vector<16x32xf32>
      %143 = arith.maximumf %141, %142 : vector<16x32xf32>
      %c0_126 = arith.constant 0 : index
      %c0_127 = arith.constant 0 : index
      %144 = vector.load %arg18[%c0_126, %c0_127] : memref<16x32xf32, #tpu.memory_space<vmem>>, vector<16x32xf32>
      tpu.vector_store %arg18[%c0_126, %c0_127], %143 {strides = array<i32>} : memref<16x32xf32, #tpu.memory_space<vmem>>, vector<16x32xf32>,
      %c0_128 = arith.constant 0 : index
      %c0_129 = arith.constant 0 : index
      %145 = tpu.strided_load %arg18[%c0_128, %c0_129] {strides = array<i32: 2, 1>} : memref<16x32xf32, #tpu.memory_space<vmem>>, vector<7x32xf32>
      %c1_130 = arith.constant 1 : index
      %c0_131 = arith.constant 0 : index
      %146 = tpu.strided_load %arg18[%c1_130, %c0_131] {strides = array<i32: 2, 1>} : memref<16x32xf32, #tpu.memory_space<vmem>>, vector<7x32xf32>
      %147 = arith.maximumf %145, %146 : vector<7x32xf32>
      %148 = arith.truncf %147 : vector<7x32xf32> to vector<7x32xbf16>
      %c42 = arith.constant 42 : index
      %c0_132 = arith.constant 0 : index
      %149 = vector.load %arg19[%c42, %c0_132] : memref<56x32xbf16, #tpu.memory_space<vmem>>, vector<7x32xbf16>
      tpu.vector_store %arg19[%c42, %c0_132], %148 {strides = array<i32>} : memref<56x32xbf16, #tpu.memory_space<vmem>>, vector<7x32xbf16>,
      %c0_133 = arith.constant 0 : index
      %c0_134 = arith.constant 0 : index
      %150 = vector.load %arg19[%c0_133, %c0_134] : memref<56x32xbf16, #tpu.memory_space<vmem>>, vector<35x32xbf16>
      %c0_135 = arith.constant 0 : index
      %c0_136 = arith.constant 0 : index
      %151 = vector.load %arg5[%c0_135, %c0_136] : memref<288x64xbf16, #tpu.memory_space<vmem>>, vector<32x64xbf16>
      %cst_137 = arith.constant dense<0.000000e+00> : vector<35x64xf32>
      %152 = tpu.matmul %150, %151, %cst_137 {dimension_numbers = #tpu.dot_dimension_numbers<[1], [0], [0], [1], [0, 0, 1, 1], [], []>} : vector<35x32xbf16>, vector<32x64xbf16>, vector<35x64xf32> -> vector<35x64xf32>
      %c1_138 = arith.constant 1 : index
      %c0_139 = arith.constant 0 : index
      %153 = vector.load %arg19[%c1_138, %c0_139] : memref<56x32xbf16, #tpu.memory_space<vmem>>, vector<35x32xbf16>
      %c32_140 = arith.constant 32 : index
      %c0_141 = arith.constant 0 : index
      %154 = vector.load %arg5[%c32_140, %c0_141] : memref<288x64xbf16, #tpu.memory_space<vmem>>, vector<32x64xbf16>
      %cst_142 = arith.constant dense<0.000000e+00> : vector<35x64xf32>
      %155 = tpu.matmul %153, %154, %cst_142 {dimension_numbers = #tpu.dot_dimension_numbers<[1], [0], [0], [1], [0, 0, 1, 1], [], []>} : vector<35x32xbf16>, vector<32x64xbf16>, vector<35x64xf32> -> vector<35x64xf32>
      %156 = arith.addf %152, %155 : vector<35x64xf32>
      %c2_143 = arith.constant 2 : index
      %c0_144 = arith.constant 0 : index
      %157 = vector.load %arg19[%c2_143, %c0_144] : memref<56x32xbf16, #tpu.memory_space<vmem>>, vector<35x32xbf16>
      %c64_145 = arith.constant 64 : index
      %c0_146 = arith.constant 0 : index
      %158 = vector.load %arg5[%c64_145, %c0_146] : memref<288x64xbf16, #tpu.memory_space<vmem>>, vector<32x64xbf16>
      %cst_147 = arith.constant dense<0.000000e+00> : vector<35x64xf32>
      %159 = tpu.matmul %157, %158, %cst_147 {dimension_numbers = #tpu.dot_dimension_numbers<[1], [0], [0], [1], [0, 0, 1, 1], [], []>} : vector<35x32xbf16>, vector<32x64xbf16>, vector<35x64xf32> -> vector<35x64xf32>
      %160 = arith.addf %156, %159 : vector<35x64xf32>
      %c7_148 = arith.constant 7 : index
      %c0_149 = arith.constant 0 : index
      %161 = vector.load %arg19[%c7_148, %c0_149] : memref<56x32xbf16, #tpu.memory_space<vmem>>, vector<35x32xbf16>
      %c96_150 = arith.constant 96 : index
      %c0_151 = arith.constant 0 : index
      %162 = vector.load %arg5[%c96_150, %c0_151] : memref<288x64xbf16, #tpu.memory_space<vmem>>, vector<32x64xbf16>
      %cst_152 = arith.constant dense<0.000000e+00> : vector<35x64xf32>
      %163 = tpu.matmul %161, %162, %cst_152 {dimension_numbers = #tpu.dot_dimension_numbers<[1], [0], [0], [1], [0, 0, 1, 1], [], []>} : vector<35x32xbf16>, vector<32x64xbf16>, vector<35x64xf32> -> vector<35x64xf32>
      %164 = arith.addf %160, %163 : vector<35x64xf32>
      %c8 = arith.constant 8 : index
      %c0_153 = arith.constant 0 : index
      %165 = vector.load %arg19[%c8, %c0_153] : memref<56x32xbf16, #tpu.memory_space<vmem>>, vector<35x32xbf16>
      %c128_154 = arith.constant 128 : index
      %c0_155 = arith.constant 0 : index
      %166 = vector.load %arg5[%c128_154, %c0_155] : memref<288x64xbf16, #tpu.memory_space<vmem>>, vector<32x64xbf16>
      %cst_156 = arith.constant dense<0.000000e+00> : vector<35x64xf32>
      %167 = tpu.matmul %165, %166, %cst_156 {dimension_numbers = #tpu.dot_dimension_numbers<[1], [0], [0], [1], [0, 0, 1, 1], [], []>} : vector<35x32xbf16>, vector<32x64xbf16>, vector<35x64xf32> -> vector<35x64xf32>
      %168 = arith.addf %164, %167 : vector<35x64xf32>
      %c9_157 = arith.constant 9 : index
      %c0_158 = arith.constant 0 : index
      %169 = vector.load %arg19[%c9_157, %c0_158] : memref<56x32xbf16, #tpu.memory_space<vmem>>, vector<35x32xbf16>
      %c160_159 = arith.constant 160 : index
      %c0_160 = arith.constant 0 : index
      %170 = vector.load %arg5[%c160_159, %c0_160] : memref<288x64xbf16, #tpu.memory_space<vmem>>, vector<32x64xbf16>
      %cst_161 = arith.constant dense<0.000000e+00> : vector<35x64xf32>
      %171 = tpu.matmul %169, %170, %cst_161 {dimension_numbers = #tpu.dot_dimension_numbers<[1], [0], [0], [1], [0, 0, 1, 1], [], []>} : vector<35x32xbf16>, vector<32x64xbf16>, vector<35x64xf32> -> vector<35x64xf32>
      %172 = arith.addf %168, %171 : vector<35x64xf32>
      %c14_162 = arith.constant 14 : index
      %c0_163 = arith.constant 0 : index
      %173 = vector.load %arg19[%c14_162, %c0_163] : memref<56x32xbf16, #tpu.memory_space<vmem>>, vector<35x32xbf16>
      %c192_164 = arith.constant 192 : index
      %c0_165 = arith.constant 0 : index
      %174 = vector.load %arg5[%c192_164, %c0_165] : memref<288x64xbf16, #tpu.memory_space<vmem>>, vector<32x64xbf16>
      %cst_166 = arith.constant dense<0.000000e+00> : vector<35x64xf32>
      %175 = tpu.matmul %173, %174, %cst_166 {dimension_numbers = #tpu.dot_dimension_numbers<[1], [0], [0], [1], [0, 0, 1, 1], [], []>} : vector<35x32xbf16>, vector<32x64xbf16>, vector<35x64xf32> -> vector<35x64xf32>
      %176 = arith.addf %172, %175 : vector<35x64xf32>
      %c15_167 = arith.constant 15 : index
      %c0_168 = arith.constant 0 : index
      %177 = vector.load %arg19[%c15_167, %c0_168] : memref<56x32xbf16, #tpu.memory_space<vmem>>, vector<35x32xbf16>
      %c224 = arith.constant 224 : index
      %c0_169 = arith.constant 0 : index
      %178 = vector.load %arg5[%c224, %c0_169] : memref<288x64xbf16, #tpu.memory_space<vmem>>, vector<32x64xbf16>
      %cst_170 = arith.constant dense<0.000000e+00> : vector<35x64xf32>
      %179 = tpu.matmul %177, %178, %cst_170 {dimension_numbers = #tpu.dot_dimension_numbers<[1], [0], [0], [1], [0, 0, 1, 1], [], []>} : vector<35x32xbf16>, vector<32x64xbf16>, vector<35x64xf32> -> vector<35x64xf32>
      %180 = arith.addf %176, %179 : vector<35x64xf32>
      %c16_171 = arith.constant 16 : index
      %c0_172 = arith.constant 0 : index
      %181 = vector.load %arg19[%c16_171, %c0_172] : memref<56x32xbf16, #tpu.memory_space<vmem>>, vector<35x32xbf16>
      %c256 = arith.constant 256 : index
      %c0_173 = arith.constant 0 : index
      %182 = vector.load %arg5[%c256, %c0_173] : memref<288x64xbf16, #tpu.memory_space<vmem>>, vector<32x64xbf16>
      %cst_174 = arith.constant dense<0.000000e+00> : vector<35x64xf32>
      %183 = tpu.matmul %181, %182, %cst_174 {dimension_numbers = #tpu.dot_dimension_numbers<[1], [0], [0], [1], [0, 0, 1, 1], [], []>} : vector<35x32xbf16>, vector<32x64xbf16>, vector<35x64xf32> -> vector<35x64xf32>
      %184 = arith.addf %180, %183 : vector<35x64xf32>
      %185 = vector.broadcast %2 : vector<1x64xf32> to vector<35x64xf32>
      %186 = arith.mulf %184, %185 : vector<35x64xf32>
      %187 = vector.broadcast %3 : vector<1x64xf32> to vector<35x64xf32>
      %188 = arith.addf %186, %187 : vector<35x64xf32>
      %cst_175 = arith.constant 0.000000e+00 : f32
      %189 = vector.broadcast %cst_175 : f32 to vector<35x64xf32>
      %190 = arith.maximumf %188, %189 : vector<35x64xf32>
      %191 = vector.extract_strided_slice %190 {offsets = [0, 0], sizes = [7, 64], strides = [1, 1]} : vector<35x64xf32> to vector<7x64xf32>
      %192 = vector.extract_strided_slice %190 {offsets = [7, 0], sizes = [7, 64], strides = [1, 1]} : vector<35x64xf32> to vector<7x64xf32>
      %193 = arith.maximumf %191, %192 : vector<7x64xf32>
      %c0_176 = arith.constant 0 : index
      %c0_177 = arith.constant 0 : index
      %194 = vector.load %arg20[%c0_176, %c0_177] : memref<8x64xf32, #tpu.memory_space<vmem>>, vector<7x64xf32>
      tpu.vector_store %arg20[%c0_176, %c0_177], %193 {strides = array<i32>} : memref<8x64xf32, #tpu.memory_space<vmem>>, vector<7x64xf32>,
      %c0_178 = arith.constant 0 : index
      %c0_179 = arith.constant 0 : index
      %195 = tpu.strided_load %arg20[%c0_178, %c0_179] {strides = array<i32: 2, 1>} : memref<8x64xf32, #tpu.memory_space<vmem>>, vector<2x64xf32>
      %c1_180 = arith.constant 1 : index
      %c0_181 = arith.constant 0 : index
      %196 = tpu.strided_load %arg20[%c1_180, %c0_181] {strides = array<i32: 2, 1>} : memref<8x64xf32, #tpu.memory_space<vmem>>, vector<2x64xf32>
      %197 = arith.maximumf %195, %196 : vector<2x64xf32>
      %198 = arith.truncf %197 : vector<2x64xf32> to vector<2x64xbf16>
      %c5 = arith.constant 5 : index
      %c0_182 = arith.constant 0 : index
      %199 = vector.load %arg21[%c5, %c0_182] : memref<24x64xbf16, #tpu.memory_space<vmem>>, vector<2x64xbf16>
      tpu.vector_store %arg21[%c5, %c0_182], %198 {strides = array<i32>} : memref<24x64xbf16, #tpu.memory_space<vmem>>, vector<2x64xbf16>,
      %200 = vector.extract_strided_slice %190 {offsets = [14, 0], sizes = [7, 64], strides = [1, 1]} : vector<35x64xf32> to vector<7x64xf32>
      %201 = vector.extract_strided_slice %190 {offsets = [21, 0], sizes = [7, 64], strides = [1, 1]} : vector<35x64xf32> to vector<7x64xf32>
      %202 = arith.maximumf %200, %201 : vector<7x64xf32>
      %c0_183 = arith.constant 0 : index
      %c0_184 = arith.constant 0 : index
      %203 = vector.load %arg20[%c0_183, %c0_184] : memref<8x64xf32, #tpu.memory_space<vmem>>, vector<7x64xf32>
      tpu.vector_store %arg20[%c0_183, %c0_184], %202 {strides = array<i32>} : memref<8x64xf32, #tpu.memory_space<vmem>>, vector<7x64xf32>,
      %c0_185 = arith.constant 0 : index
      %c0_186 = arith.constant 0 : index
      %204 = tpu.strided_load %arg20[%c0_185, %c0_186] {strides = array<i32: 2, 1>} : memref<8x64xf32, #tpu.memory_space<vmem>>, vector<2x64xf32>
      %c1_187 = arith.constant 1 : index
      %c0_188 = arith.constant 0 : index
      %205 = tpu.strided_load %arg20[%c1_187, %c0_188] {strides = array<i32: 2, 1>} : memref<8x64xf32, #tpu.memory_space<vmem>>, vector<2x64xf32>
      %206 = arith.maximumf %204, %205 : vector<2x64xf32>
      %207 = arith.truncf %206 : vector<2x64xf32> to vector<2x64xbf16>
      %c9_189 = arith.constant 9 : index
      %c0_190 = arith.constant 0 : index
      %208 = vector.load %arg21[%c9_189, %c0_190] : memref<24x64xbf16, #tpu.memory_space<vmem>>, vector<2x64xbf16>
      tpu.vector_store %arg21[%c9_189, %c0_190], %207 {strides = array<i32>} : memref<24x64xbf16, #tpu.memory_space<vmem>>, vector<2x64xbf16>,
      %c0_191 = arith.constant 0 : index
      %c0_192 = arith.constant 0 : index
      %209 = vector.load %arg21[%c0_191, %c0_192] : memref<24x64xbf16, #tpu.memory_space<vmem>>, vector<8x64xbf16>
      %c0_193 = arith.constant 0 : index
      %c0_194 = arith.constant 0 : index
      %210 = vector.load %arg8[%c0_193, %c0_194] : memref<576x128xbf16, #tpu.memory_space<vmem>>, vector<64x128xbf16>
      %cst_195 = arith.constant dense<0.000000e+00> : vector<8x128xf32>
      %211 = tpu.matmul %209, %210, %cst_195 {dimension_numbers = #tpu.dot_dimension_numbers<[1], [0], [0], [1], [0, 0, 1, 1], [], []>} : vector<8x64xbf16>, vector<64x128xbf16>, vector<8x128xf32> -> vector<8x128xf32>
      %c1_196 = arith.constant 1 : index
      %c0_197 = arith.constant 0 : index
      %212 = vector.load %arg21[%c1_196, %c0_197] : memref<24x64xbf16, #tpu.memory_space<vmem>>, vector<8x64xbf16>
      %c64_198 = arith.constant 64 : index
      %c0_199 = arith.constant 0 : index
      %213 = vector.load %arg8[%c64_198, %c0_199] : memref<576x128xbf16, #tpu.memory_space<vmem>>, vector<64x128xbf16>
      %cst_200 = arith.constant dense<0.000000e+00> : vector<8x128xf32>
      %214 = tpu.matmul %212, %213, %cst_200 {dimension_numbers = #tpu.dot_dimension_numbers<[1], [0], [0], [1], [0, 0, 1, 1], [], []>} : vector<8x64xbf16>, vector<64x128xbf16>, vector<8x128xf32> -> vector<8x128xf32>
      %215 = arith.addf %211, %214 : vector<8x128xf32>
      %c2_201 = arith.constant 2 : index
      %c0_202 = arith.constant 0 : index
      %216 = vector.load %arg21[%c2_201, %c0_202] : memref<24x64xbf16, #tpu.memory_space<vmem>>, vector<8x64xbf16>
      %c128_203 = arith.constant 128 : index
      %c0_204 = arith.constant 0 : index
      %217 = vector.load %arg8[%c128_203, %c0_204] : memref<576x128xbf16, #tpu.memory_space<vmem>>, vector<64x128xbf16>
      %cst_205 = arith.constant dense<0.000000e+00> : vector<8x128xf32>
      %218 = tpu.matmul %216, %217, %cst_205 {dimension_numbers = #tpu.dot_dimension_numbers<[1], [0], [0], [1], [0, 0, 1, 1], [], []>} : vector<8x64xbf16>, vector<64x128xbf16>, vector<8x128xf32> -> vector<8x128xf32>
      %219 = arith.addf %215, %218 : vector<8x128xf32>
      %c4 = arith.constant 4 : index
      %c0_206 = arith.constant 0 : index
      %220 = vector.load %arg21[%c4, %c0_206] : memref<24x64xbf16, #tpu.memory_space<vmem>>, vector<8x64xbf16>
      %c192_207 = arith.constant 192 : index
      %c0_208 = arith.constant 0 : index
      %221 = vector.load %arg8[%c192_207, %c0_208] : memref<576x128xbf16, #tpu.memory_space<vmem>>, vector<64x128xbf16>
      %cst_209 = arith.constant dense<0.000000e+00> : vector<8x128xf32>
      %222 = tpu.matmul %220, %221, %cst_209 {dimension_numbers = #tpu.dot_dimension_numbers<[1], [0], [0], [1], [0, 0, 1, 1], [], []>} : vector<8x64xbf16>, vector<64x128xbf16>, vector<8x128xf32> -> vector<8x128xf32>
      %223 = arith.addf %219, %222 : vector<8x128xf32>
      %c5_210 = arith.constant 5 : index
      %c0_211 = arith.constant 0 : index
      %224 = vector.load %arg21[%c5_210, %c0_211] : memref<24x64xbf16, #tpu.memory_space<vmem>>, vector<8x64xbf16>
      %c256_212 = arith.constant 256 : index
      %c0_213 = arith.constant 0 : index
      %225 = vector.load %arg8[%c256_212, %c0_213] : memref<576x128xbf16, #tpu.memory_space<vmem>>, vector<64x128xbf16>
      %cst_214 = arith.constant dense<0.000000e+00> : vector<8x128xf32>
      %226 = tpu.matmul %224, %225, %cst_214 {dimension_numbers = #tpu.dot_dimension_numbers<[1], [0], [0], [1], [0, 0, 1, 1], [], []>} : vector<8x64xbf16>, vector<64x128xbf16>, vector<8x128xf32> -> vector<8x128xf32>
      %227 = arith.addf %223, %226 : vector<8x128xf32>
      %c6_215 = arith.constant 6 : index
      %c0_216 = arith.constant 0 : index
      %228 = vector.load %arg21[%c6_215, %c0_216] : memref<24x64xbf16, #tpu.memory_space<vmem>>, vector<8x64xbf16>
      %c320 = arith.constant 320 : index
      %c0_217 = arith.constant 0 : index
      %229 = vector.load %arg8[%c320, %c0_217] : memref<576x128xbf16, #tpu.memory_space<vmem>>, vector<64x128xbf16>
      %cst_218 = arith.constant dense<0.000000e+00> : vector<8x128xf32>
      %230 = tpu.matmul %228, %229, %cst_218 {dimension_numbers = #tpu.dot_dimension_numbers<[1], [0], [0], [1], [0, 0, 1, 1], [], []>} : vector<8x64xbf16>, vector<64x128xbf16>, vector<8x128xf32> -> vector<8x128xf32>
      %231 = arith.addf %227, %230 : vector<8x128xf32>
      %c8_219 = arith.constant 8 : index
      %c0_220 = arith.constant 0 : index
      %232 = vector.load %arg21[%c8_219, %c0_220] : memref<24x64xbf16, #tpu.memory_space<vmem>>, vector<8x64xbf16>
      %c384 = arith.constant 384 : index
      %c0_221 = arith.constant 0 : index
      %233 = vector.load %arg8[%c384, %c0_221] : memref<576x128xbf16, #tpu.memory_space<vmem>>, vector<64x128xbf16>
      %cst_222 = arith.constant dense<0.000000e+00> : vector<8x128xf32>
      %234 = tpu.matmul %232, %233, %cst_222 {dimension_numbers = #tpu.dot_dimension_numbers<[1], [0], [0], [1], [0, 0, 1, 1], [], []>} : vector<8x64xbf16>, vector<64x128xbf16>, vector<8x128xf32> -> vector<8x128xf32>
      %235 = arith.addf %231, %234 : vector<8x128xf32>
      %c9_223 = arith.constant 9 : index
      %c0_224 = arith.constant 0 : index
      %236 = vector.load %arg21[%c9_223, %c0_224] : memref<24x64xbf16, #tpu.memory_space<vmem>>, vector<8x64xbf16>
      %c448 = arith.constant 448 : index
      %c0_225 = arith.constant 0 : index
      %237 = vector.load %arg8[%c448, %c0_225] : memref<576x128xbf16, #tpu.memory_space<vmem>>, vector<64x128xbf16>
      %cst_226 = arith.constant dense<0.000000e+00> : vector<8x128xf32>
      %238 = tpu.matmul %236, %237, %cst_226 {dimension_numbers = #tpu.dot_dimension_numbers<[1], [0], [0], [1], [0, 0, 1, 1], [], []>} : vector<8x64xbf16>, vector<64x128xbf16>, vector<8x128xf32> -> vector<8x128xf32>
      %239 = arith.addf %235, %238 : vector<8x128xf32>
      %c10 = arith.constant 10 : index
      %c0_227 = arith.constant 0 : index
      %240 = vector.load %arg21[%c10, %c0_227] : memref<24x64xbf16, #tpu.memory_space<vmem>>, vector<8x64xbf16>
      %c512 = arith.constant 512 : index
      %c0_228 = arith.constant 0 : index
      %241 = vector.load %arg8[%c512, %c0_228] : memref<576x128xbf16, #tpu.memory_space<vmem>>, vector<64x128xbf16>
      %cst_229 = arith.constant dense<0.000000e+00> : vector<8x128xf32>
      %242 = tpu.matmul %240, %241, %cst_229 {dimension_numbers = #tpu.dot_dimension_numbers<[1], [0], [0], [1], [0, 0, 1, 1], [], []>} : vector<8x64xbf16>, vector<64x128xbf16>, vector<8x128xf32> -> vector<8x128xf32>
      %243 = arith.addf %239, %242 : vector<8x128xf32>
      %244 = vector.broadcast %4 : vector<1x128xf32> to vector<8x128xf32>
      %245 = arith.mulf %243, %244 : vector<8x128xf32>
      %246 = vector.broadcast %5 : vector<1x128xf32> to vector<8x128xf32>
      %247 = arith.addf %245, %246 : vector<8x128xf32>
      %cst_230 = arith.constant 0.000000e+00 : f32
      %248 = vector.broadcast %cst_230 : f32 to vector<8x128xf32>
      %249 = arith.maximumf %247, %248 : vector<8x128xf32>
      %250 = vector.extract_strided_slice %249 {offsets = [0, 0], sizes = [2, 128], strides = [1, 1]} : vector<8x128xf32> to vector<2x128xf32>
      %cst_231 = arith.constant dense<0.000000e+00> : vector<128xf32>
      %251 = vector.multi_reduction <add>, %250, %cst_231 [0] : vector<2x128xf32> to vector<128xf32>
      %252 = vector.shape_cast %251 : vector<128xf32> to vector<1x128xf32>
      %253 = vector.extract_strided_slice %249 {offsets = [4, 0], sizes = [2, 128], strides = [1, 1]} : vector<8x128xf32> to vector<2x128xf32>
      %cst_232 = arith.constant dense<0.000000e+00> : vector<128xf32>
      %254 = vector.multi_reduction <add>, %253, %cst_232 [0] : vector<2x128xf32> to vector<128xf32>
      %255 = vector.shape_cast %254 : vector<128xf32> to vector<1x128xf32>
      %256 = arith.addf %252, %255 : vector<1x128xf32>
      %cst_233 = arith.constant 2.500000e-01 : f32
      %257 = vector.broadcast %cst_233 : f32 to vector<1x128xf32>
      %258 = arith.mulf %256, %257 : vector<1x128xf32>
      %259 = arith.index_cast %arg22 : i32 to index
      %c0_234 = arith.constant 0 : index
      %260 = vector.load %arg16[%259, %c0_234] : memref<2x128xf32, #tpu.memory_space<vmem>>, vector<1x128xf32>
      tpu.vector_store %arg16[%259, %c0_234], %258 {strides = array<i32>} : memref<2x128xf32, #tpu.memory_space<vmem>>, vector<1x128xf32>,
    }
    %c2_i32_16 = arith.constant 2 : i32
    %c0_17 = arith.constant 0 : index
    %c0_18 = arith.constant 0 : index
    %11 = vector.load %arg16[%c0_17, %c0_18] : memref<2x128xf32, #tpu.memory_space<vmem>>, vector<2x128xf32>
    %12 = arith.truncf %11 : vector<2x128xf32> to vector<2x128xbf16>
    %c0_19 = arith.constant 0 : index
    %c0_20 = arith.constant 0 : index
    %13 = vector.load %arg11[%c0_19, %c0_20] : memref<128x512xbf16, #tpu.memory_space<vmem>>, vector<128x512xbf16>
    %cst_21 = arith.constant dense<0.000000e+00> : vector<2x512xf32>
    %14 = tpu.matmul %12, %13, %cst_21 {dimension_numbers = #tpu.dot_dimension_numbers<[1], [0], [0], [1], [0, 0, 1, 1], [], []>} : vector<2x128xbf16>, vector<128x512xbf16>, vector<2x512xf32> -> vector<2x512xf32>
    %c0_22 = arith.constant 0 : index
    %c0_23 = arith.constant 0 : index
    %15 = vector.load %arg12[%c0_22, %c0_23] : memref<1x512xf32, #tpu.memory_space<vmem>>, vector<1x512xf32>
    %16 = vector.broadcast %15 : vector<1x512xf32> to vector<2x512xf32>
    %17 = arith.addf %14, %16 : vector<2x512xf32>
    %cst_24 = arith.constant 0.000000e+00 : f32
    %18 = vector.broadcast %cst_24 : f32 to vector<2x512xf32>
    %19 = arith.maximumf %17, %18 : vector<2x512xf32>
    %20 = arith.truncf %19 : vector<2x512xf32> to vector<2x512xbf16>
    %c0_25 = arith.constant 0 : index
    %c0_26 = arith.constant 0 : index
    %21 = vector.load %arg13[%c0_25, %c0_26] : memref<512x128xbf16, #tpu.memory_space<vmem>>, vector<512x128xbf16>
    %cst_27 = arith.constant dense<0.000000e+00> : vector<2x128xf32>
    %22 = tpu.matmul %20, %21, %cst_27 {dimension_numbers = #tpu.dot_dimension_numbers<[1], [0], [0], [1], [0, 0, 1, 1], [], []>} : vector<2x512xbf16>, vector<512x128xbf16>, vector<2x128xf32> -> vector<2x128xf32>
    %c0_28 = arith.constant 0 : index
    %c0_29 = arith.constant 0 : index
    %23 = vector.load %arg14[%c0_28, %c0_29] : memref<1x128xf32, #tpu.memory_space<vmem>>, vector<1x128xf32>
    %24 = vector.broadcast %23 : vector<1x128xf32> to vector<2x128xf32>
    %25 = arith.addf %22, %24 : vector<2x128xf32>
    %c0_30 = arith.constant 0 : index
    %c0_31 = arith.constant 0 : index
    %26 = vector.load %arg15[%c0_30, %c0_31] : memref<2x128xf32, #tpu.memory_space<vmem>>, vector<2x128xf32>
    tpu.vector_store %arg15[%c0_30, %c0_31], %25 {strides = array<i32>} : memref<2x128xf32, #tpu.memory_space<vmem>>, vector<2x128xf32>,
    return
  }
  func.func @transform_0(%arg0: i32) -> (i32, i32, i32) {
    %c0_i32 = arith.constant 0 : i32
    %c0_i32_0 = arith.constant 0 : i32
    %c0_i32_1 = arith.constant 0 : i32
    return %arg0, %c0_i32, %c0_i32_0 : i32, i32, i32
  }
  func.func @transform_1(%arg0: i32) -> (i32, i32) {
    %c0_i32 = arith.constant 0 : i32
    %c0_i32_0 = arith.constant 0 : i32
    %c0_i32_1 = arith.constant 0 : i32
    return %c0_i32, %c0_i32_0 : i32, i32
  }
  func.func @transform_2(%arg0: i32) -> (i32, i32) {
    %c0_i32 = arith.constant 0 : i32
    %c0_i32_0 = arith.constant 0 : i32
    %c0_i32_1 = arith.constant 0 : i32
    return %c0_i32, %c0_i32_0 : i32, i32
  }
  func.func @transform_3(%arg0: i32) -> (i32, i32) {
    %c0_i32 = arith.constant 0 : i32
    %c0_i32_0 = arith.constant 0 : i32
    %c0_i32_1 = arith.constant 0 : i32
    return %c0_i32, %c0_i32_0 : i32, i32
  }
  func.func @transform_4(%arg0: i32) -> (i32, i32) {
    %c0_i32 = arith.constant 0 : i32
    %c0_i32_0 = arith.constant 0 : i32
    %c0_i32_1 = arith.constant 0 : i32
    return %c0_i32, %c0_i32_0 : i32, i32
  }
  func.func @transform_5(%arg0: i32) -> (i32, i32) {
    %c0_i32 = arith.constant 0 : i32
    %c0_i32_0 = arith.constant 0 : i32
    %c0_i32_1 = arith.constant 0 : i32
    return %c0_i32, %c0_i32_0 : i32, i32
  }
  func.func @transform_6(%arg0: i32) -> (i32, i32) {
    %c0_i32 = arith.constant 0 : i32
    %c0_i32_0 = arith.constant 0 : i32
    %c0_i32_1 = arith.constant 0 : i32
    return %c0_i32, %c0_i32_0 : i32, i32
  }
  func.func @transform_7(%arg0: i32) -> (i32, i32) {
    %c0_i32 = arith.constant 0 : i32
    %c0_i32_0 = arith.constant 0 : i32
    %c0_i32_1 = arith.constant 0 : i32
    return %c0_i32, %c0_i32_0 : i32, i32
  }
  func.func @transform_8(%arg0: i32) -> (i32, i32) {
    %c0_i32 = arith.constant 0 : i32
    %c0_i32_0 = arith.constant 0 : i32
    %c0_i32_1 = arith.constant 0 : i32
    return %c0_i32, %c0_i32_0 : i32, i32
  }
  func.func @transform_9(%arg0: i32) -> (i32, i32) {
    %c0_i32 = arith.constant 0 : i32
    %c0_i32_0 = arith.constant 0 : i32
    %c0_i32_1 = arith.constant 0 : i32
    return %c0_i32, %c0_i32_0 : i32, i32
  }
  func.func @transform_10(%arg0: i32) -> (i32, i32) {
    %c0_i32 = arith.constant 0 : i32
    %c0_i32_0 = arith.constant 0 : i32
    %c0_i32_1 = arith.constant 0 : i32
    return %c0_i32, %c0_i32_0 : i32, i32
  }
  func.func @transform_11(%arg0: i32) -> (i32, i32) {
    %c0_i32 = arith.constant 0 : i32
    %c0_i32_0 = arith.constant 0 : i32
    %c0_i32_1 = arith.constant 0 : i32
    return %c0_i32, %c0_i32_0 : i32, i32
  }
  func.func @transform_12(%arg0: i32) -> (i32, i32) {
    %c0_i32 = arith.constant 0 : i32
    %c0_i32_0 = arith.constant 0 : i32
    %c0_i32_1 = arith.constant 0 : i32
    return %c0_i32, %c0_i32_0 : i32, i32
  }
  func.func @transform_13(%arg0: i32) -> (i32, i32) {
    %c0_i32 = arith.constant 0 : i32
    %c0_i32_0 = arith.constant 0 : i32
    %c0_i32_1 = arith.constant 0 : i32
    return %c0_i32, %c0_i32_0 : i32, i32
  }
  func.func @transform_14(%arg0: i32) -> (i32, i32) {
    %c0_i32 = arith.constant 0 : i32
    %c0_i32_0 = arith.constant 0 : i32
    return %arg0, %c0_i32 : i32, i32
  }
  func.func @transform_15(%arg0: i32) -> (i32, i32) {
    %c0_i32 = arith.constant 0 : i32
    %c0_i32_0 = arith.constant 0 : i32
    return %arg0, %c0_i32 : i32, i32
  }
}

</mosaic_0001>

<bundles_post_ra>
// kernel: mnist_cnn_forward.1
= control target key start
LH: loop header
LB: loop body
LE: loop exit
PB: predicated region body
PF: predicated region fallthrough
CT: control target
= control target key end

     0   :  { %21 = vsyncpa [#allocation8], 0  ;;  %s9166_s0 = inlined_call_operand.vmem [shape: bf16[2,264,3], index: 0, kind: input, shape index: {}]   ;;  %s9167_s1 = inlined_call_operand.vmem [shape: bf16[27,32], index: 1, kind: input, shape index: {}]   ;;  %s9168_s2 = inlined_call_operand.vmem [shape: f32[1,32], index: 2, kind: input, shape index: {}]   ;;  %s9169_s3 = inlined_call_operand.vmem [shape: f32[1,32], index: 3, kind: input, shape index: {}]   ;;  %s9170_s4 = inlined_call_operand.vmem [shape: bf16[288,64], index: 4, kind: input, shape index: {}]   ;;  %s9171_s5 = inlined_call_operand.vmem [shape: f32[1,64], index: 5, kind: input, shape index: {}]   ;;  %s9172_s6 = inlined_call_operand.vmem [shape: f32[1,64], index: 6, kind: input, shape index: {}]   ;;  %s9173_s7 = inlined_call_operand.vmem [shape: bf16[576,128], index: 7, kind: input, shape index: {}]   ;;  %s9174_s8 = inlined_call_operand.vmem [shape: f32[1,128], index: 8, kind: input, shape index: {}]   ;;  %s9175_s9 = inlined_call_operand.vmem [shape: f32[1,128], index: 9, kind: input, shape index: {}]   ;;  %s9176_s10 = inlined_call_operand.vmem [shape: bf16[128,512], index: 10, kind: input, shape index: {}]   ;;  %s9177_s11 = inlined_call_operand.vmem [shape: f32[1,512], index: 11, kind: input, shape index: {}]   ;;  %s9178_s12 = inlined_call_operand.vmem [shape: bf16[512,128], index: 12, kind: input, shape index: {}]   ;;  %s9179_s13 = inlined_call_operand.vmem [shape: f32[1,128], index: 13, kind: input, shape index: {}]   ;;  %s9180_s14 = inlined_call_operand.hbm [shape: f32[2,128], index: 14, kind: output, shape index: {0}]   ;;  %s9181_s15 = inlined_call_operand.hbm [shape: f32[2,128], index: 15, kind: output, shape index: {1}]  }
   0x1   :  { %22 = vsyncpa [#allocation10], 0  ;;  %v7741_v0 = vld [vmem:[%s9168_s2] ss:$0 sm:$0xff]  ;;  %vm58_vm0 = vcmask 257024   ;;  %vm66_vm1 = vcmask 519168  }
   0x2   :  { %v7746_v1 = vld [vmem:[%s9169_s3] ss:$0 sm:$0xff]  ;;  %v7652_v6 = vmov 0   ;;  %s7785_s3 = smov 0  }
   0x3   :  { %v7751_v2 = vld [vmem:[%s9171_s5] ss:$0 sm:$0xff]  ;;  %59 = vst.msk [vmem:[#allocation4] sm:$0xf] %vm58_vm0, %v7652_v6  ;;  %60 = vst.msk [vmem:[#allocation4 + $0x4] sm:$0xf] %vm58_vm0, %v7652_v6 }
   0x4   :  { %v7756_v3 = vld [vmem:[%s9172_s6] ss:$0 sm:$0xff]  ;;  %61 = vst.msk [vmem:[#allocation4 + $0x8] sm:$0xf] %vm58_vm0, %v7652_v6  ;;  %62 = vst.msk [vmem:[#allocation4 + $0xc] sm:$0xf] %vm58_vm0, %v7652_v6 }
   0x5   :  { %v7761_v4 = vld [vmem:[%s9174_s8] ss:$0 sm:$0xff]  ;;  %63 = vst.msk [vmem:[#allocation4 + $0x10] sm:$0xf] %vm58_vm0, %v7652_v6  ;;  %64 = vst.msk [vmem:[#allocation4 + $0x14] sm:$0xf] %vm58_vm0, %v7652_v6 }
   0x6   :  { %v7766_v5 = vld [vmem:[%s9175_s9] ss:$0 sm:$0xff]  ;;  %65 = vst.msk [vmem:[#allocation4 + $0x18] sm:$0xf] %vm58_vm0, %v7652_v6 }
   0x7   :  { %67 = vst.msk [vmem:[#allocation6] sm:$0xf] %vm66_vm1, %v7652_v6  ;;  %68 = vst.msk [vmem:[#allocation6 + $0x4] sm:$0xf] %vm66_vm1, %v7652_v6 }
   0x8   :  { %69 = vst.msk [vmem:[#allocation6 + $0x8] sm:$0xf] %vm66_vm1, %v7652_v6 }
   0x9 LB: > { %v107_v7 = vld [vmem:[%s9167_s1] sm:$0x3]  ;;  %vm354_vm2 = vcmask 1040384   ;;  %vm355_vm3 = vcmask 1041408   ;;  %v7653_v8 = vmov 65535   ;;  %s6218_s8 = smul.u32 132, %s7650_s3  ;;  %s7650_s3 = sphi %s7785_s3, %s75_s3  }
   0xa   : > { %v356_v9 = vsel %vm354_vm2, 4294967295, %v7653_v8  ;;  %v7357_v11 = vld [vmem:[%s9167_s1] sm:$0x18]   ;;  %vm311_vm4 = vcmask 23552   ;;  %vm688_vm5 = vcmask 1046528   ;;  %vm7655_vm7 = vmmov 0  }
   0xb   : > { %v7795_v10 = vsel %vm355_vm3, %v356_v9, 0  ;;  %v7366_v13 = vld [vmem:[%s9167_s1 + $0x4] ss:$0 sps:$4 sm:$0x33]   ;;  %s7810_s19 = scalar_lea.vmem %s9166_s0, %s6218_s8  ;;  %v723_v14 = vrot.slane %v7357_v11, 3  ;;  %vm3093_vm8 = vcmask 261120  }
   0xc   : > { %v7802_v12 = vand.u32 %v7795_v10, %v107_v7  ;;  %v79_v15 = vld [vmem:[%s7810_s19] sm:$0xf]  ;;  %v80_v16 = vld [vmem:[%s7810_s19 + $0x4] sm:$0xf]  ;;  %v7819_v18 = vld [vmem:[%s7810_s19 + $0x8] sm:$0xff]   ;;  %v1047_v21 = vshll.u32 %v7366_v13, 16 }
   0xd   : > { %v7816_v17 = vcombine.low %v79_v15, %v80_v16  ;;  %v767_v19 = vand.u32 %v723_v14, %v7795_v10  ;;  %v7823_v20 = vld [vmem:[%s7810_s19 + $0x10] sm:$0xff]   ;;  %v1045_v22 = vshrl.u32 %v7366_v13, 16  ;;  %v7832_v24 = vld [vmem:[%s7810_s19 + $0x18] sm:$0xff]   ;;  %v7835_v26 = vld [vmem:[%s7810_s19 + $0x20] sm:$0xff]   ;;  %v690_v35 = vrot.slane %v7819_v18, 1  ;;  %s5127_s20 = scalar_lea.vmem [#allocation9], %s7650_s3 }
   0xe   : > { %6526 = vmatprep.subr.bf16.mxu0 %v7802_v12  ;;  %v1049_v23 = vrot.slane %v1047_v21, 1  ;;  %v7843_v28 = vld [vmem:[%s7810_s19 + $0x28] sm:$0xff]   ;;  %v7846_v29 = vld [vmem:[%s7810_s19 + $0x30] sm:$0xff]   ;;  %v682_v30 = vld [vmem:[%s7810_s19] sm:$0xe]  ;;  %v692_v39 = vrot.slane %v7823_v20, 1 }
   0xf   : > { %6527 = vmatpush3.bf16.msra.mxu0 %v7802_v12  ;;  %6528 = vmatprep.mubr.msk.bf16.mxu0 %vm311_vm4, %v7816_v17  ;;  %v7854_v31 = vld [vmem:[%s7810_s19 + $0x38] sm:$0xff]   ;;  %v7857_v32 = vld [vmem:[%s7810_s19 + $0x40] sm:$0xff]   ;;  %v5860_v33 = vcombine.low %v682_v30, %v80_v16  ;;  %v7865_v36 = vld [vmem:[%s7810_s19 + $0x48] sm:$0xff]   ;;  %v694_v40 = vrot.slane %v7832_v24, 1  ;;  %v696_v45 = vrot.slane %v7835_v26, 1  ;;  %v698_v46 = vrot.slane %v7843_v28, 1 }
  0x10   : > { %6556 = vmatprep.subr.bf16.mxu0 %v767_v19  ;;  %v1050_v25 = vor.u32 %v1049_v23, %v1045_v22  ;;  %v7374_v38 = vld [vmem:[%s9167_s1 + $0x4] ss:$0 sps:$4 sm:$0xcc]   ;;  %v693_v42 = vsel %vm688_vm5, %v690_v35, %v692_v39  ;;  %v700_v49 = vrot.slane %v7846_v29, 1  ;;  %v702_v50 = vrot.slane %v7854_v31, 1  ;;  %v7896_v55 = vld [vmem:[%s7810_s19 + $0x50] sm:$0xff]  }
  0x11   : > { %v689_v34 = vrot.slane %v5860_v33, 1  ;;  %v1491_v41 = vrot.slane %v7374_v38, 2  ;;  %v695_v43 = vsel %vm688_vm5, %v692_v39, %v694_v40  ;;  %v697_v47 = vsel %vm688_vm5, %v694_v40, %v696_v45  ;;  %v7900_v57 = vld [vmem:[%s7810_s19 + $0x58] sm:$0xff]   ;;  %v7908_v61 = vld [vmem:[%s7810_s19 + $0x60] sm:$0xff]   ;;  %v7911_v62 = vld [vmem:[%s7810_s19 + $0x68] sm:$0xff]   ;;  %s75_s3 = sadd.s32 1, %s7650_s3  }
  0x12   : > { %6529 = vmatmul.mubr.msk.bf16.vlgmr.msra.gmra.mrb[0].mxu0 %vm311_vm4, %v7819_v18  ;;  %v1094_v27 = vand.u32 %v1050_v25, %v7795_v10  ;;  %v699_v48 = vsel %vm688_vm5, %v696_v45, %v698_v46  ;;  %v701_v51 = vsel %vm688_vm5, %v698_v46, %v700_v49  ;;  %v703_v52 = vsel %vm688_vm5, %v700_v49, %v702_v50  ;;  %v7390_v7 = vld [vmem:[%s9167_s1 + $0x4] sm:$0x18]   ;;  %v7923_v13 = vld [vmem:[%s7810_s19 + $0x70] ss:$0 sps:$4 sm:$0x11]   ;;  %v7379_v40 = vld [vmem:[%s7810_s19 + $0x38] sm:$0xff]  }
  0x13   : > { %6557 = vmatpush3.bf16.msra.mxu0 %v767_v19  ;;  %6532 = vmatprep.mubr.msk.bf16.mxu0 %vm311_vm4, %v7823_v20  ;;  %v691_v37 = vsel %vm688_vm5, %v689_v34, %v690_v35  ;;  %v1535_v44 = vand.u32 %v1491_v41, %v7795_v10  ;;  %v704_v53 = vrot.slane %v7857_v32, 1  ;;  %v706_v54 = vrot.slane %v7865_v36, 1  ;;  %v7372_v25 = vld [vmem:[%s7810_s19 + $0x8] sm:$0xff]   ;;  %v7373_v30 = vld [vmem:[%s7810_s19 + $0x10] sm:$0xff]   ;;  %v7375_v34 = vld [vmem:[%s7810_s19 + $0x18] sm:$0xff]   ;;  %p72_p0 = scmp.ge.s32.totalorder %s75_s3, 2  }
  0x14   : > { %6586 = vmatprep.subr.bf16.mxu0 %v1094_v27  ;;  %v708_v59 = vrot.slane %v7896_v55, 1  ;;  %v710_v60 = vrot.slane %v7900_v57, 1  ;;  %v712_v9 = vrot.slane %v7908_v61, 1  ;;  %v714_v11 = vrot.slane %v7911_v62, 1  ;;  %v7377_v38 = vld [vmem:[%s7810_s19 + $0x28] sm:$0xff]   ;;  %v7378_v39 = vld [vmem:[%s7810_s19 + $0x30] sm:$0xff]  }
  0x15   : > { %v705_v56 = vsel %vm688_vm5, %v702_v50, %v704_v53  ;;  %v707_v58 = vsel %vm688_vm5, %v704_v53, %v706_v54  ;;  %v1751_v14 = vshrl.u32 %v7390_v7, 16  ;;  %v1754_v15 = vshll.u32 %v7390_v7, 16  ;;  %v7380_v41 = vld [vmem:[%s7810_s19 + $0x40] sm:$0xff]   ;;  %v7382_v45 = vld [vmem:[%s7810_s19 + $0x50] sm:$0xff]   ;;  %v7383_v46 = vld [vmem:[%s7810_s19 + $0x58] sm:$0xff]  }
  0x16   : > { %v709_v63 = vsel %vm688_vm5, %v706_v54, %v708_v59  ;;  %v711_v8 = vsel %vm688_vm5, %v708_v59, %v710_v60  ;;  %v713_v16 = vsel %vm688_vm5, %v710_v60, %v712_v9  ;;  %v715_v19 = vsel %vm688_vm5, %v712_v9, %v714_v11  ;;  %v7384_v50 = vld [vmem:[%s7810_s19 + $0x60] sm:$0xff]  }
  0x17   : > { %v716_v21 = vrot.slane %v7923_v13, 1  ;;  %v1753_v22 = vrot.slane %v1751_v14, 3  ;;  %v1756_v23 = vrot.slane %v1754_v15, 4  ;;  %v7975_v60 = vld [vmem:[%s7810_s19 + $0x20] sm:$0xff]   ;;  %vm183_vm6 = vsmask.f32 7424 }
  0x18   : > { %v1396_v14 = vshll.u32 %v7975_v60, 16  ;;  %v7404_v15 = vld [vmem:[%s9167_s1 + $0x8] ss:$0 sps:$4 sm:$0x66]   ;;  %vm3136_vm9 = vsmask.f32 3328 }
  0x19   : > { %v1757_v33 = vor.u32 %v1756_v23, %v1753_v22  ;;  %vm8487_vm10 = vmand %vm58_vm0, %vm3136_vm9  ;;  %vm3167_vm11 = vcmask 257027   ;;  %vm3168_vm12 = vsmask.f32 7950  ;;  %vm3173_vm14 = vcmask 256000  }
  0x1a   : > { %6533 = vmatmul.mubr.msk.bf16.gmra.mrb[4].mxu0 %vm311_vm4, %v7832_v24  ;;  %v1398_v23 = vrot.slane %v1396_v14, 1  ;;  %vm8521_vm13 = vmand %vm3167_vm11, %vm3168_vm12  ;;  %vm3197_vm15 = vsmask.f32 2304  ;;  %vm3229_vm9 = vsmask.f32 7946 }
  0x1b   : > { %6536 = vmatprep.mubr.msk.bf16.mxu0 %vm311_vm4, %v7835_v26  ;;  %v7937_v35 = vand.u32 %v1757_v33, %v7795_v10  ;;  %vm3198_vm1 = vmand %vm3173_vm14, %vm3197_vm15  ;;  %vm3258_vm12 = vsmask.f32 1280  ;;  %vm3290_vm15 = vsmask.f32 7942 }
  0x22   : > { %6537 = vmatmul.mubr.msk.bf16.gmra.mrb[8].mxu0 %vm311_vm4, %v7843_v28 }
  0x23   : > { %6540 = vmatprep.mubr.msk.bf16.mxu0 %vm311_vm4, %v7846_v29 }
  0x2a   : > { %6541 = vmatmul.mubr.msk.bf16.gmra.mrb[12].mxu0 %vm311_vm4, %v7854_v31 }
  0x2b   : > { %6544 = vmatprep.mubr.msk.bf16.mxu0 %vm311_vm4, %v7857_v32 }
  0x32   : > { %6545 = vmatmul.mubr.msk.bf16.gmra.mrb[16].mxu0 %vm311_vm4, %v7865_v36 }
  0x33   : > { %6558 = vmatprep.mubr.msk.bf16.mxu0 %vm311_vm4, %v691_v37  ;;  %v7376_v37 = vld [vmem:[%s7810_s19 + $0x20] sm:$0xff]  }
  0x3a   : > { %6559 = vmatmul.mubr.msk.bf16.vlgmr.msra.gmra.mrb[0].mxu0 %vm311_vm4, %v693_v42  ;;  %v7381_v42 = vld [vmem:[%s7810_s19 + $0x48] sm:$0xff]  }
  0x3b   : > { %6587 = vmatpush3.bf16.msra.mxu0 %v1094_v27  ;;  %6562 = vmatprep.mubr.msk.bf16.mxu0 %vm311_vm4, %v695_v43  ;;  %v717_v27 = vsel %vm688_vm5, %v714_v11, %v716_v21  ;;  %v1269_v43 = vld [vmem:[%s7810_s19 + $0x8] sm:$0xf] }
  0x3c   : > { %6616 = vmatprep.subr.bf16.mxu0 %v1535_v44 }
  0x42   : > { %6563 = vmatmul.mubr.msk.bf16.gmra.mrb[4].mxu0 %vm311_vm4, %v697_v47 }
  0x43   : > { %6566 = vmatprep.mubr.msk.bf16.mxu0 %vm311_vm4, %v699_v48  ;;  %v7964_v48 = vld [vmem:[%s7810_s19 + $0x10] sm:$0xff]  }
  0x44   : > { %v1380_v54 = vshll.u32 %v7964_v48, 16 }
  0x46   : > { %v1382_v59 = vrot.slane %v1380_v54, 1 }
  0x4a   : > { %6567 = vmatmul.mubr.msk.bf16.gmra.mrb[8].mxu0 %vm311_vm4, %v701_v51  ;;  %v7385_v51 = vld [vmem:[%s7810_s19 + $0x68] sm:$0xff]  }
  0x4b   : > { %6570 = vmatprep.mubr.msk.bf16.mxu0 %vm311_vm4, %v703_v52 }
  0x52   : > { %6571 = vmatmul.mubr.msk.bf16.gmra.mrb[12].mxu0 %vm311_vm4, %v705_v56  ;;  %v7971_v56 = vld [vmem:[%s7810_s19 + $0x18] sm:$0xff]  }
  0x53   : > { %6574 = vmatprep.mubr.msk.bf16.mxu0 %vm311_vm4, %v707_v58  ;;  %v1388_v7 = vshll.u32 %v7971_v56, 16  ;;  %v1392_v11 = vshrl.u32 %v7971_v56, 16 }
  0x5a   : > { %6575 = vmatmul.mubr.msk.bf16.gmra.mrb[16].mxu0 %vm311_vm4, %v709_v63  ;;  %v7386_v63 = vld [vmem:[%s7810_s19 + $0x70] sm:$0xff]  }
  0x5b   : > { %6578 = vmatprep.mubr.msk.bf16.mxu0 %vm311_vm4, %v711_v8  ;;  %v1384_v8 = vshrl.u32 %v7964_v48, 16 }
  0x5d   : > { %v1386_v21 = vor.u32 %v1384_v8, %v1382_v59  ;;  %v8025_v8 = vld [vmem:[%s7810_s19 + $0x50] sm:$0xff]  }
  0x62   : > { %6579 = vmatmul.mubr.msk.bf16.gmra.mrb[20].mxu0 %vm311_vm4, %v713_v16  ;;  %v1390_v16 = vrot.slane %v1388_v7, 1 }
  0x63   : > { %6582 = vmatprep.mubr.msk.bf16.mxu0 %vm311_vm4, %v715_v19  ;;  %v7988_v19 = vld [vmem:[%s7810_s19 + $0x28] sm:$0xff]  }
  0x64   : > { %v1394_v22 = vor.u32 %v1392_v11, %v1390_v16  ;;  %v1391_v33 = vsel %vm183_vm6, %v1386_v21, %v1390_v16  ;;  %v1444_v21 = vshll.u32 %v8025_v8, 16 }
  0x6a   : > { %6583 = vmatmul.mubr.msk.bf16.gmra.mrb[24].mxu0 %vm311_vm4, %v717_v27  ;;  %v2078_v27 = vrot.slane %v7404_v15, 1 }
  0x6b   : > { %6588 = vmatprep.mubr.msk.bf16.mxu0 %vm311_vm4, %v7372_v25  ;;  %v7992_v25 = vld [vmem:[%s7810_s19 + $0x30] sm:$0xff]  }
  0x72   : > { %6589 = vmatmul.mubr.msk.bf16.vlgmr.msra.gmra.mrb[0].mxu0 %vm311_vm4, %v7373_v30  ;;  %v1404_v30 = vshll.u32 %v7988_v19, 16 }
  0x73   : > { %6617 = vmatpush3.bf16.msra.mxu0 %v1535_v44  ;;  %6592 = vmatprep.mubr.msk.bf16.mxu0 %vm311_vm4, %v7375_v34  ;;  %v7956_v44 = vld [vmem:[%s7810_s19 + $0xc] sm:$0xf]  ;;  %v1400_v34 = vshrl.u32 %v7975_v60, 16 }
  0x74   : > { %6646 = vmatprep.subr.bf16.mxu0 %v7937_v35  ;;  %v5905_v47 = vcombine.low %v1269_v43, %v7956_v44 }
  0x75   : > { %v1402_v43 = vor.u32 %v1400_v34, %v1398_v23  ;;  %v8039_v34 = vld [vmem:[%s7810_s19 + $0x60] sm:$0xff]  }
  0x76   : > { %v1375_v49 = vshll.u32 %v5905_v47, 16  ;;  %v1373_v52 = vshrl.u32 %v5905_v47, 16  ;;  %v8010_v47 = vld [vmem:[%s7810_s19 + $0x40] sm:$0xff]  }
  0x77   : > { %v1432_v14 = vshrl.u32 %v8010_v47, 16 }
  0x78   : > { %v1377_v53 = vrot.slane %v1375_v49, 1 }
  0x7a   : > { %6593 = vmatmul.mubr.msk.bf16.gmra.mrb[4].mxu0 %vm311_vm4, %v7376_v37  ;;  %v1378_v58 = vor.u32 %v1377_v53, %v1373_v52  ;;  %v1399_v37 = vsel %vm183_vm6, %v1394_v22, %v1398_v23  ;;  %v1428_v53 = vshll.u32 %v8010_v47, 16  ;;  %v8035_v23 = vld [vmem:[%s7810_s19 + $0x58] sm:$0xff]  }
  0x7b   : > { %6596 = vmatprep.mubr.msk.bf16.mxu0 %vm311_vm4, %v7377_v38  ;;  %v1408_v38 = vshrl.u32 %v7988_v19, 16 }
  0x7c   : > { %v1383_v9 = vsel %vm183_vm6, %v1378_v58, %v1382_v59  ;;  %v8021_v58 = vld [vmem:[%s7810_s19 + $0x48] sm:$0xff]   ;;  %v1430_v7 = vrot.slane %v1428_v53, 1 }
  0x7d   : > { %v1440_v16 = vshrl.u32 %v8021_v58, 16 }
  0x82   : > { %6597 = vmatmul.mubr.msk.bf16.gmra.mrb[8].mxu0 %vm311_vm4, %v7378_v39  ;;  %v1412_v39 = vshll.u32 %v7992_v25, 16 }
  0x83   : > { %6600 = vmatprep.mubr.msk.bf16.mxu0 %vm311_vm4, %v7379_v40  ;;  %v8001_v40 = vand.u32 %v2078_v27, %v7795_v10  ;;  %v1434_v27 = vor.u32 %v1432_v14, %v1430_v7 }
  0x8a   : > { %6601 = vmatmul.mubr.msk.bf16.gmra.mrb[12].mxu0 %vm311_vm4, %v7380_v41  ;;  %v1406_v41 = vrot.slane %v1404_v30, 1 }
  0x8b   : > { %6604 = vmatprep.mubr.msk.bf16.mxu0 %vm311_vm4, %v7381_v42  ;;  %v8005_v42 = vld [vmem:[%s7810_s19 + $0x38] sm:$0xff]  }
  0x8c   : > { %v1420_v49 = vshll.u32 %v8005_v42, 16 }
  0x8e   : > { %v1422_v54 = vrot.slane %v1420_v49, 1  ;;  %v8049_v49 = vld [vmem:[%s7810_s19 + $0x68] sm:$0xff]  }
  0x8f   : > { %v1468_v53 = vshll.u32 %v8049_v49, 16 }
  0x92   : > { %6605 = vmatmul.mubr.msk.bf16.gmra.mrb[16].mxu0 %vm311_vm4, %v7382_v45  ;;  %v1410_v45 = vor.u32 %v1408_v38, %v1406_v41 }
  0x93   : > { %6608 = vmatprep.mubr.msk.bf16.mxu0 %vm311_vm4, %v7383_v46  ;;  %v1414_v46 = vrot.slane %v1412_v39, 1  ;;  %v1448_v39 = vshrl.u32 %v8025_v8, 16 }
  0x95   : > { %v1415_v52 = vsel %vm183_vm6, %v1410_v45, %v1414_v46  ;;  %v1460_v45 = vshll.u32 %v8039_v34, 16 }
  0x9a   : > { %6609 = vmatmul.mubr.msk.bf16.gmra.mrb[20].mxu0 %vm311_vm4, %v7384_v50  ;;  %v1407_v50 = vsel %vm183_vm6, %v1402_v43, %v1406_v41  ;;  %v1456_v43 = vshrl.u32 %v8035_v23, 16 }
  0x9b   : > { %6612 = vmatprep.mubr.msk.bf16.mxu0 %vm311_vm4, %v7385_v51  ;;  %v1416_v51 = vshrl.u32 %v7992_v25, 16 }
  0x9d   : > { %v1418_v59 = vor.u32 %v1416_v51, %v1414_v46 }
  0x9f   : > { %v1423_v11 = vsel %vm183_vm6, %v1418_v59, %v1422_v54  ;;  %v1464_v59 = vshrl.u32 %v8039_v34, 16 }
  0xa2   : > { %6613 = vmatmul.mubr.msk.bf16.gmra.mrb[24].mxu0 %vm311_vm4, %v7386_v63 }
  0xa3   : > { %6618 = vmatprep.mubr.msk.bf16.mxu0 %vm311_vm4, %v1383_v9  ;;  %v1436_v9 = vshll.u32 %v8021_v58, 16 }
  0xa5   : > { %v1438_v22 = vrot.slane %v1436_v9, 1 }
  0xa7   : > { %v1442_v30 = vor.u32 %v1440_v16, %v1438_v22  ;;  %v1439_v38 = vsel %vm183_vm6, %v1434_v27, %v1438_v22  ;;  %v1710_v22 = vld [vmem:[%s7810_s19 + $0x8] sm:$0xe] }
  0xaa   : > { %6619 = vmatmul.mubr.msk.bf16.vlgmr.msra.gmra.mrb[0].mxu0 %vm311_vm4, %v1391_v33  ;;  %v1446_v33 = vrot.slane %v1444_v21, 1 }
  0xab   : > { %6647 = vmatpush3.bf16.msra.mxu0 %v7937_v35  ;;  %6622 = vmatprep.mubr.msk.bf16.mxu0 %vm311_vm4, %v1399_v37  ;;  %v1424_v35 = vshrl.u32 %v8005_v42, 16  ;;  %v1452_v37 = vshll.u32 %v8035_v23, 16 }
  0xac   : > { %6676 = vmatprep.subr.bf16.mxu0 %v8001_v40  ;;  %v1447_v41 = vsel %vm183_vm6, %v1442_v30, %v1446_v33 }
  0xad   : > { %v1426_v63 = vor.u32 %v1424_v35, %v1422_v54  ;;  %v1454_v46 = vrot.slane %v1452_v37, 1  ;;  %v8053_v35 = vld [vmem:[%s7810_s19 + $0x70] sm:$0xff]  }
  0xae   : > { %v1476_v9 = vshll.u32 %v8053_v35, 16  ;;  %v1480_v30 = vshrl.u32 %v8053_v35, 16 }
  0xaf   : > { %v1431_v15 = vsel %vm183_vm6, %v1426_v63, %v1430_v7  ;;  %v1458_v51 = vor.u32 %v1456_v43, %v1454_v46  ;;  %v1472_v7 = vshrl.u32 %v8049_v49, 16 }
  0xb0   : > { %v1478_v21 = vrot.slane %v1476_v9, 1  ;;  %v1721_v9 = vrot.slane %v7975_v60, 1 }
  0xb2   : > { %6623 = vmatmul.mubr.msk.bf16.gmra.mrb[4].mxu0 %vm311_vm4, %v1407_v50  ;;  %v1450_v50 = vor.u32 %v1448_v39, %v1446_v33  ;;  %v7407_v39 = vld [vmem:[%s9167_s1 + $0x8] ss:$0 sps:$4 sm:$0xcc]  }
  0xb3   : > { %6626 = vmatprep.mubr.msk.bf16.mxu0 %vm311_vm4, %v1415_v52  ;;  %v1462_v52 = vrot.slane %v1460_v45, 1 }
  0xb4   : > { %v1455_v54 = vsel %vm183_vm6, %v1450_v50, %v1454_v46  ;;  %v1717_v46 = vrot.slane %v7964_v48, 1  ;;  %v2520_v50 = vshrl.u32 %v7407_v39, 16 }
  0xb5   : > { %v1463_v63 = vsel %vm183_vm6, %v1458_v51, %v1462_v52  ;;  %v1466_v14 = vor.u32 %v1464_v59, %v1462_v52  ;;  %v2523_v51 = vshll.u32 %v7407_v39, 16  ;;  %v7427_v59 = vld [vmem:[%s9167_s1] ss:$0 sps:$4 sm:$0x66]  }
  0xb6   : > { %v307_v48 = vshll.u32 %v7427_v59, 16 }
  0xba   : > { %6627 = vmatmul.mubr.msk.bf16.gmra.mrb[8].mxu0 %vm311_vm4, %v1423_v11  ;;  %v1470_v11 = vrot.slane %v1468_v53, 1 }
  0xbb   : > { %6630 = vmatprep.mubr.msk.bf16.mxu0 %vm311_vm4, %v1431_v15  ;;  %v8064_v15 = vld [vmem:[%s7810_s19 + $0x78] ss:$0 sps:$4 sm:$0x11]  }
  0xbc   : > { %v1474_v16 = vor.u32 %v1472_v7, %v1470_v11  ;;  %v1471_v27 = vsel %vm183_vm6, %v1466_v14, %v1470_v11  ;;  %v1484_v33 = vshll.u32 %v8064_v15, 16  ;;  %v304_v7 = vshrl.u32 %v7427_v59, 16 }
  0xbd   : > { %v216_v59 = vshll.u32 %v7835_v26, 16  ;;  %v224_v26 = vshll.u32 %v7843_v28, 16 }
  0xbe   : > { %v1479_v37 = vsel %vm183_vm6, %v1474_v16, %v1478_v21  ;;  %v1486_v43 = vrot.slane %v1484_v33, 1  ;;  %v306_v14 = vrot.slane %v304_v7, 1  ;;  %v309_v16 = vrot.slane %v307_v48, 2 }
  0xbf   : > { %v187_v33 = vshll.u32 %v7816_v17, 16  ;;  %v1729_v48 = vrot.slane %v8010_v47, 1  ;;  %v226_v47 = vrot.slane %v224_v26, 1  ;;  %v280_v26 = vshll.u32 %v7908_v61, 16 }
  0xc1   : > { %v189_v60 = vrot.slane %v187_v33, 1  ;;  %v1731_v33 = vrot.slane %v8021_v58, 1  ;;  %v7514_v58 = vld [vmem:[%s7810_s19 + $0x30] sm:$0xff]  }
  0xc2   : > { %6631 = vmatmul.mubr.msk.bf16.gmra.mrb[12].mxu0 %vm311_vm4, %v1439_v38  ;;  %v5935_v38 = vcombine.low %v1710_v22, %v7956_v44  ;;  %v2522_v44 = vrot.slane %v2520_v50, 2  ;;  %v310_v22 = vor.u32 %v309_v16, %v306_v14 }
  0xc3   : > { %6634 = vmatprep.mubr.msk.bf16.mxu0 %vm311_vm4, %v1447_v41  ;;  %v1482_v41 = vor.u32 %v1480_v30, %v1478_v21 }
  0xc4   : > { %v1716_v45 = vrot.slane %v5935_v38, 1  ;;  %v185_v38 = vshrl.u32 %v7816_v17, 16 }
  0xc5   : > { %v1487_v52 = vsel %vm183_vm6, %v1482_v41, %v1486_v43  ;;  %v196_v41 = vshrl.u32 %v7819_v18, 16  ;;  %v200_v43 = vshll.u32 %v7823_v20, 16 }
  0xc6   : > { %v1718_v53 = vsel %vm688_vm5, %v1716_v45, %v1717_v46  ;;  %v1723_v45 = vrot.slane %v7988_v19, 1  ;;  %v190_v17 = vor.u32 %v189_v60, %v185_v38 }
  0xca   : > { %6635 = vmatmul.mubr.msk.bf16.gmra.mrb[16].mxu0 %vm311_vm4, %v1455_v54  ;;  %v2525_v54 = vrot.slane %v2523_v51, 3  ;;  %v202_v51 = vrot.slane %v200_v43, 1  ;;  %v1732_v43 = vsel %vm688_vm5, %v1729_v48, %v1731_v33 }
  0xcb   : > { %6638 = vmatprep.mubr.msk.bf16.mxu0 %vm311_vm4, %v1463_v63  ;;  %v1719_v63 = vrot.slane %v7971_v56, 1  ;;  %v359_v56 = vand.u32 %v7795_v10, %v310_v22  ;;  %v228_v22 = vshrl.u32 %v7843_v28, 16 }
  0xcc   : > { %v2526_v11 = vor.u32 %v2525_v54, %v2522_v44  ;;  %v212_v54 = vshrl.u32 %v7832_v24, 16 }
  0xcd   : > { %v1720_v21 = vsel %vm688_vm5, %v1717_v46, %v1719_v63  ;;  %v1725_v46 = vrot.slane %v7992_v25, 1  ;;  %6496 = vmatprep.subr.bf16.mxu1 %v359_v56  ;;  %v208_v25 = vshll.u32 %v7832_v24, 16  ;;  %v230_v38 = vor.u32 %v228_v22, %v226_v47 }
  0xce   : > { %v8090_v30 = vand.u32 %v2526_v11, %v7795_v10  ;;  %6497 = vmatpush3.bf16.msra.mxu1 %v359_v56  ;;  %v218_v11 = vrot.slane %v216_v59, 1  ;;  %v1733_v56 = vrot.slane %v8025_v8, 1  ;;  %v1739_v59 = vrot.slane %v8049_v49, 1 }
  0xcf   : > { %7018 = vmatprep.subr.bf16.mxu1 %v7802_v12  ;;  %v1726_v19 = vsel %vm688_vm5, %v1723_v45, %v1725_v46  ;;  %v210_v44 = vrot.slane %v208_v25, 1  ;;  %v272_v49 = vshll.u32 %v7900_v57, 16  ;;  %v282_v22 = vrot.slane %v280_v26, 1 }
  0xd0   : > { %v1734_v28 = vsel %vm688_vm5, %v1731_v33, %v1733_v56 }
  0xd2   : > { %6639 = vmatmul.mubr.msk.bf16.gmra.mrb[20].mxu0 %vm311_vm4, %v1471_v27  ;;  %v1722_v27 = vsel %vm688_vm5, %v1719_v63, %v1721_v9  ;;  %v1727_v63 = vrot.slane %v8005_v42, 1  ;;  %v7513_v42 = vld [vmem:[%s7810_s19 + $0x20] sm:$0xff]  }
  0xd3   : > { %6642 = vmatprep.mubr.msk.bf16.mxu0 %vm311_vm4, %v1479_v37  ;;  %v192_v37 = vshll.u32 %v7819_v18, 16 }
  0xd4   : > { %v1728_v16 = vsel %vm688_vm5, %v1725_v46, %v1727_v63  ;;  %v1730_v24 = vsel %vm688_vm5, %v1727_v63, %v1729_v48  ;;  %v244_v46 = vshrl.u32 %v7854_v31, 16 }
  0xd5   : > { %v194_v39 = vrot.slane %v192_v37, 1 }
  0xd7   : > { %v198_v50 = vor.u32 %v196_v41, %v194_v39  ;;  %v195_v18 = vsel %vm183_vm6, %v190_v17, %v194_v39  ;;  %v248_v17 = vshll.u32 %v7857_v32, 16  ;;  %v256_v32 = vshll.u32 %v7865_v36, 16 }
  0xd8   : > { %6498 = vmatprep.mubr.msk.bf16.mxu1 %vm311_vm4, %v195_v18  ;;  %v1737_v18 = vrot.slane %v8039_v34, 1 }
  0xd9   : > { %v203_v20 = vsel %vm183_vm6, %v198_v50, %v202_v51  ;;  %v1735_v50 = vrot.slane %v8035_v23, 1  ;;  %v7515_v23 = vld [vmem:[%s7810_s19 + $0x40] sm:$0xff]   ;;  %v258_v34 = vrot.slane %v256_v32, 1 }
  0xda   : > { %6643 = vmatmul.mubr.msk.bf16.gmra.mrb[24].mxu0 %vm311_vm4, %v1487_v52  ;;  %6499 = vmatmul.mubr.msk.bf16.vlgmr.msra.gmra.mrb[0].mxu1 %vm311_vm4, %v203_v20  ;;  %v7512_v52 = vld [vmem:[%s7810_s19 + $0x10] sm:$0xff]  }
  0xdb   : > { %6648 = vmatprep.mubr.msk.bf16.mxu0 %vm311_vm4, %v1718_v53  ;;  %v204_v53 = vshrl.u32 %v7512_v52, 16  ;;  %7019 = vmatpush3.bf16.msra.mxu1 %v7802_v12  ;;  %v1736_v52 = vsel %vm688_vm5, %v1733_v56, %v1735_v50  ;;  %v7405_v56 = vld [vmem:[%s7810_s19 + $0x10] sm:$0xff]  }
  0xdd   : > { %v206_v7 = vor.u32 %v204_v53, %v202_v51  ;;  %v252_v53 = vshrl.u32 %v7515_v23, 16 }
  0xdf   : > { %v211_v14 = vsel %vm183_vm6, %v206_v7, %v210_v44  ;;  %v1741_v7 = vrot.slane %v8053_v35, 1  ;;  %v274_v35 = vrot.slane %v272_v49, 1 }
  0xe0   : > { %6502 = vmatprep.mubr.msk.bf16.mxu1 %vm311_vm4, %v211_v14 }
  0xe2   : > { %6649 = vmatmul.mubr.msk.bf16.vlgmr.msra.gmra.mrb[0].mxu0 %vm311_vm4, %v1720_v21  ;;  %v220_v21 = vshrl.u32 %v7513_v42, 16  ;;  %v1743_v42 = vrot.slane %v8064_v15, 1  ;;  %v284_v15 = vshrl.u32 %v7908_v61, 16 }
  0xe3   : > { %6677 = vmatpush3.bf16.msra.mxu0 %v8001_v40  ;;  %6652 = vmatprep.mubr.msk.bf16.mxu0 %vm311_vm4, %v1722_v27  ;;  %v1724_v40 = vsel %vm688_vm5, %v1721_v9, %v1723_v45  ;;  %v214_v9 = vor.u32 %v212_v54, %v210_v44  ;;  %v232_v27 = vshll.u32 %v7846_v29, 16  ;;  %v240_v29 = vshll.u32 %v7854_v31, 16 }
  0xe4   : > { %6706 = vmatprep.subr.bf16.mxu0 %v8090_v30  ;;  %v222_v37 = vor.u32 %v220_v21, %v218_v11  ;;  %v236_v45 = vshrl.u32 %v7514_v58, 16  ;;  %v1738_v31 = vsel %vm688_vm5, %v1735_v50, %v1737_v18  ;;  %v260_v44 = vshrl.u32 %v7865_v36, 16  ;;  %v2746_v58 = vld [vmem:[%s9167_s1 + $0xc] sm:$0x3] }
  0xe5   : > { %v219_v12 = vsel %vm183_vm6, %v214_v9, %v218_v11  ;;  %v234_v60 = vrot.slane %v232_v27, 1  ;;  %v242_v8 = vrot.slane %v240_v29, 1  ;;  %v264_v54 = vshll.u32 %v7896_v55, 16  ;;  %v7409_v50 = vld [vmem:[%s7810_s19 + $0x28] sm:$0xff]  }
  0xe6   : > { %6503 = vmatmul.mubr.msk.bf16.gmra.mrb[4].mxu1 %vm311_vm4, %v219_v12  ;;  %v227_v39 = vsel %vm183_vm6, %v222_v37, %v226_v47  ;;  %v262_v48 = vor.u32 %v260_v44, %v258_v34  ;;  %v1740_v12 = vsel %vm688_vm5, %v1737_v18, %v1739_v59  ;;  %v1742_v36 = vsel %vm688_vm5, %v1739_v59, %v1741_v7  ;;  %v8225_v18 = vld [vmem:[%s7810_s19 + $0x14] sm:$0xf]  ;;  %v8244_v59 = vld [vmem:[%s7810_s19 + $0x28] sm:$0xff]  }
  0xe7   : > { %6506 = vmatprep.mubr.msk.bf16.mxu1 %vm311_vm4, %v227_v39  ;;  %v235_v41 = vsel %vm183_vm6, %v230_v38, %v234_v60  ;;  %v238_v51 = vor.u32 %v236_v45, %v234_v60  ;;  %v246_v20 = vor.u32 %v244_v46, %v242_v8  ;;  %v266_v9 = vrot.slane %v264_v54, 1 }
  0xe8   : > { %v1744_v37 = vsel %vm688_vm5, %v1741_v7, %v1743_v42  ;;  %v288_v38 = vshll.u32 %v7911_v62, 16  ;;  %v292_v39 = vshrl.u32 %v7911_v62, 16 }
  0xe9   : > { %v267_v14 = vsel %vm183_vm6, %v262_v48, %v266_v9 }
  0xea   : > { %6653 = vmatmul.mubr.msk.bf16.gmra.mrb[4].mxu0 %vm311_vm4, %v1724_v40  ;;  %v250_v40 = vrot.slane %v248_v17, 1  ;;  %v290_v60 = vrot.slane %v288_v38, 1  ;;  %v8196_v17 = vand.u32 %v2746_v58, %v7795_v10  ;;  %v7410_v10 = vld [vmem:[%s7810_s19 + $0x30] sm:$0xff]  }
  0xeb   : > { %6656 = vmatprep.mubr.msk.bf16.mxu0 %vm311_vm4, %v1726_v19  ;;  %v243_v19 = vsel %vm183_vm6, %v238_v51, %v242_v8  ;;  %v7406_v8 = vld [vmem:[%s7810_s19 + $0x18] sm:$0xff]   ;;  %v7414_v51 = vld [vmem:[%s7810_s19 + $0x50] sm:$0xff]  }
  0xec   : > { %v251_v25 = vsel %vm183_vm6, %v246_v20, %v250_v40  ;;  %v254_v63 = vor.u32 %v252_v53, %v250_v40  ;;  %v7415_v20 = vld [vmem:[%s7810_s19 + $0x58] sm:$0xff]   ;;  %v7416_v40 = vld [vmem:[%s7810_s19 + $0x60] sm:$0xff]  }
  0xee   : > { %6507 = vmatmul.mubr.msk.bf16.gmra.mrb[8].mxu1 %vm311_vm4, %v235_v41  ;;  %v259_v11 = vsel %vm183_vm6, %v254_v63, %v258_v34  ;;  %v296_v41 = vshll.u32 %v7923_v13, 16  ;;  %v7408_v13 = vld [vmem:[%s7810_s19 + $0x20] sm:$0xff]   ;;  %v7419_v63 = vld [vmem:[%s7810_s19 + $0x78] sm:$0xff]  }
  0xef   : > { %6510 = vmatprep.mubr.msk.bf16.mxu1 %vm311_vm4, %v243_v19  ;;  %v8233_v19 = vld [vmem:[%s7810_s19 + $0x18] sm:$0xff]   ;;  %v8240_v34 = vld [vmem:[%s7810_s19 + $0x20] sm:$0xff]  }
  0xf0   : > { %v298_v29 = vrot.slane %v296_v41, 1  ;;  %v2408_v53 = vshll.u32 %v8233_v19, 16  ;;  %v2416_v7 = vshll.u32 %v8240_v34, 16  ;;  %v2412_v48 = vshrl.u32 %v8233_v19, 16 }
  0xf2   : > { %6657 = vmatmul.mubr.msk.bf16.gmra.mrb[8].mxu0 %vm311_vm4, %v1728_v16  ;;  %v268_v16 = vshrl.u32 %v7896_v55, 16  ;;  %v2410_v54 = vrot.slane %v2408_v53, 1 }
  0xf3   : > { %6660 = vmatprep.mubr.msk.bf16.mxu0 %vm311_vm4, %v1730_v24  ;;  %v276_v24 = vshrl.u32 %v7900_v57, 16 }
  0xf4   : > { %v270_v21 = vor.u32 %v268_v16, %v266_v9  ;;  %v2414_v49 = vor.u32 %v2412_v48, %v2410_v54  ;;  %v8311_v48 = vld [vmem:[%s7810_s19 + $0x70] sm:$0xff]  }
  0xf5   : > { %v278_v47 = vor.u32 %v276_v24, %v274_v35  ;;  %v8258_v24 = vld [vmem:[%s7810_s19 + $0x38] sm:$0xff]  }
  0xf6   : > { %6511 = vmatmul.mubr.msk.bf16.gmra.mrb[12].mxu1 %vm311_vm4, %v251_v25  ;;  %v275_v27 = vsel %vm183_vm6, %v270_v21, %v274_v35  ;;  %v2428_v21 = vshrl.u32 %v8244_v59, 16 }
  0xf7   : > { %6514 = vmatprep.mubr.msk.bf16.mxu1 %vm311_vm4, %v259_v11  ;;  %v283_v33 = vsel %vm183_vm6, %v278_v47, %v282_v22  ;;  %v2420_v11 = vshrl.u32 %v8240_v34, 16 }
  0xfa   : > { %6661 = vmatmul.mubr.msk.bf16.gmra.mrb[12].mxu0 %vm311_vm4, %v1732_v43  ;;  %v286_v43 = vor.u32 %v284_v15, %v282_v22 }
  0xfb   : > { %6664 = vmatprep.mubr.msk.bf16.mxu0 %vm311_vm4, %v1734_v28  ;;  %v294_v28 = vor.u32 %v292_v39, %v290_v60 }
  0xfc   : > { %v291_v45 = vsel %vm183_vm6, %v286_v43, %v290_v60  ;;  %v8273_v60 = vld [vmem:[%s7810_s19 + $0x48] sm:$0xff]   ;;  %v2444_v43 = vshrl.u32 %v8258_v24, 16 }
  0xfd   : > { %v299_v46 = vsel %vm183_vm6, %v294_v28, %v298_v29  ;;  %v2456_v58 = vshll.u32 %v8273_v60, 16 }
  0xfe   : > { %6515 = vmatmul.mubr.msk.bf16.gmra.mrb[16].mxu1 %vm311_vm4, %v267_v14  ;;  %v2424_v14 = vshll.u32 %v8244_v59, 16 }
  0xff   : > { %6518 = vmatprep.mubr.msk.bf16.mxu1 %vm311_vm4, %v275_v27  ;;  %v2440_v27 = vshll.u32 %v8258_v24, 16 }
 0x100   : > { %v2426_v35 = vrot.slane %v2424_v14, 1 }
 0x101   : > { %v2442_v15 = vrot.slane %v2440_v27, 1  ;;  %v7435_v27 = vld [vmem:[%s7810_s19 + $0x80] ss:$0 sps:$4 sm:$0x11]  }
 0x102   : > { %6665 = vmatmul.mubr.msk.bf16.gmra.mrb[16].mxu0 %vm311_vm4, %v1736_v52  ;;  %v7417_v52 = vld [vmem:[%s7810_s19 + $0x68] sm:$0xff]  }
 0x103   : > { %6668 = vmatprep.mubr.msk.bf16.mxu0 %vm311_vm4, %v1738_v31  ;;  %v7418_v31 = vld [vmem:[%s7810_s19 + $0x70] sm:$0xff]  }
 0x106   : > { %6519 = vmatmul.mubr.msk.bf16.gmra.mrb[20].mxu1 %vm311_vm4, %v283_v33 }
 0x107   : > { %6522 = vmatprep.mubr.msk.bf16.mxu1 %vm311_vm4, %v291_v45 }
 0x10a   : > { %6669 = vmatmul.mubr.msk.bf16.gmra.mrb[20].mxu0 %vm311_vm4, %v1740_v12  ;;  %v2418_v12 = vrot.slane %v2416_v7, 1 }
 0x10b   : > { %6672 = vmatprep.mubr.msk.bf16.mxu0 %vm311_vm4, %v1742_v36  ;;  %v8254_v36 = vld [vmem:[%s7810_s19 + $0x30] sm:$0xff]  }
 0x10c   : > { %v2422_v16 = vor.u32 %v2420_v11, %v2418_v12  ;;  %v2432_v26 = vshll.u32 %v8254_v36, 16  ;;  %v2419_v42 = vsel %vm183_vm6, %v2414_v49, %v2418_v12  ;;  %v2436_v22 = vshrl.u32 %v8254_v36, 16  ;;  %v8315_v12 = vld [vmem:[%s7810_s19 + $0x78] sm:$0xff]  }
 0x10d   : > { %v2496_v49 = vshll.u32 %v8311_v48, 16 }
 0x10e   : > { %6523 = vmatmul.mubr.msk.bf16.gmra.mrb[24].mxu1 %vm311_vm4, %v299_v46  ;;  %v2427_v47 = vsel %vm183_vm6, %v2422_v16, %v2426_v35  ;;  %v2434_v33 = vrot.slane %v2432_v26, 1  ;;  %v2446_v46 = vor.u32 %v2444_v43, %v2442_v15 }
 0x10f   : > { %6548 = vmatprep.mubr.msk.bf16.mxu1 %vm311_vm4, %v7896_v55  ;;  %v7411_v55 = vld [vmem:[%s7810_s19 + $0x38] sm:$0xff]  }
 0x110   : > { %v2438_v38 = vor.u32 %v2436_v22, %v2434_v33 }
 0x112   : > { %6673 = vmatmul.mubr.msk.bf16.gmra.mrb[24].mxu0 %vm311_vm4, %v1744_v37  ;;  %v8268_v37 = vld [vmem:[%s7810_s19 + $0x40] sm:$0xff]   ;;  %v2443_v28 = vsel %vm183_vm6, %v2438_v38, %v2442_v15  ;;  %v2745_v38 = vld [vmem:[%s7810_s19 + $0x10] sm:$0xe] }
 0x113   : > { %6678 = vmatprep.mubr.msk.bf16.mxu0 %vm311_vm4, %v7405_v56  ;;  %v2430_v56 = vor.u32 %v2428_v21, %v2426_v35  ;;  %v2448_v39 = vshll.u32 %v8268_v37, 16  ;;  %v2452_v29 = vshrl.u32 %v8268_v37, 16  ;;  %v2504_v21 = vshll.u32 %v8315_v12, 16 }
 0x115   : > { %v2435_v41 = vsel %vm183_vm6, %v2430_v56, %v2434_v33  ;;  %v2450_v45 = vrot.slane %v2448_v39, 1  ;;  %v2506_v56 = vrot.slane %v2504_v21, 1  ;;  %v2508_v39 = vshrl.u32 %v8315_v12, 16 }
 0x116   : > { %6549 = vmatmul.mubr.msk.bf16.vlgmr.msra.gmra.mrb[20].mxu1 %vm311_vm4, %v7900_v57  ;;  %v7413_v57 = vld [vmem:[%s7810_s19 + $0x48] sm:$0xff]  }
 0x117   : > { %6552 = vmatprep.mubr.msk.bf16.mxu1 %vm311_vm4, %v7908_v61  ;;  %v2297_v61 = vld [vmem:[%s7810_s19 + $0x10] sm:$0xf] }
 0x11a   : > { %6679 = vmatmul.mubr.msk.bf16.vlgmr.msra.gmra.mrb[0].mxu0 %vm311_vm4, %v7406_v8  ;;  %v8283_v8 = vld [vmem:[%s7810_s19 + $0x50] sm:$0xff]  }
 0x11b   : > { %6707 = vmatpush3.bf16.msra.mxu0 %v8090_v30  ;;  %6682 = vmatprep.mubr.msk.bf16.mxu0 %vm311_vm4, %v7408_v13  ;;  %v7412_v30 = vld [vmem:[%s7810_s19 + $0x40] sm:$0xff]   ;;  %v2454_v13 = vor.u32 %v2452_v29, %v2450_v45  ;;  %v2510_v29 = vor.u32 %v2508_v39, %v2506_v56 }
 0x11c   : > { %6736 = vmatprep.subr.bf16.mxu0 %v8196_v17 }
 0x11e   : > { %6553 = vmatmul.mubr.msk.bf16.gmra.mrb[24].mxu1 %vm311_vm4, %v7911_v62  ;;  %v5980_v62 = vcombine.low %v2297_v61, %v8225_v18 }
 0x120   : > { %v2403_v25 = vshll.u32 %v5980_v62, 16  ;;  %v2401_v32 = vshrl.u32 %v5980_v62, 16 }
 0x122   : > { %6683 = vmatmul.mubr.msk.bf16.gmra.mrb[4].mxu0 %vm311_vm4, %v7409_v50  ;;  %v2405_v23 = vrot.slane %v2403_v25, 1  ;;  %v8287_v50 = vld [vmem:[%s7810_s19 + $0x58] sm:$0xff]  }
 0x123   : > { %6686 = vmatprep.mubr.msk.bf16.mxu0 %vm311_vm4, %v7410_v10  ;;  %v2464_v10 = vshll.u32 %v8283_v8, 16  ;;  %v2472_v61 = vshll.u32 %v8287_v50, 16  ;;  %v2476_v53 = vshrl.u32 %v8287_v50, 16 }
 0x124   : > { %v2406_v44 = vor.u32 %v2405_v23, %v2401_v32 }
 0x126   : > { %v2411_v9 = vsel %vm183_vm6, %v2406_v44, %v2410_v54 }
 0x12a   : > { %6687 = vmatmul.mubr.msk.bf16.gmra.mrb[8].mxu0 %vm311_vm4, %v7411_v55  ;;  %v2451_v55 = vsel %vm183_vm6, %v2446_v46, %v2450_v45  ;;  %v2751_v46 = vrot.slane %v8233_v19, 1  ;;  %v2757_v19 = vrot.slane %v8254_v36, 1  ;;  %v2765_v36 = vrot.slane %v8283_v8, 1 }
 0x12b   : > { %6690 = vmatprep.mubr.msk.bf16.mxu0 %vm311_vm4, %v7412_v30  ;;  %v2460_v30 = vshrl.u32 %v8273_v60, 16 }
 0x132   : > { %6691 = vmatmul.mubr.msk.bf16.gmra.mrb[12].mxu0 %vm311_vm4, %v7413_v57 }
 0x133   : > { %6694 = vmatprep.mubr.msk.bf16.mxu0 %vm311_vm4, %v7414_v51  ;;  %v2468_v51 = vshrl.u32 %v8283_v8, 16  ;;  %v2773_v8 = vrot.slane %v8311_v48, 1 }
 0x13a   : > { %6695 = vmatmul.mubr.msk.bf16.gmra.mrb[16].mxu0 %vm311_vm4, %v7415_v20  ;;  %v2466_v20 = vrot.slane %v2464_v10, 1  ;;  %v2753_v10 = vrot.slane %v8240_v34, 1  ;;  %v2761_v34 = vrot.slane %v8268_v37, 1 }
 0x13b   : > { %6698 = vmatprep.mubr.msk.bf16.mxu0 %vm311_vm4, %v7416_v40  ;;  %v8297_v40 = vld [vmem:[%s7810_s19 + $0x60] sm:$0xff]  }
 0x13c   : > { %v2470_v25 = vor.u32 %v2468_v51, %v2466_v20  ;;  %v2480_v32 = vshll.u32 %v8297_v40, 16  ;;  %v2484_v54 = vshrl.u32 %v8297_v40, 16  ;;  %v2769_v37 = vrot.slane %v8297_v40, 1 }
 0x13d   : > { %v2777_v40 = vrot.slane %v7435_v27, 1 }
 0x13e   : > { %v2482_v7 = vrot.slane %v2480_v32, 1 }
 0x140   : > { %v2486_v11 = vor.u32 %v2484_v54, %v2482_v7 }
 0x142   : > { %6699 = vmatmul.mubr.msk.bf16.gmra.mrb[20].mxu0 %vm311_vm4, %v7417_v52  ;;  %v2474_v52 = vrot.slane %v2472_v61, 1 }
 0x143   : > { %6702 = vmatprep.mubr.msk.bf16.mxu0 %vm311_vm4, %v7418_v31  ;;  %v8301_v31 = vld [vmem:[%s7810_s19 + $0x68] sm:$0xff]  }
 0x144   : > { %v2475_v44 = vsel %vm183_vm6, %v2470_v25, %v2474_v52  ;;  %v2492_v35 = vshrl.u32 %v8301_v31, 16 }
 0x14a   : > { %6703 = vmatmul.mubr.msk.bf16.gmra.mrb[24].mxu0 %vm311_vm4, %v7419_v63  ;;  %v2488_v63 = vshll.u32 %v8301_v31, 16 }
 0x14b   : > { %6708 = vmatprep.mubr.msk.bf16.mxu0 %vm311_vm4, %v2411_v9  ;;  %v2478_v9 = vor.u32 %v2476_v53, %v2474_v52 }
 0x14c   : > { %v2490_v14 = vrot.slane %v2488_v63, 1 }
 0x14d   : > { %v2483_v16 = vsel %vm183_vm6, %v2478_v9, %v2482_v7 }
 0x14e   : > { %v2491_v26 = vsel %vm183_vm6, %v2486_v11, %v2490_v14  ;;  %v2494_v22 = vor.u32 %v2492_v35, %v2490_v14 }
 0x152   : > { %6709 = vmatmul.mubr.msk.bf16.vlgmr.msra.gmra.mrb[0].mxu0 %vm311_vm4, %v2419_v42  ;;  %v2500_v42 = vshrl.u32 %v8311_v48, 16 }
 0x153   : > { %6737 = vmatpush3.bf16.msra.mxu0 %v8196_v17  ;;  %6712 = vmatprep.mubr.msk.bf16.mxu0 %vm311_vm4, %v2427_v47  ;;  %v2458_v17 = vrot.slane %v2456_v58, 1  ;;  %v2498_v47 = vrot.slane %v2496_v49, 1 }
 0x155   : > { %v2459_v57 = vsel %vm183_vm6, %v2454_v13, %v2458_v17  ;;  %v2462_v62 = vor.u32 %v2460_v30, %v2458_v17  ;;  %v2502_v33 = vor.u32 %v2500_v42, %v2498_v47  ;;  %v2499_v15 = vsel %vm183_vm6, %v2494_v22, %v2498_v47 }
 0x157   : > { %v2467_v23 = vsel %vm183_vm6, %v2462_v62, %v2466_v20  ;;  %v2507_v43 = vsel %vm183_vm6, %v2502_v33, %v2506_v56 }
 0x15a   : > { %6713 = vmatmul.mubr.msk.bf16.gmra.mrb[4].mxu0 %vm311_vm4, %v2435_v41  ;;  %v2512_v41 = vshll.u32 %v7435_v27, 16 }
 0x15b   : > { %6716 = vmatprep.mubr.msk.bf16.mxu0 %vm311_vm4, %v2443_v28  ;;  %v6010_v28 = vcombine.low %v2745_v38, %v8225_v18  ;;  %v2755_v18 = vrot.slane %v8244_v59, 1  ;;  %v2763_v59 = vrot.slane %v8273_v60, 1  ;;  %v2771_v60 = vrot.slane %v8301_v31, 1 }
 0x15c   : > { %v2514_v58 = vrot.slane %v2512_v41, 1 }
 0x15d   : > { %v2750_v45 = vrot.slane %v6010_v28, 1  ;;  %v2756_v30 = vsel %vm688_vm5, %v2753_v10, %v2755_v18  ;;  %v2758_v51 = vsel %vm688_vm5, %v2755_v18, %v2757_v19  ;;  %v2764_v62 = vsel %vm688_vm5, %v2761_v34, %v2763_v59 }
 0x15e   : > { %v2515_v13 = vsel %vm183_vm6, %v2510_v29, %v2514_v58  ;;  %v2766_v25 = vsel %vm688_vm5, %v2763_v59, %v2765_v36  ;;  %v2774_v53 = vsel %vm688_vm5, %v2771_v60, %v2773_v8 }
 0x15f   : > { %v2752_v17 = vsel %vm688_vm5, %v2750_v45, %v2751_v46 }
 0x162   : > { %6717 = vmatmul.mubr.msk.bf16.gmra.mrb[8].mxu0 %vm311_vm4, %v2451_v55  ;;  %v2754_v55 = vsel %vm688_vm5, %v2751_v46, %v2753_v10  ;;  %v7437_v46 = vld [vmem:[%s9170_s4 + $0x10] sm:$0xff]  }
 0x163   : > { %6720 = vmatprep.mubr.msk.bf16.mxu0 %vm311_vm4, %v2459_v57  ;;  %v2759_v57 = vrot.slane %v8258_v24, 1  ;;  %v2767_v24 = vrot.slane %v8287_v50, 1  ;;  %v2775_v50 = vrot.slane %v8315_v12, 1 }
 0x165   : > { %v2760_v61 = vsel %vm688_vm5, %v2757_v19, %v2759_v57  ;;  %v2762_v20 = vsel %vm688_vm5, %v2759_v57, %v2761_v34  ;;  %v2768_v52 = vsel %vm688_vm5, %v2765_v36, %v2767_v24  ;;  %v2770_v32 = vsel %vm688_vm5, %v2767_v24, %v2769_v37 }
 0x166   : > { %v2778_v31 = vsel %vm688_vm5, %v2775_v50, %v2777_v40 }
 0x16a   : > { %6721 = vmatmul.mubr.msk.bf16.gmra.mrb[12].mxu0 %vm311_vm4, %v2467_v23  ;;  %v2772_v23 = vsel %vm688_vm5, %v2769_v37, %v2771_v60 }
 0x16b   : > { %6724 = vmatprep.mubr.msk.bf16.mxu0 %vm311_vm4, %v2475_v44  ;;  %v2776_v44 = vsel %vm688_vm5, %v2773_v8, %v2775_v50 }
 0x172   : > { %6725 = vmatmul.mubr.msk.bf16.gmra.mrb[16].mxu0 %vm311_vm4, %v2483_v16 }
 0x173   : > { %6728 = vmatprep.mubr.msk.bf16.mxu0 %vm311_vm4, %v2491_v26 }
 0x17a   : > { %6729 = vmatmul.mubr.msk.bf16.gmra.mrb[20].mxu0 %vm311_vm4, %v2499_v15 }
 0x17b   : > { %6732 = vmatprep.mubr.msk.bf16.mxu0 %vm311_vm4, %v2507_v43 }
 0x182   : > { %6733 = vmatmul.mubr.msk.bf16.gmra.mrb[24].mxu0 %vm311_vm4, %v2515_v13  ;;  %v7654_v13 = vmov 0.0  }
 0x183   : > { %6738 = vmatprep.mubr.msk.bf16.mxu0 %vm311_vm4, %v2752_v17  ;;  %6766 = vmatprep.subr.bf16.mxu1 %v7654_v13  ;;  %v7438_v17 = vld [vmem:[%s9170_s4 + $0x18] sm:$0xff]  }
 0x184   : > { %6770 = vmatprep.mubr.msk.bf16.mxu1 %vm7655_vm7, %v7654_v13  ;;  %6767 = vmatpush3.bf16.msra.mxu1 %v7437_v46 }
 0x185   : > { %6768 = vmatprep.subr.bf16.mxu1 %v7654_v13 }
 0x188   : > { %6769 = vmatpush3.bf16.msra.mxu1 %v7438_v17 }
 0x189   : > { %6782 = vmatprep.subr.bf16.mxu1 %v7654_v13 }
 0x18a   : > { %6739 = vmatmul.mubr.msk.bf16.vlgmr.msra.gmra.mrb[0].mxu0 %vm311_vm4, %v2754_v55 }
 0x18b   : > { %6742 = vmatprep.mubr.msk.bf16.mxu0 %vm311_vm4, %v2756_v30 }
 0x192   : > { %6743 = vmatmul.mubr.msk.bf16.gmra.mrb[4].mxu0 %vm311_vm4, %v2758_v51 }
 0x193   : > { %6746 = vmatprep.mubr.msk.bf16.mxu0 %vm311_vm4, %v2760_v61 }
 0x19a   : > { %6747 = vmatmul.mubr.msk.bf16.gmra.mrb[8].mxu0 %vm311_vm4, %v2762_v20 }
 0x19b   : > { %6750 = vmatprep.mubr.msk.bf16.mxu0 %vm311_vm4, %v2764_v62 }
 0x1a2   : > { %6751 = vmatmul.mubr.msk.bf16.gmra.mrb[12].mxu0 %vm311_vm4, %v2766_v25 }
 0x1a3   : > { %6754 = vmatprep.mubr.msk.bf16.mxu0 %vm311_vm4, %v2768_v52 }
 0x1aa   : > { %6755 = vmatmul.mubr.msk.bf16.gmra.mrb[16].mxu0 %vm311_vm4, %v2770_v32 }
 0x1ab   : > { %6758 = vmatprep.mubr.msk.bf16.mxu0 %vm311_vm4, %v2772_v23 }
 0x1ad   : > { %v6500_v54 = vpop.f32.mrb[0].mxu1 }
 0x1ae   : > { %v395_v63 = vpop.f32.mrb[1].mxu1 }
 0x1af   : > { %v6501_v7 = vpop.f32.mrb[2].mxu1 }
 0x1b0   : > { %v398_v9 = vpop.f32.mrb[3].mxu1 }
 0x1b2   : > { %6759 = vmatmul.mubr.msk.bf16.gmra.mrb[20].mxu0 %vm311_vm4, %v2774_v53 }
 0x1b3   : > { %6762 = vmatprep.mubr.msk.bf16.mxu0 %vm311_vm4, %v2776_v44 }
 0x1b9   : > { %v6504_v48 = vpop.f32.mrb[4].mxu1 }
 0x1ba   : > { %6763 = vmatmul.mubr.msk.bf16.gmra.mrb[24].mxu0 %vm311_vm4, %v2778_v31  ;;  %v411_v11 = vpop.f32.mrb[5].mxu1  ;;  %vm3228_vm4 = vcmask 257026  }
 0x1bb   : > { %v6505_v14 = vpop.f32.mrb[6].mxu1  ;;  %5377 = vmatprep.mubr.bf16.mxu0 (%p72_p0), %v7652_v6 }
 0x1bc   : > { %v8376_v12 = vpop.f32.mrb[7].mxu1 }
 0x1c1   : > { %v8378_v49 = vpop.f32.mrb[8].mxu1 }
 0x1c2   : > { %v8380_v16 = vpop.f32.mrb[9].mxu1 }
 0x1c3   : > { %v8382_v35 = vpop.f32.mrb[10].mxu1 }
 0x1c4   : > { %v8384_v26 = vpop.f32.mrb[11].mxu1 }
 0x1c9   : > { %v8386_v42 = vpop.f32.mrb[12].mxu1 }
 0x1ca   : > { %v8388_v21 = vpop.f32.mrb[13].mxu1 }
 0x1cb   : > { %v8390_v47 = vpop.f32.mrb[14].mxu1 }
 0x1cc   : > { %v8392_v22 = vpop.f32.mrb[15].mxu1 }
 0x1d1   : > { %v8394_v27 = vpop.f32.mrb[16].mxu1 }
 0x1d2   : > { %v8396_v33 = vpop.f32.mrb[17].mxu1 }
 0x1d3   : > { %v8398_v56 = vpop.f32.mrb[18].mxu1 }
 0x1d4   : > { %v8400_v38 = vpop.f32.mrb[19].mxu1 }
 0x1e9   : > { %v8402_v15 = vpop.f32.mrb[20].mxu1 }
 0x1ea   : > { %v8404_v39 = vpop.f32.mrb[21].mxu1 }
 0x1eb   : > { %v8406_v41 = vpop.f32.mrb[22].mxu1 }
 0x1ec   : > { %v8408_v43 = vpop.f32.mrb[23].mxu1 }
 0x1f1   : > { %v8410_v28 = vpop.f32.mrb[24].mxu1 }
 0x1f2   : > { %v8412_v29 = vpop.f32.mrb[25].mxu1 }
 0x1f3   : > { %v8414_v58 = vpop.f32.mrb[26].mxu1 }
 0x1f4   : > { %v8416_v45 = vpop.f32.mrb[27].mxu1 }
 0x25d   : > { %v6740_v10 = vpop.f32.mrb[0].mxu0 }
 0x25e   : > { %v7020_v18 = vadd.f32 %v6740_v10, %v6500_v54  ;;  %v2858_v55 = vpop.f32.mrb[1].mxu0 }
 0x25f   : > { %v7021_v30 = vadd.f32 %v2858_v55, %v395_v63  ;;  %v6741_v19 = vpop.f32.mrb[2].mxu0 }
 0x260   : > { %v3005_v57 = vmul.f32 %v7020_v18, %v7741_v0  ;;  %v7022_v51 = vadd.f32 %v6741_v19, %v6501_v7  ;;  %v2861_v61 = vpop.f32.mrb[3].mxu0 }
 0x261   : > { %v3003_v34 = vmul.f32 %v7021_v30, %v7741_v0  ;;  %v7023_v59 = vadd.f32 %v2861_v61, %v398_v9 }
 0x262   : > { %v3039_v20 = vadd.f32 %v7746_v1, %v3005_v57  ;;  %v3006_v62 = vmul.f32 %v7022_v51, %v7741_v0 }
 0x263   : > { %v3037_v36 = vadd.f32 %v7746_v1, %v3003_v34  ;;  %v3004_v24 = vmul.f32 %v7023_v59, %v7741_v0 }
 0x264   : > { %v3067_v25 = vmax.f32 %v3039_v20, 0.0  ;;  %v3040_v52 = vadd.f32 %v7746_v1, %v3006_v62 }
 0x265   : > { %v3065_v37 = vmax.f32 %v3037_v36, 0.0  ;;  %v3038_v60 = vadd.f32 %v7746_v1, %v3004_v24  ;;  %v6744_v32 = vpop.f32.mrb[4].mxu0 }
 0x266   : > { %3096 = vst.msk [vmem:[#allocation2 + $0x10] sm:$0xff] %vm3093_vm8, %v3067_v25  ;;  %v3068_v23 = vmax.f32 %v3040_v52, 0.0  ;;  %v7024_v8 = vadd.f32 %v6744_v32, %v6504_v48  ;;  %v2874_v50 = vpop.f32.mrb[5].mxu0 }
 0x267   : > { %3094 = vst.msk [vmem:[#allocation2] sm:$0xff] %vm3093_vm8, %v3065_v37  ;;  %v3066_v53 = vmax.f32 %v3038_v60, 0.0  ;;  %v7025_v44 = vadd.f32 %v2874_v50, %v411_v11  ;;  %v6745_v40 = vpop.f32.mrb[6].mxu0 }
 0x268   : > { %3097 = vst.msk [vmem:[#allocation2 + $0x18] sm:$0xff] %vm3093_vm8, %v3068_v23  ;;  %v3009_v31 = vmul.f32 %v7024_v8, %v7741_v0  ;;  %v7026_v54 = vadd.f32 %v6745_v40, %v6505_v14  ;;  %v2877_v63 = vpop.f32.mrb[7].mxu0 }
 0x269   : > { %3095 = vst.msk [vmem:[#allocation2 + $0x8] sm:$0xff] %vm3093_vm8, %v3066_v53  ;;  %v3007_v7 = vmul.f32 %v7025_v44, %v7741_v0  ;;  %v7027_v9 = vadd.f32 %v2877_v63, %v8376_v12 }
 0x26a   : > { %v3043_v48 = vadd.f32 %v7746_v1, %v3009_v31  ;;  %v3010_v46 = vmul.f32 %v7026_v54, %v7741_v0 }
 0x26b   : > { %v3041_v17 = vadd.f32 %v7746_v1, %v3007_v7  ;;  %v3008_v11 = vmul.f32 %v7027_v9, %v7741_v0 }
 0x26c   : > { %v3071_v10 = vmax.f32 %v3043_v48, 0.0  ;;  %v3044_v18 = vadd.f32 %v7746_v1, %v3010_v46 }
 0x26d   : > { %v3124_v55 = vld [vmem:[#allocation2 + $0x10] sm:$0xff]  ;;  %v3069_v14 = vmax.f32 %v3041_v17, 0.0  ;;  %v3042_v30 = vadd.f32 %v7746_v1, %v3008_v11  ;;  %v6748_v19 = vpop.f32.mrb[8].mxu0 }
 0x26e   : > { %v3122_v57 = vld [vmem:[#allocation2] sm:$0xff]  ;;  %3100 = vst.msk [vmem:[#allocation2 + $0x30] sm:$0xff] %vm3093_vm8, %v3071_v10  ;;  %v3072_v12 = vmax.f32 %v3044_v18, 0.0  ;;  %v7028_v51 = vadd.f32 %v6748_v19, %v8378_v49  ;;  %v2890_v61 = vpop.f32.mrb[9].mxu0 }
 0x26f   : > { %v3126_v34 = vmax.f32 %v3122_v57, %v3124_v55  ;;  %v3125_v59 = vld [vmem:[#allocation2 + $0x18] sm:$0xff]  ;;  %3098 = vst.msk [vmem:[#allocation2 + $0x20] sm:$0xff] %vm3093_vm8, %v3069_v14  ;;  %v3070_v20 = vmax.f32 %v3042_v30, 0.0  ;;  %v7029_v62 = vadd.f32 %v2890_v61, %v8380_v16  ;;  %v6749_v36 = vpop.f32.mrb[10].mxu0 }
 0x270   : > { %v3123_v24 = vld [vmem:[#allocation2 + $0x8] sm:$0xff]  ;;  %3101 = vst.msk [vmem:[#allocation2 + $0x38] sm:$0xff] %vm3093_vm8, %v3072_v12  ;;  %v3013_v25 = vmul.f32 %v7028_v51, %v7741_v0  ;;  %v7030_v52 = vadd.f32 %v6749_v36, %v8382_v35  ;;  %v2893_v37 = vpop.f32.mrb[11].mxu0  ;;  %v3138_v36 = vld [vmem:[#allocation4] sm:$0xf] }
 0x271   : > { %3128 = vst.msk [vmem:[#allocation3] sm:$0xff] %vm3093_vm8, %v3126_v34  ;;  %v3127_v49 = vmax.f32 %v3123_v24, %v3125_v59  ;;  %3099 = vst.msk [vmem:[#allocation2 + $0x28] sm:$0xff] %vm3093_vm8, %v3070_v20  ;;  %v3011_v60 = vmul.f32 %v7029_v62, %v7741_v0  ;;  %v7031_v32 = vadd.f32 %v2893_v37, %v8384_v26 }
 0x272   : > { %v3047_v16 = vadd.f32 %v7746_v1, %v3013_v25  ;;  %v3014_v23 = vmul.f32 %v7030_v52, %v7741_v0 }
 0x273   : > { %3129 = vst.msk [vmem:[#allocation3 + $0x8] sm:$0xff] %vm3093_vm8, %v3127_v49  ;;  %v3045_v8 = vadd.f32 %v7746_v1, %v3011_v60  ;;  %v3012_v35 = vmul.f32 %v7031_v32, %v7741_v0 }
 0x274   : > { %v3075_v50 = vmax.f32 %v3047_v16, 0.0  ;;  %v3048_v53 = vadd.f32 %v7746_v1, %v3014_v23 }
 0x275   : > { %v3073_v44 = vmax.f32 %v3045_v8, 0.0  ;;  %v3046_v40 = vadd.f32 %v7746_v1, %v3012_v35  ;;  %v6752_v31 = vpop.f32.mrb[12].mxu0  ;;  %v3143_v54 = vld [vmem:[#allocation2 + $0x30] sm:$0xff] }
 0x276   : > { %v3141_v63 = vld [vmem:[#allocation2 + $0x20] sm:$0xff]  ;;  %3104 = vst.msk [vmem:[#allocation2 + $0x50] sm:$0xff] %vm3093_vm8, %v3075_v50  ;;  %v3076_v26 = vmax.f32 %v3048_v53, 0.0  ;;  %v7032_v7 = vadd.f32 %v6752_v31, %v8386_v42  ;;  %v2906_v9 = vpop.f32.mrb[13].mxu0 }
 0x277   : > { %v3144_v48 = vld [vmem:[#allocation2 + $0x38] sm:$0xff]  ;;  %3102 = vst.msk [vmem:[#allocation2 + $0x40] sm:$0xff] %vm3093_vm8, %v3073_v44  ;;  %v3074_v46 = vmax.f32 %v3046_v40, 0.0  ;;  %v7033_v17 = vadd.f32 %v2906_v9, %v8388_v21  ;;  %v6753_v11 = vpop.f32.mrb[14].mxu0  ;;  %v3145_v30 = vmax.f32 %v3141_v63, %v3143_v54 }
 0x278   : > { %v3142_v10 = vld [vmem:[#allocation2 + $0x28] sm:$0xff]  ;;  %3105 = vst.msk [vmem:[#allocation2 + $0x58] sm:$0xff] %vm3093_vm8, %v3076_v26  ;;  %v3017_v18 = vmul.f32 %v7032_v7, %v7741_v0  ;;  %v7034_v55 = vadd.f32 %v6753_v11, %v8390_v47  ;;  %v2909_v14 = vpop.f32.mrb[15].mxu0 }
 0x279   : > { %v3146_v19 = vmax.f32 %v3142_v10, %v3144_v48  ;;  %3103 = vst.msk [vmem:[#allocation2 + $0x48] sm:$0xff] %vm3093_vm8, %v3074_v46  ;;  %v3015_v42 = vmul.f32 %v7033_v17, %v7741_v0  ;;  %v7035_v57 = vadd.f32 %v2909_v14, %v8392_v22 }
 0x27a   : > { %v3130_v12 = vld [vmem:[#allocation3] ss:$2 sm:$0x7f]  ;;  %v3132_v21 = vld [vmem:[#allocation3 + $0x1] ss:$2 sm:$0x7f]  ;;  %v3051_v51 = vadd.f32 %v7746_v1, %v3017_v18  ;;  %v3018_v61 = vmul.f32 %v7034_v55, %v7741_v0 }
 0x27b   : > { %3147 = vst.msk [vmem:[#allocation3] sm:$0xff] %vm3093_vm8, %v3145_v30  ;;  %3148 = vst.msk [vmem:[#allocation3 + $0x8] sm:$0xff] %vm3093_vm8, %v3146_v19  ;;  %v3049_v47 = vadd.f32 %v7746_v1, %v3015_v42  ;;  %v3016_v34 = vmul.f32 %v7035_v57, %v7741_v0  ;;  %v3133_v59 = vmax.f32 %v3130_v12, %v3132_v21 }
 0x27c   : > { %v3079_v20 = vmax.f32 %v3051_v51, 0.0  ;;  %v3052_v62 = vadd.f32 %v7746_v1, %v3018_v61 }
 0x27d   : > { %v3077_v24 = vmax.f32 %v3049_v47, 0.0  ;;  %v3050_v25 = vadd.f32 %v7746_v1, %v3016_v34  ;;  %v6756_v52 = vpop.f32.mrb[16].mxu0  ;;  %v3134_v37 = vpack.c.bf16 %v3133_v59, %v3133_v59  ;;  %v3177_v49 = vld [vmem:[#allocation2 + $0x50] sm:$0xff] }
 0x27e   : > { %v3175_v60 = vld [vmem:[#allocation2 + $0x40] sm:$0xff]  ;;  %3108 = vst.msk [vmem:[#allocation2 + $0x70] sm:$0xff] %vm3093_vm8, %v3079_v20  ;;  %v3080_v32 = vmax.f32 %v3052_v62, 0.0  ;;  %v7036_v16 = vadd.f32 %v6756_v52, %v8394_v27  ;;  %v2922_v23 = vpop.f32.mrb[17].mxu0 }
 0x27f   : > { %v3178_v8 = vld [vmem:[#allocation2 + $0x58] sm:$0xff]  ;;  %3106 = vst.msk [vmem:[#allocation2 + $0x60] sm:$0xff] %vm3093_vm8, %v3077_v24  ;;  %v3078_v35 = vmax.f32 %v3050_v25, 0.0  ;;  %v7037_v50 = vadd.f32 %v2922_v23, %v8396_v33  ;;  %v6757_v53 = vpop.f32.mrb[18].mxu0  ;;  %v3139_v44 = vsel %vm8487_vm10, %v3134_v37, %v3138_v36  ;;  %v3179_v27 = vmax.f32 %v3175_v60, %v3177_v49  ;;  %vm8565_vm10 = vmand %vm3228_vm4, %vm3229_vm9 }
 0x280   : > { %v3176_v40 = vld [vmem:[#allocation2 + $0x48] sm:$0xff]  ;;  %3109 = vst.msk [vmem:[#allocation2 + $0x78] sm:$0xff] %vm3093_vm8, %v3080_v32  ;;  %v3021_v31 = vmul.f32 %v7036_v16, %v7741_v0  ;;  %v7038_v54 = vadd.f32 %v6757_v53, %v8398_v56  ;;  %v2925_v63 = vpop.f32.mrb[19].mxu0  ;;  %3140 = vst [vmem:[#allocation4] sm:$0xf] %v3139_v44 }
 0x281   : > { %v3180_v26 = vmax.f32 %v3176_v40, %v3178_v8  ;;  %3107 = vst.msk [vmem:[#allocation2 + $0x68] sm:$0xff] %vm3093_vm8, %v3078_v35  ;;  %v3019_v7 = vmul.f32 %v7037_v50, %v7741_v0  ;;  %v7039_v33 = vadd.f32 %v2925_v63, %v8400_v38  ;;  %vm3319_vm9 = vsmask.f32 256 }
 0x282   : > { %v3149_v9 = vld [vmem:[#allocation3] ss:$2 sm:$0x7f]  ;;  %v3150_v48 = vld [vmem:[#allocation3 + $0x1] ss:$2 sm:$0x7f]  ;;  %v3055_v46 = vadd.f32 %v7746_v1, %v3021_v31  ;;  %v3022_v17 = vmul.f32 %v7038_v54, %v7741_v0 }
 0x283   : > { %3181 = vst.msk [vmem:[#allocation3] sm:$0xff] %vm3093_vm8, %v3179_v27  ;;  %3182 = vst.msk [vmem:[#allocation3 + $0x8] sm:$0xff] %vm3093_vm8, %v3180_v26  ;;  %v3053_v56 = vadd.f32 %v7746_v1, %v3019_v7  ;;  %v3020_v11 = vmul.f32 %v7039_v33, %v7741_v0  ;;  %v3151_v10 = vmax.f32 %v3149_v9, %v3150_v48 }
 0x284   : > { %v3083_v18 = vmax.f32 %v3055_v46, 0.0  ;;  %v3056_v55 = vadd.f32 %v7746_v1, %v3022_v17 }
 0x285   : > { %v3081_v38 = vmax.f32 %v3053_v56, 0.0  ;;  %v3054_v14 = vadd.f32 %v7746_v1, %v3020_v11  ;;  %v6760_v30 = vpop.f32.mrb[20].mxu0  ;;  %v6219_v19 = vpack.c.bf16 %v3151_v10, %v3151_v10  ;;  %v3204_v21 = vld [vmem:[#allocation2 + $0x70] sm:$0xff] }
 0x286   : > { %3112 = vst.msk [vmem:[#allocation2 + $0x90] sm:$0xff] %vm3093_vm8, %v3083_v18  ;;  %v3084_v42 = vmax.f32 %v3056_v55, 0.0  ;;  %v7040_v57 = vadd.f32 %v6760_v30, %v8402_v15  ;;  %v2938_v12 = vpop.f32.mrb[21].mxu0  ;;  %v3202_v51 = vld [vmem:[#allocation2 + $0x60] sm:$0xff] }
 0x287   : > { %v3205_v61 = vld [vmem:[#allocation2 + $0x78] sm:$0xff]  ;;  %3110 = vst.msk [vmem:[#allocation2 + $0x80] sm:$0xff] %vm3093_vm8, %v3081_v38  ;;  %v3082_v47 = vmax.f32 %v3054_v14, 0.0  ;;  %v7041_v34 = vadd.f32 %v2938_v12, %v8404_v39  ;;  %v6761_v59 = vpop.f32.mrb[22].mxu0  ;;  %v3157_v20 = vshll.u32 %v6219_v19, 16  ;;  %v3160_v15 = vshrl.u32 %v6219_v19, 16 }
 0x288   : > { %v3203_v62 = vld [vmem:[#allocation2 + $0x68] sm:$0xff]  ;;  %3113 = vst.msk [vmem:[#allocation2 + $0x98] sm:$0xff] %vm3093_vm8, %v3084_v42  ;;  %v3025_v22 = vmul.f32 %v7040_v57, %v7741_v0  ;;  %v7042_v36 = vadd.f32 %v6761_v59, %v8406_v41  ;;  %v2941_v24 = vpop.f32.mrb[23].mxu0  ;;  %v3206_v60 = vmax.f32 %v3202_v51, %v3204_v21  ;;  %v3170_v23 = vld [vmem:[#allocation4] sm:$0x8] }
 0x289   : > { %v3207_v52 = vmax.f32 %v3203_v62, %v3205_v61  ;;  %3111 = vst.msk [vmem:[#allocation2 + $0x88] sm:$0xff] %vm3093_vm8, %v3082_v47  ;;  %v3023_v39 = vmul.f32 %v7041_v34, %v7741_v0  ;;  %v7043_v37 = vadd.f32 %v2941_v24, %v8408_v43  ;;  %v3159_v49 = vrot.slane %v3157_v20, 5 }
 0x28a   : > { %v3059_v32 = vadd.f32 %v7746_v1, %v3025_v22  ;;  %v3026_v41 = vmul.f32 %v7042_v36, %v7741_v0  ;;  %v3162_v16 = vrot.slane %v3160_v15, 4  ;;  %v3183_v8 = vld [vmem:[#allocation3] ss:$2 sm:$0x7f] }
 0x28b   : > { %v3057_v35 = vadd.f32 %v7746_v1, %v3023_v39  ;;  %v3024_v50 = vmul.f32 %v7043_v37, %v7741_v0  ;;  %v3171_v53 = vsel %vm8521_vm13, %v3159_v49, %v3170_v23  ;;  %v3184_v44 = vld [vmem:[#allocation3 + $0x1] ss:$2 sm:$0x7f] }
 0x28c   : > { %v3087_v40 = vmax.f32 %v3059_v32, 0.0  ;;  %v3060_v43 = vadd.f32 %v7746_v1, %v3026_v41  ;;  %v3163_v31 = vor.u32 %v3162_v16, %v3159_v49  ;;  %3172 = vst [vmem:[#allocation4] sm:$0x8] %v3171_v53  ;;  %v3185_v54 = vmax.f32 %v3183_v8, %v3184_v44  ;;  %3208 = vst.msk [vmem:[#allocation3] sm:$0xff] %vm3093_vm8, %v3206_v60 }
 0x28d   : > { %3209 = vst.msk [vmem:[#allocation3 + $0x8] sm:$0xff] %vm3093_vm8, %v3207_v52  ;;  %v3085_v63 = vmax.f32 %v3057_v35, 0.0  ;;  %v3058_v27 = vadd.f32 %v7746_v1, %v3024_v50  ;;  %v6764_v26 = vpop.f32.mrb[24].mxu0  ;;  %v3238_v17 = vld [vmem:[#allocation2 + $0x90] sm:$0xff] }
 0x28e   : > { %3116 = vst.msk [vmem:[#allocation2 + $0xb0] sm:$0xff] %vm3093_vm8, %v3087_v40  ;;  %v3088_v7 = vmax.f32 %v3060_v43, 0.0  ;;  %v7044_v33 = vadd.f32 %v6764_v26, %v8410_v28  ;;  %v2954_v9 = vpop.f32.mrb[25].mxu0  ;;  %v3164_v48 = vrot.slane %v3163_v31, 4  ;;  %v6220_v46 = vpack.c.bf16 %v3185_v54, %v3185_v54  ;;  %v3236_v56 = vld [vmem:[#allocation2 + $0x80] sm:$0xff] }
 0x28f   : > { %v3239_v11 = vld [vmem:[#allocation2 + $0x98] sm:$0xff]  ;;  %3114 = vst.msk [vmem:[#allocation2 + $0xa0] sm:$0xff] %vm3093_vm8, %v3085_v63  ;;  %v3086_v10 = vmax.f32 %v3058_v27, 0.0  ;;  %v7045_v18 = vadd.f32 %v2954_v9, %v8412_v29  ;;  %v6765_v55 = vpop.f32.mrb[26].mxu0  ;;  %v3240_v21 = vmax.f32 %v3236_v56, %v3238_v17 }
 0x290   : > { %v3237_v38 = vld [vmem:[#allocation2 + $0x88] sm:$0xff]  ;;  %3117 = vst.msk [vmem:[#allocation2 + $0xb8] sm:$0xff] %vm3093_vm8, %v3088_v7  ;;  %v3029_v14 = vmul.f32 %v7044_v33, %v7741_v0  ;;  %v7046_v30 = vadd.f32 %v6765_v55, %v8414_v58  ;;  %v2957_v28 = vpop.f32.mrb[27].mxu0  ;;  %v3190_v19 = vrot.slane %v6220_v46, 5  ;;  %v3199_v29 = vld [vmem:[#allocation4 + $0x8] sm:$0x7] }
 0x291   : > { %3174 = vst.msk [vmem:[#allocation4 + $0x4] sm:$0x7] %vm3173_vm14, %v3164_v48  ;;  %v3241_v42 = vmax.f32 %v3237_v38, %v3239_v11  ;;  %v3027_v57 = vmul.f32 %v7045_v18, %v7741_v0  ;;  %v7047_v12 = vadd.f32 %v2957_v28, %v8416_v45  ;;  %v3260_v18 = vld [vmem:[#allocation4 + $0x10] sm:$0x3]  ;;  %vm3289_vm14 = vcmask 257025  }
 0x292   : > { %3115 = vst.msk [vmem:[#allocation2 + $0xa8] sm:$0xff] %vm3093_vm8, %v3086_v10  ;;  %v3063_v51 = vadd.f32 %v7746_v1, %v3029_v14  ;;  %v3030_v58 = vmul.f32 %v7046_v30, %v7741_v0  ;;  %v3191_v61 = vrot.slane %v3190_v19, 4 }
 0x293   : > { %3195 = vst.msk [vmem:[#allocation4 + $0x4] sm:$0x8] %vm3167_vm11, %v3190_v19  ;;  %v3061_v47 = vadd.f32 %v7746_v1, %v3027_v57  ;;  %v3028_v34 = vmul.f32 %v7047_v12, %v7741_v0  ;;  %vm3234_vm11 = vcmask 254976   ;;  %v3324_v56 = vld [vmem:[#allocation4] sm:$0xf] }
 0x294   : > { %v3210_v59 = vld [vmem:[#allocation3] ss:$2 sm:$0x7f]  ;;  %v3211_v20 = vld [vmem:[#allocation3 + $0x1] ss:$2 sm:$0x7f]  ;;  %v3064_v45 = vadd.f32 %v7746_v1, %v3030_v58  ;;  %v3200_v22 = vsel %vm3198_vm1, %v3191_v61, %v3199_v29  ;;  %vm3259_vm13 = vmand %vm3234_vm11, %vm3258_vm12 }
 0x295   : > { %v3091_v62 = vmax.f32 %v3063_v51, 0.0  ;;  %v3212_v36 = vmax.f32 %v3210_v59, %v3211_v20  ;;  %3242 = vst.msk [vmem:[#allocation3] sm:$0xff] %vm3093_vm8, %v3240_v21  ;;  %3243 = vst.msk [vmem:[#allocation3 + $0x8] sm:$0xff] %vm3093_vm8, %v3241_v42  ;;  %v3089_v24 = vmax.f32 %v3061_v47, 0.0  ;;  %v3062_v15 = vadd.f32 %v7746_v1, %v3028_v34  ;;  %v3265_v39 = vld [vmem:[#allocation2 + $0xb0] sm:$0xff] }
 0x296   : > { %3201 = vst [vmem:[#allocation4 + $0x8] sm:$0x7] %v3200_v22  ;;  %v3092_v25 = vmax.f32 %v3064_v45, 0.0  ;;  %v3263_v37 = vld [vmem:[#allocation2 + $0xa0] sm:$0xff]  ;;  %vm3291_vm1 = vmand %vm3289_vm14, %vm3290_vm15  ;;  %vm4323_vm12 = vcmask 520192  }
 0x297   : > { %3120 = vst.msk [vmem:[#allocation2 + $0xd0] sm:$0xff] %vm3093_vm8, %v3091_v62  ;;  %v6221_v52 = vpack.c.bf16 %v3212_v36, %v3212_v36  ;;  %v3266_v49 = vld [vmem:[#allocation2 + $0xb8] sm:$0xff]  ;;  %3118 = vst.msk [vmem:[#allocation2 + $0xc0] sm:$0xff] %vm3093_vm8, %v3089_v24  ;;  %v3090_v60 = vmax.f32 %v3062_v15, 0.0  ;;  %v3267_v8 = vmax.f32 %v3263_v37, %v3265_v39  ;;  %v7441_v36 = vld [vmem:[%s9170_s4] sm:$0xff]  }
 0x298   : > { %3121 = vst.msk [vmem:[#allocation2 + $0xd8] sm:$0xff] %vm3093_vm8, %v3092_v25  ;;  %v7443_v37 = vld [vmem:[%s9170_s4 + $0x8] sm:$0xff]   ;;  %v7522_v1 = vld [vmem:[%s9176_s10 + $0x24] ss:$16 sps:$4 sm:$0xff] (%p72_p0)  }
 0x299   : > { %v3264_v32 = vld [vmem:[#allocation2 + $0xa8] sm:$0xff]  ;;  %v3218_v41 = vshrl.u32 %v6221_v52, 16  ;;  %v3221_v16 = vshll.u32 %v6221_v52, 16  ;;  %3119 = vst.msk [vmem:[#allocation2 + $0xc8] sm:$0xff] %vm3093_vm8, %v3090_v60 }
 0x29a   : > { %v3268_v23 = vmax.f32 %v3264_v32, %v3266_v49  ;;  %v8573_v7 = vld [vmem:[#allocation4 + $0x4] sm:$0xf]  ;;  %v3321_v32 = vld [vmem:[#allocation4 + $0x18] sm:$0x1] }
 0x29b   : > { %v3220_v35 = vrot.slane %v3218_v41, 5  ;;  %v3223_v50 = vrot.slane %v3221_v16, 6  ;;  %v8577_v10 = vcombine.low %v3324_v56, %v8573_v7  ;;  %v7521_v0 = vld [vmem:[%s9176_s10 + $0x8] ss:$16 sps:$4 sm:$0xff] (%p72_p0)  }
 0x29c   : > { %v3244_v44 = vld [vmem:[#allocation3] ss:$2 sm:$0x7f]  ;;  %v3245_v40 = vld [vmem:[#allocation3 + $0x1] ss:$2 sm:$0x7f] }
 0x29d   : > { %v3224_v43 = vor.u32 %v3223_v50, %v3220_v35  ;;  %v3231_v31 = vld [vmem:[#allocation4 + $0x8] sm:$0xc]  ;;  %v3246_v54 = vmax.f32 %v3244_v44, %v3245_v40  ;;  %3269 = vst.msk [vmem:[#allocation3] sm:$0xff] %vm3093_vm8, %v3267_v8  ;;  %3270 = vst.msk [vmem:[#allocation3 + $0x8] sm:$0xff] %vm3093_vm8, %v3268_v23  ;;  %v3353_v42 = vshll.u32 %v8577_v10, 16  ;;  %v3351_v47 = vshrl.u32 %v8577_v10, 16 }
 0x29e   : > { %v3299_v33 = vld [vmem:[#allocation2 + $0xd0] sm:$0xff]  ;;  %v3297_v9 = vld [vmem:[#allocation2 + $0xc0] sm:$0xff] }
 0x29f   : > { %v3225_v63 = vrot.slane %v3224_v43, 4  ;;  %v3232_v27 = vsel %vm8565_vm10, %v3224_v43, %v3231_v31  ;;  %v6222_v26 = vpack.c.bf16 %v3246_v54, %v3246_v54  ;;  %v3300_v48 = vld [vmem:[#allocation2 + $0xd8] sm:$0xff]  ;;  %v3301_v55 = vmax.f32 %v3297_v9, %v3299_v33  ;;  %v7444_v31 = vld [vmem:[%s9170_s4 + $0x20] sm:$0xff]   ;;  %v7445_v54 = vld [vmem:[%s9170_s4 + $0x28] sm:$0xff]  }
 0x2a0   : > { %3233 = vst [vmem:[#allocation4 + $0x8] sm:$0xc] %v3232_v27  ;;  %v3298_v46 = vld [vmem:[#allocation2 + $0xc8] sm:$0xff]  ;;  %v3355_v51 = vrot.slane %v3353_v42, 1  ;;  %v7446_v9 = vld [vmem:[%s9170_s4 + $0x30] sm:$0xff]  }
 0x2a1   : > { %3235 = vst.msk [vmem:[#allocation4 + $0xc] sm:$0x3] %vm3234_vm11, %v3225_v63  ;;  %v3251_v17 = vrot.slane %v6222_v26, 6  ;;  %v3302_v11 = vmax.f32 %v3298_v46, %v3300_v48  ;;  %v3522_v63 = vld [vmem:[#allocation4] sm:$0xe]  ;;  %vm4321_vm11 = vcmask 523270  }
 0x2a2   : > { %v3356_v45 = vor.u32 %v3355_v51, %v3351_v47  ;;  %v6046_v27 = vcombine.low %v3522_v63, %v8573_v7  ;;  %v7448_v7 = vld [vmem:[%s9170_s4 + $0x38] sm:$0xff]  }
 0x2a3   : > { %3256 = vst.msk [vmem:[#allocation4 + $0xc] sm:$0xc] %vm3228_vm4, %v3251_v17  ;;  %v3252_v38 = vrot.slane %v3251_v17, 4  ;;  %vm3295_vm4 = vcmask 253952  }
 0x2a4   : > { %v3271_v14 = vld [vmem:[#allocation3] ss:$2 sm:$0x7f]  ;;  %v3272_v30 = vld [vmem:[#allocation3 + $0x1] ss:$2 sm:$0x7f]  ;;  %vm3320_vm10 = vmand %vm3295_vm4, %vm3319_vm9 }
 0x2a5   : > { %v3261_v28 = vsel %vm3259_vm13, %v3252_v38, %v3260_v18  ;;  %v3273_v19 = vmax.f32 %v3271_v14, %v3272_v30  ;;  %3303 = vst.msk [vmem:[#allocation3] sm:$0xff] %vm3093_vm8, %v3301_v55  ;;  %3304 = vst.msk [vmem:[#allocation3 + $0x8] sm:$0xff] %vm3093_vm8, %v3302_v11  ;;  %v3534_v33 = vrot.slane %v6046_v27, 1  ;;  %v3620_v11 = vld [vmem:[#allocation4 + $0x4] sm:$0xf]  ;;  %vm4306_vm13 = vcmask 519170  }
 0x2a6   : > { %3262 = vst [vmem:[#allocation4 + $0x10] sm:$0x3] %v3261_v28  ;;  %v3619_v38 = vld [vmem:[#allocation4] sm:$0x8]  ;;  %vm4400_vm9 = vcmask 523264  }
 0x2a7   : > { %v6223_v57 = vpack.c.bf16 %v3273_v19, %v3273_v19  ;;  %v6053_v14 = vcombine.low %v3619_v38, %v3620_v11 }
 0x2a9   : > { %v3279_v12 = vshrl.u32 %v6223_v57, 16  ;;  %v3282_v29 = vshll.u32 %v6223_v57, 16  ;;  %v3646_v57 = vshrl.u32 %v6053_v14, 16 }
 0x2aa   : > { %v8584_v21 = vld [vmem:[#allocation4 + $0x8] sm:$0xff]  }
 0x2ab   : > { %v3281_v58 = vrot.slane %v3279_v12, 6  ;;  %v3284_v61 = vrot.slane %v3282_v29, 7  ;;  %v3358_v34 = vshll.u32 %v8584_v21, 16  ;;  %v3362_v8 = vshrl.u32 %v8584_v21, 16  ;;  %v3622_v56 = vld [vmem:[#allocation4 + $0xc] sm:$0xf] }
 0x2ac   : > { %v3305_v62 = vld [vmem:[#allocation3] ss:$2 sm:$0x7f]  ;;  %v3306_v24 = vld [vmem:[#allocation3 + $0x1] ss:$2 sm:$0x7f] }
 0x2ad   : > { %v3285_v59 = vor.u32 %v3284_v61, %v3281_v58  ;;  %v3292_v20 = vld [vmem:[#allocation4 + $0x10] sm:$0xe]  ;;  %v3360_v22 = vrot.slane %v3358_v34, 1  ;;  %v3307_v39 = vmax.f32 %v3305_v62, %v3306_v24  ;;  %v7442_v16 = vld [vmem:[#allocation4 + $0x10] ss:$0 sps:$4 sm:$0x33]  }
 0x2ae   : > { %v3366_v35 = vshll.u32 %v7442_v16, 16  ;;  %v3370_v40 = vshrl.u32 %v7442_v16, 16  ;;  %v3535_v26 = vrot.slane %v8584_v21, 1  ;;  %v7447_v46 = vld [vmem:[#allocation4 + $0x10] ss:$0 sps:$4 sm:$0x77]  }
 0x2af   : > { %v3293_v15 = vsel %vm3291_vm1, %v3285_v59, %v3292_v20  ;;  %v3286_v25 = vrot.slane %v3285_v59, 4  ;;  %v3361_v52 = vsel %vm183_vm6, %v3356_v45, %v3360_v22  ;;  %v6224_v49 = vpack.c.bf16 %v3307_v39, %v3307_v39  ;;  %v7451_v62 = vld [vmem:[%s9170_s4 + $0x40] sm:$0xff]   ;;  %v7453_v24 = vld [vmem:[%s9170_s4 + $0x48] sm:$0xff]  }
 0x2b0   : > { %3294 = vst [vmem:[#allocation4 + $0x10] sm:$0xe] %v3293_v15  ;;  %6771 = vmatmul.mubr.msk.bf16.vlgmr.msra.gmra.mrb[28].mxu1 %vm3093_vm8, %v3361_v52  ;;  %v3364_v50 = vor.u32 %v3362_v8, %v3360_v22  ;;  %v3368_v53 = vrot.slane %v3366_v35, 1  ;;  %v3536_v48 = vsel %vm688_vm5, %v3534_v33, %v3535_v26  ;;  %v3537_v17 = vrot.slane %v7447_v46, 1  ;;  %v7454_v52 = vld [vmem:[%s9170_s4 + $0x50] sm:$0xff]  }
 0x2b1   : > { %3296 = vst.msk [vmem:[#allocation4 + $0x14] sm:$0x1] %vm3295_vm4, %v3286_v25  ;;  %6783 = vmatpush3.bf16.msra.mxu1 %v7441_v36  ;;  %6774 = vmatprep.mubr.msk.bf16.mxu1 %vm7655_vm7, %v7654_v13  ;;  %v3312_v60 = vrot.slane %v6224_v49, 7  ;;  %v3649_v12 = vshll.u32 %v6053_v14, 16  ;;  %v3648_v58 = vrot.slane %v3646_v57, 3 }
 0x2b2   : > { %6784 = vmatprep.subr.bf16.mxu1 %v7654_v13  ;;  %v3369_v44 = vsel %vm183_vm6, %v3364_v50, %v3368_v53  ;;  %v3372_v43 = vor.u32 %v3370_v40, %v3368_v53  ;;  %v3538_v18 = vsel %vm688_vm5, %v3535_v26, %v3537_v17  ;;  %vm3644_vm5 = vsmask.f32 4352  ;;  %v7457_v50 = vld [vmem:[%s9170_s4 + $0x60] sm:$0xff]  }
 0x2b3   : > { %v3313_v41 = vrot.slane %v3312_v60, 4  ;;  %3317 = vst.msk [vmem:[#allocation4 + $0x14] sm:$0xe] %vm3289_vm14, %v3312_v60  ;;  %v3651_v61 = vrot.slane %v3649_v12, 4  ;;  %vm4307_vm14 = vsmask.f32 3338 }
 0x2b4   : > { %vm4308_vm15 = vmand %vm4306_vm13, %vm4307_vm14  ;;  %vm4341_vm1 = vsmask.f32 1282 }
 0x2b5   : > { %6785 = vmatpush3.bf16.msra.mxu1 %v7443_v37  ;;  %v3322_v23 = vsel %vm3320_vm10, %v3313_v41, %v3321_v32  ;;  %v3652_v20 = vor.u32 %v3651_v61, %v3648_v58  ;;  %v7455_v37 = vld [vmem:[%s9170_s4 + $0x58] sm:$0xff]  }
 0x2b6   : > { %6798 = vmatprep.subr.bf16.mxu1 %v7654_v13  ;;  %3323 = vst [vmem:[#allocation4 + $0x18] sm:$0x1] %v3322_v23 }
 0x2b7   : > { %v3623_v19 = vld [vmem:[#allocation4 + $0x10] sm:$0xf] }
 0x2b8   : > { %6775 = vmatmul.mubr.msk.bf16.gmra.mrb[32].mxu1 %vm3093_vm8, %v3369_v44  ;;  %v3624_v42 = vld [vmem:[#allocation4 + $0x14] sm:$0x1]  ;;  %v6062_v49 = vcombine.low %v3622_v56, %v3623_v19  ;;  %v8704_v26 = vld [vmem:[#allocation4 + $0x10] sm:$0xf] }
 0x2b9   : > { %6778 = vmatprep.mubr.msk.bf16.mxu1 %vm7655_vm7, %v7654_v13  ;;  %v6055_v51 = vcombine.low %v3623_v19, %v3624_v42  ;;  %v7456_v32 = vld [vmem:[#allocation4 + $0x14] ss:$0 sps:$4 sm:$0x33]  }
 0x2ba   : > { %v3851_v41 = vshll.u32 %v6062_v49, 16  ;;  %v3858_v44 = vshll.u32 %v7456_v32, 16  ;;  %v3855_v40 = vshrl.u32 %v6062_v49, 16  ;;  %v3862_v27 = vshrl.u32 %v7456_v32, 16 }
 0x2bb   : > { %v3663_v34 = vshrl.u32 %v6055_v51, 16  ;;  %v3666_v59 = vshll.u32 %v6055_v51, 16 }
 0x2bc   : > { %v3853_v23 = vrot.slane %v3851_v41, 1 }
 0x2bd   : > { %v3665_v22 = vrot.slane %v3663_v34, 3  ;;  %v3668_v36 = vrot.slane %v3666_v59, 4 }
 0x2bf   : > { %v3669_v15 = vor.u32 %v3668_v36, %v3665_v22 }
 0x2c0   : > { %6779 = vmatmul.mubr.msk.bf16.gmra.mrb[36].mxu1 %vm3093_vm8, %v3372_v43  ;;  %v7458_v43 = vld [vmem:[%s9170_s4 + $0x68] sm:$0xff]  }
 0x2c1   : > { %6786 = vmatprep.mubr.msk.bf16.mxu1 %vm7655_vm7, %v7654_v13 }
 0x2c8   : > { %6787 = vmatmul.mubr.msk.bf16.vlgmr.msra.gmra.mrb[28].mxu1 %vm3093_vm8, %v8577_v10  ;;  %v3621_v10 = vld [vmem:[#allocation4 + $0x8] sm:$0xf] }
 0x2c9   : > { %6799 = vmatpush3.bf16.msra.mxu1 %v7444_v31  ;;  %6790 = vmatprep.mubr.msk.bf16.mxu1 %vm7655_vm7, %v7654_v13  ;;  %v6054_v55 = vcombine.low %v3621_v10, %v3622_v56  ;;  %v6061_v39 = vcombine.low %v3620_v11, %v3621_v10  ;;  %v3857_v31 = vor.u32 %v3855_v40, %v3853_v23  ;;  %v3950_v11 = vld [vmem:[#allocation4 + $0x18] sm:$0x1] }
 0x2ca   : > { %6800 = vmatprep.subr.bf16.mxu1 %v7654_v13 }
 0x2cb   : > { %v3654_v30 = vshrl.u32 %v6054_v55, 16  ;;  %v3657_v28 = vshll.u32 %v6054_v55, 16  ;;  %v3847_v60 = vshll.u32 %v6061_v39, 16  ;;  %v3845_v8 = vshrl.u32 %v6061_v39, 16  ;;  %v3949_v55 = vld [vmem:[#allocation4 + $0x14] sm:$0xf] }
 0x2cc   : > { %v6076_v14 = vcombine.low %v3949_v55, %v3950_v11 }
 0x2cd   : > { %6801 = vmatpush3.bf16.msra.mxu1 %v7445_v54  ;;  %v3656_v29 = vrot.slane %v3654_v30, 3  ;;  %v3860_v54 = vrot.slane %v3858_v44, 1  ;;  %v7463_v30 = vld [vmem:[%s9170_s4 + $0x78] sm:$0xff]  }
 0x2ce   : > { %6814 = vmatprep.subr.bf16.mxu1 %v7654_v13  ;;  %v4078_v34 = vshrl.u32 %v6076_v14, 16  ;;  %v4081_v59 = vshll.u32 %v6076_v14, 16 }
 0x2cf   : > { %v3861_v63 = vsel %vm183_vm6, %v3857_v31, %v3860_v54  ;;  %v3864_v33 = vor.u32 %v3862_v27, %v3860_v54  ;;  %v7469_v27 = vld [vmem:[%s9173_s7 + $0x20] sm:$0xff]  }
 0x2d0   : > { %6791 = vmatmul.mubr.msk.bf16.gmra.mrb[32].mxu1 %vm3093_vm8, %v8584_v21  ;;  %v3659_v21 = vrot.slane %v3657_v28, 4  ;;  %v3974_v28 = vrot.slane %v6076_v14, 3  ;;  %v4080_v22 = vrot.slane %v4078_v34, 3  ;;  %v4083_v36 = vrot.slane %v4081_v59, 4 }
 0x2d1   : > { %6794 = vmatprep.mubr.msk.bf16.mxu1 %vm7655_vm7, %v7654_v13 }
 0x2d2   : > { %v3660_v47 = vor.u32 %v3659_v21, %v3656_v29 }
 0x2d4   : > { %v3661_v45 = vsel %vm3644_vm5, %v3652_v20, %v3660_v47  ;;  %v3670_v25 = vsel %vm3644_vm5, %v3660_v47, %v3669_v15 }
 0x2d8   : > { %6795 = vmatmul.mubr.msk.bf16.gmra.mrb[40].mxu1 %vm3093_vm8, %v7442_v16  ;;  %v3849_v16 = vrot.slane %v3847_v60, 1 }
 0x2d9   : > { %6802 = vmatprep.mubr.msk.bf16.mxu1 %vm7655_vm7, %v7654_v13 }
 0x2da   : > { %v3850_v35 = vor.u32 %v3849_v16, %v3845_v8 }
 0x2dc   : > { %v3854_v53 = vsel %vm183_vm6, %v3850_v35, %v3853_v23  ;;  %vm3970_vm6 = vcmask 1044480  }
 0x2e0   : > { %6803 = vmatmul.mubr.msk.bf16.vlgmr.msra.gmra.mrb[28].mxu1 %vm3093_vm8, %v3536_v48  ;;  %v3947_v48 = vld [vmem:[#allocation4 + $0xc] sm:$0xf] }
 0x2e1   : > { %6815 = vmatpush3.bf16.msra.mxu1 %v7446_v9  ;;  %6806 = vmatprep.mubr.msk.bf16.mxu1 %vm7655_vm7, %v7654_v13  ;;  %v3946_v9 = vld [vmem:[#allocation4 + $0x8] sm:$0xf]  ;;  %v6075_v46 = vcombine.low %v3947_v48, %v8704_v26 }
 0x2e2   : > { %6816 = vmatprep.subr.bf16.mxu1 %v7654_v13 }
 0x2e3   : > { %v3972_v56 = vrot.slane %v6075_v46, 3  ;;  %v4069_v42 = vshrl.u32 %v6075_v46, 16  ;;  %v4072_v57 = vshll.u32 %v6075_v46, 16 }
 0x2e5   : > { %6817 = vmatpush3.bf16.msra.mxu1 %v7448_v7  ;;  %v3945_v7 = vld [vmem:[#allocation4 + $0x4] sm:$0x8]  ;;  %v3975_v19 = vsel %vm3970_vm6, %v3972_v56, %v3974_v28  ;;  %v4071_v21 = vrot.slane %v4069_v42, 3  ;;  %v4074_v51 = vrot.slane %v4072_v57, 4 }
 0x2e6   : > { %6830 = vmatprep.subr.bf16.mxu1 %v7654_v13 }
 0x2e7   : > { %v4075_v47 = vor.u32 %v4074_v51, %v4071_v21 }
 0x2e8   : > { %6807 = vmatmul.mubr.msk.bf16.gmra.mrb[32].mxu1 %vm3093_vm8, %v3538_v18  ;;  %v7461_v18 = vld [vmem:[%s9170_s4 + $0x70] sm:$0xff]  }
 0x2e9   : > { %6810 = vmatprep.mubr.msk.bf16.mxu1 %vm7655_vm7, %v7654_v13 }
 0x2f0   : > { %6811 = vmatmul.mubr.msk.bf16.gmra.mrb[44].mxu1 %vm3093_vm8, %v3537_v17  ;;  %v6074_v17 = vcombine.low %v3945_v7, %v3946_v9 }
 0x2f1   : > { %6818 = vmatprep.mubr.msk.bf16.mxu1 %vm7655_vm7, %v7654_v13 }
 0x2f2   : > { %v3971_v10 = vrot.slane %v6074_v17, 3  ;;  %v4061_v12 = vshrl.u32 %v6074_v17, 16  ;;  %v4064_v29 = vshll.u32 %v6074_v17, 16 }
 0x2f4   : > { %v3973_v38 = vsel %vm3970_vm6, %v3971_v10, %v3972_v56  ;;  %v4063_v58 = vrot.slane %v4061_v12, 3  ;;  %v4066_v61 = vrot.slane %v4064_v29, 4 }
 0x2f6   : > { %v4067_v20 = vor.u32 %v4066_v61, %v4063_v58 }
 0x2f8   : > { %6819 = vmatmul.mubr.msk.bf16.vlgmr.msra.gmra.mrb[28].mxu1 %vm3093_vm8, %v3661_v45  ;;  %v4076_v45 = vsel %vm3644_vm5, %v4067_v20, %v4075_v47 }
 0x2f9   : > { %6831 = vmatpush3.bf16.msra.mxu1 %v7451_v62  ;;  %6822 = vmatprep.mubr.msk.bf16.mxu1 %vm7655_vm7, %v7654_v13  ;;  %v7464_v62 = vld [vmem:[%s9170_s4 + $0x80] sm:$0xff]  }
 0x2fa   : > { %6832 = vmatprep.subr.bf16.mxu1 %v7654_v13 }
 0x2fd   : > { %6833 = vmatpush3.bf16.msra.mxu1 %v7453_v24  ;;  %v7465_v24 = vld [vmem:[%s9170_s4 + $0x88] sm:$0xff]  }
 0x2fe   : > { %6846 = vmatprep.subr.bf16.mxu1 %v7654_v13 }
 0x300   : > { %6823 = vmatmul.mubr.msk.bf16.gmra.mrb[32].mxu1 %vm3093_vm8, %v3670_v25 }
 0x301   : > { %6826 = vmatprep.mubr.msk.bf16.mxu1 %vm7655_vm7, %v7654_v13 }
 0x308   : > { %6827 = vmatmul.mubr.msk.bf16.gmra.mrb[48].mxu1 %vm3093_vm8, %v3669_v15  ;;  %v4084_v15 = vor.u32 %v4083_v36, %v4080_v22 }
 0x309   : > { %6834 = vmatprep.mubr.msk.bf16.mxu1 %vm7655_vm7, %v7654_v13 }
 0x30a   : > { %v4085_v25 = vsel %vm3644_vm5, %v4075_v47, %v4084_v15 }
 0x310   : > { %6835 = vmatmul.mubr.msk.bf16.vlgmr.msra.gmra.mrb[28].mxu1 %vm3093_vm8, %v6061_v39  ;;  %v6088_v39 = vcombine.low %v8704_v26, %v3949_v55  ;;  %v7470_v26 = vld [vmem:[%s9173_s7 + $0x28] sm:$0xff]  }
 0x311   : > { %6847 = vmatpush3.bf16.msra.mxu1 %v7454_v52  ;;  %6838 = vmatprep.mubr.msk.bf16.mxu1 %vm7655_vm7, %v7654_v13  ;;  %v6087_v52 = vcombine.low %v3946_v9, %v3947_v48  ;;  %v7472_v48 = vld [vmem:[%s9173_s7 + $0x38] sm:$0xff]  }
 0x312   : > { %6848 = vmatprep.subr.bf16.mxu1 %v7654_v13 }
 0x315   : > { %6849 = vmatpush3.bf16.msra.mxu1 %v7455_v37  ;;  %v7468_v37 = vld [vmem:[#allocation4 + $0x18] ss:$0 sps:$4 sm:$0x33]  }
 0x316   : > { %6862 = vmatprep.subr.bf16.mxu1 %v7654_v13 }
 0x318   : > { %6839 = vmatmul.mubr.msk.bf16.gmra.mrb[32].mxu1 %vm3093_vm8, %v6062_v49 }
 0x319   : > { %6842 = vmatprep.mubr.msk.bf16.mxu1 %vm7655_vm7, %v7654_v13 }
 0x320   : > { %6843 = vmatmul.mubr.msk.bf16.gmra.mrb[52].mxu1 %vm3093_vm8, %v7456_v32 }
 0x321   : > { %6850 = vmatprep.mubr.msk.bf16.mxu1 %vm7655_vm7, %v7654_v13 }
 0x328   : > { %6851 = vmatmul.mubr.msk.bf16.vlgmr.msra.gmra.mrb[28].mxu1 %vm3093_vm8, %v3854_v53 }
 0x329   : > { %6863 = vmatpush3.bf16.msra.mxu1 %v7457_v50  ;;  %6854 = vmatprep.mubr.msk.bf16.mxu1 %vm7655_vm7, %v7654_v13 }
 0x32a   : > { %6864 = vmatprep.subr.bf16.mxu1 %v7654_v13 }
 0x32d   : > { %6865 = vmatpush3.bf16.msra.mxu1 %v7458_v43 }
 0x32e   : > { %6878 = vmatprep.subr.bf16.mxu1 %v7654_v13 }
 0x330   : > { %6855 = vmatmul.mubr.msk.bf16.gmra.mrb[32].mxu1 %vm3093_vm8, %v3861_v63 }
 0x331   : > { %6858 = vmatprep.mubr.msk.bf16.mxu1 %vm7655_vm7, %v7654_v13 }
 0x338   : > { %6859 = vmatmul.mubr.msk.bf16.gmra.mrb[56].mxu1 %vm3093_vm8, %v3864_v33  ;;  %v7471_v33 = vld [vmem:[%s9173_s7 + $0x30] sm:$0xff]  }
 0x339   : > { %6866 = vmatprep.mubr.msk.bf16.mxu1 %vm7655_vm7, %v7654_v13 }
 0x340   : > { %6867 = vmatmul.mubr.msk.bf16.vlgmr.msra.gmra.mrb[28].mxu1 %vm3093_vm8, %v3973_v38 }
 0x341   : > { %6879 = vmatpush3.bf16.msra.mxu1 %v7461_v18  ;;  %6870 = vmatprep.mubr.msk.bf16.mxu1 %vm7655_vm7, %v7654_v13 }
 0x342   : > { %6880 = vmatprep.subr.bf16.mxu1 %v7654_v13 }
 0x345   : > { %6881 = vmatpush3.bf16.msra.mxu1 %v7463_v30 }
 0x346   : > { %6894 = vmatprep.subr.bf16.mxu1 %v7654_v13 }
 0x348   : > { %6871 = vmatmul.mubr.msk.bf16.gmra.mrb[32].mxu1 %vm3093_vm8, %v3975_v19 }
 0x349   : > { %6874 = vmatprep.mubr.msk.bf16.mxu1 %vm7655_vm7, %v7654_v13 }
 0x350   : > { %6875 = vmatmul.mubr.msk.bf16.gmra.mrb[60].mxu1 %vm3093_vm8, %v3974_v28 }
 0x351   : > { %6882 = vmatprep.mubr.msk.bf16.mxu1 %vm7655_vm7, %v7654_v13 }
 0x358   : > { %6883 = vmatmul.mubr.msk.bf16.vlgmr.msra.gmra.mrb[28].mxu1 %vm3093_vm8, %v4076_v45 }
 0x359   : > { %6895 = vmatpush3.bf16.msra.mxu1 %v7464_v62  ;;  %6886 = vmatprep.mubr.msk.bf16.mxu1 %vm7655_vm7, %v7654_v13 }
 0x35a   : > { %6896 = vmatprep.subr.bf16.mxu1 %v7654_v13 }
 0x35d   : > { %6897 = vmatpush3.bf16.msra.mxu1 %v7465_v24 }
 0x35e   : > { %6910 = vmatprep.subr.bf16.mxu1 %v7654_v13 }
 0x360   : > { %6887 = vmatmul.mubr.msk.bf16.gmra.mrb[32].mxu1 %vm3093_vm8, %v4085_v25 }
 0x361   : > { %6890 = vmatprep.mubr.msk.bf16.mxu1 %vm7655_vm7, %v7654_v13 }
 0x368   : > { %6891 = vmatmul.mubr.msk.bf16.gmra.mrb[64].mxu1 %vm3093_vm8, %v4084_v15 }
 0x369   : > { %6898 = vmatprep.mubr.msk.bf16.mxu1 %vm7655_vm7, %v7654_v13 }
 0x370   : > { %6899 = vmatmul.mubr.msk.bf16.vlgmr.msra.gmra.mrb[28].mxu1 %vm3093_vm8, %v6087_v52 }
 0x371   : > { %6902 = vmatprep.mubr.msk.bf16.mxu1 %vm7655_vm7, %v7654_v13  ;;  %6911 = vmatpush3.bf16.msra.mxu1 %v7469_v27 }
 0x372   : > { %6912 = vmatprep.subr.bf16.mxu1 %v7654_v13 }
 0x375   : > { %6913 = vmatpush3.bf16.msra.mxu1 %v7470_v26 }
 0x376   : > { %6914 = vmatprep.subr.bf16.mxu1 %v7654_v13 }
 0x378   : > { %6903 = vmatmul.mubr.msk.bf16.gmra.mrb[32].mxu1 %vm3093_vm8, %v6088_v39 }
 0x379   : > { %6906 = vmatprep.mubr.msk.bf16.mxu1 %vm7655_vm7, %v7654_v13  ;;  %6915 = vmatpush3.bf16.msra.mxu1 %v7471_v33 }
 0x37a   : > { %6916 = vmatprep.subr.bf16.mxu1 %v7654_v13 }
 0x37d   : > { %6917 = vmatpush3.bf16.msra.mxu1 %v7472_v48 }
 0x37e   : > { %6922 = vmatprep.subr.bf16.mxu1 %v7654_v13 }
 0x380   : > { %6907 = vmatmul.mubr.msk.bf16.gmra.mrb[68].mxu1 %vm3093_vm8, %v7468_v37  ;;  %vm4287_vm8 = vcmask 522240  }
 0x381   : > { %6918 = vmatprep.mubr.msk.bf16.mxu1 %vm7655_vm7, %v7654_v13 }
 0x393   : > { %v3444_v49 = vpop.f32.mrb[36].mxu1 }
 0x394   : > { %v6780_v60 = vpop.f32.mrb[37].mxu1 }
 0x395   : > { %v3446_v32 = vpop.f32.mrb[38].mxu1 }
 0x396   : > { %v6781_v41 = vpop.f32.mrb[39].mxu1 }
 0x3ab   : > { %v3517_v16 = vpop.f32.mrb[40].mxu1 }
 0x3ac   : > { %v6796_v23 = vpop.f32.mrb[41].mxu1 }
 0x3ad   : > { %v3519_v8 = vpop.f32.mrb[42].mxu1 }
 0x3ae   : > { %v6797_v35 = vpop.f32.mrb[43].mxu1 }
 0x3c3   : > { %v3610_v50 = vpop.f32.mrb[44].mxu1 }
 0x3c4   : > { %v6812_v53 = vpop.f32.mrb[45].mxu1 }
 0x3c5   : > { %v3612_v44 = vpop.f32.mrb[46].mxu1 }
 0x3c6   : > { %v6813_v40 = vpop.f32.mrb[47].mxu1 }
 0x3db   : > { %v3742_v43 = vpop.f32.mrb[48].mxu1 }
 0x3dc   : > { %v6828_v31 = vpop.f32.mrb[49].mxu1 }
 0x3dd   : > { %v3744_v54 = vpop.f32.mrb[50].mxu1 }
 0x3de   : > { %v6829_v63 = vpop.f32.mrb[51].mxu1 }
 0x3f3   : > { %v3832_v9 = vpop.f32.mrb[52].mxu1 }
 0x3f4   : > { %v6844_v46 = vpop.f32.mrb[53].mxu1 }
 0x3f5   : > { %v3834_v7 = vpop.f32.mrb[54].mxu1  ;;  %v4309_v46 = vld [vmem:[#allocation6] sm:$0xc] }
 0x3f6   : > { %v6845_v17 = vpop.f32.mrb[55].mxu1 }
 0x40b   : > { %v3936_v56 = vpop.f32.mrb[56].mxu1 }
 0x40c   : > { %v6860_v11 = vpop.f32.mrb[57].mxu1 }
 0x40d   : > { %v3938_v10 = vpop.f32.mrb[58].mxu1 }
 0x40e   : > { %v6861_v18 = vpop.f32.mrb[59].mxu1 }
 0x423   : > { %v4047_v55 = vpop.f32.mrb[60].mxu1 }
 0x424   : > { %v6876_v38 = vpop.f32.mrb[61].mxu1 }
 0x425   : > { %v4049_v14 = vpop.f32.mrb[62].mxu1 }
 0x426   : > { %v6877_v30 = vpop.f32.mrb[63].mxu1 }
 0x427   : > { %v4343_v30 = vld [vmem:[#allocation6 + $0x4] sm:$0x3] }
 0x43b   : > { %v4157_v28 = vpop.f32.mrb[64].mxu1 }
 0x43c   : > { %v6892_v19 = vpop.f32.mrb[65].mxu1 }
 0x43d   : > { %v4159_v42 = vpop.f32.mrb[66].mxu1 }
 0x43e   : > { %v6893_v57 = vpop.f32.mrb[67].mxu1 }
 0x443   : > { %v4231_v12 = vpop.f32.mrb[28].mxu1 }
 0x444   : > { %v4262_v29 = vmul.f32 %v7751_v2, %v4231_v12  ;;  %v6900_v21 = vpop.f32.mrb[29].mxu1 }
 0x445   : > { %v4234_v51 = vpop.f32.mrb[30].mxu1 }
 0x446   : > { %v4272_v58 = vadd.f32 %v7756_v3, %v4262_v29  ;;  %v4263_v61 = vmul.f32 %v7751_v2, %v4234_v51  ;;  %v6901_v47 = vpop.f32.mrb[31].mxu1 }
 0x447   : > { %v7475_v47 = vld [vmem:[%s9173_s7 + $0x8] sm:$0xff]  }
 0x448   : > { %v4276_v34 = vmax.f32 %v4272_v58, 0.0  ;;  %v4273_v59 = vadd.f32 %v7756_v3, %v4263_v61  ;;  %v7474_v58 = vld [vmem:[%s9173_s7] sm:$0xff]  }
 0x44a   : > { %v4277_v20 = vmax.f32 %v4273_v59, 0.0  ;;  %v4282_v45 = vrot.slane %v4276_v34, 7  ;;  %v7477_v59 = vld [vmem:[%s9173_s7 + $0x18] sm:$0xff]  }
 0x44b   : > { %v4239_v62 = vpop.f32.mrb[32].mxu1 }
 0x44c   : > { %v4283_v22 = vrot.slane %v4277_v20, 7  ;;  %v4264_v36 = vmul.f32 %v7751_v2, %v4239_v62  ;;  %v6904_v24 = vpop.f32.mrb[33].mxu1  ;;  %v7479_v62 = vld [vmem:[%s9173_s7 + $0x48] sm:$0xff]  }
 0x44d   : > { %v4242_v15 = vpop.f32.mrb[34].mxu1 }
 0x44e   : > { %v4284_v25 = vsel %vm354_vm2, %v4282_v45, %v4283_v22  ;;  %v4274_v52 = vadd.f32 %v7756_v3, %v4264_v36  ;;  %v4265_v39 = vmul.f32 %v7751_v2, %v4242_v15  ;;  %v6905_v37 = vpop.f32.mrb[35].mxu1  ;;  %v7480_v45 = vld [vmem:[%s9173_s7 + $0x50] sm:$0xff]   ;;  %v7481_v22 = vld [vmem:[%s9173_s7 + $0x58] sm:$0xff]   ;;  %v7483_v15 = vld [vmem:[%s9173_s7 + $0x60] sm:$0xff]  }
 0x44f   : > { %v4286_v49 = vmax.f32 %v4276_v34, %v4284_v25  ;;  %v7476_v34 = vld [vmem:[%s9173_s7 + $0x10] sm:$0xff]   ;;  %v7524_v2 = vld [vmem:[%s9176_s10 + $0x2c] ss:$16 sps:$4 sm:$0xff] (%p72_p0)  }
 0x450   : > { %v4278_v60 = vmax.f32 %v4274_v52, 0.0  ;;  %v4275_v32 = vadd.f32 %v7756_v3, %v4265_v39  ;;  %v7484_v52 = vld [vmem:[%s9173_s7 + $0x68] sm:$0xff]   ;;  %v7485_v39 = vld [vmem:[%s9173_s7 + $0x70] sm:$0xff]  }
 0x451   : > { %4288 = vst.msk [vmem:[#allocation5] sm:$0x7f] %vm4287_vm8, %v4286_v49  ;;  %v7486_v49 = vld [vmem:[%s9173_s7 + $0x78] sm:$0xff]   ;;  %v7526_v3 = vld [vmem:[%s9176_s10 + $0x20] ss:$16 sps:$4 sm:$0xff] (%p72_p0)  }
 0x452   : > { %v4314_v41 = vrot.slane %v4278_v60, 7  ;;  %v4279_v16 = vmax.f32 %v4275_v32, 0.0 }
 0x453   : > { %v4247_v23 = vpop.f32.mrb[68].mxu1 }
 0x454   : > { %v4319_v8 = vmax.f32 %v4277_v20, %v4314_v41  ;;  %v4315_v35 = vrot.slane %v4279_v16, 7  ;;  %v6908_v50 = vpop.f32.mrb[69].mxu1  ;;  %v7478_v20 = vld [vmem:[%s9173_s7 + $0x40] sm:$0xff]  }
 0x455   : > { %v4249_v53 = vpop.f32.mrb[70].mxu1  ;;  %v7491_v50 = vld [vmem:[%s9173_s7 + $0x90] sm:$0xff]  }
 0x456   : > { %v4316_v44 = vsel %vm354_vm2, %v4314_v41, %v4315_v35  ;;  %v6909_v40 = vpop.f32.mrb[71].mxu1  ;;  %vm4340_vm2 = vcmask 517120   ;;  %v7489_v41 = vld [vmem:[%s9173_s7 + $0x80] sm:$0xff]  }
 0x457   : > { %v4320_v43 = vmax.f32 %v4278_v60, %v4316_v44  ;;  %vm4342_vm4 = vmand %vm4340_vm2, %vm4341_vm1  ;;  %v7492_v40 = vld [vmem:[%s9173_s7 + $0x98] sm:$0xff]  }
 0x458   : > { %v4289_v31 = vld [vmem:[#allocation5] ss:$2 sm:$0x3]  ;;  %v4291_v54 = vld [vmem:[#allocation5 + $0x1] ss:$2 sm:$0x3] }
 0x459   : > { %v4292_v63 = vmax.f32 %v4289_v31, %v4291_v54  ;;  %4322 = vst.msk [vmem:[#allocation5 - $0x6] sm:$0xc0] %vm4321_vm11, %v4319_v8  ;;  %v7490_v8 = vld [vmem:[%s9173_s7 + $0x88] sm:$0xff]   ;;  %v7493_v54 = vld [vmem:[%s9173_s7 + $0xa0] sm:$0xff]  }
 0x45a   : > { %4324 = vst.msk [vmem:[#allocation5 + $0x2] sm:$0x1f] %vm4323_vm12, %v4320_v43 }
 0x45b   : > { %v6225_v27 = vpack.c.bf16 %v4292_v63, %v4292_v63 }
 0x45d   : > { %v4298_v26 = vshrl.u32 %v6225_v27, 16  ;;  %v4301_v33 = vshll.u32 %v6225_v27, 16  ;;  %v7494_v27 = vld [vmem:[%s9173_s7 + $0xa8] sm:$0xff]  }
 0x45f   : > { %v4300_v9 = vrot.slane %v4298_v26, 5  ;;  %v4303_v48 = vrot.slane %v4301_v33, 6  ;;  %v7495_v26 = vld [vmem:[%s9173_s7 + $0xb0] sm:$0xff]   ;;  %v7496_v33 = vld [vmem:[%s9173_s7 + $0xb8] sm:$0xff]  }
 0x461   : > { %v4325_v7 = vld [vmem:[#allocation5] ss:$2 sm:$0x3]  ;;  %v4326_v17 = vld [vmem:[#allocation5 + $0x1] ss:$2 sm:$0x3]  ;;  %v4304_v56 = vor.u32 %v4303_v48, %v4300_v9 }
 0x462   : > { %v4327_v11 = vmax.f32 %v4325_v7, %v4326_v17  ;;  %v7499_v17 = vld [vmem:[%s9173_s7 + $0xc8] sm:$0xff]  }
 0x463   : > { %v4310_v10 = vsel %vm4308_vm15, %v4304_v56, %v4309_v46  ;;  %v7498_v46 = vld [vmem:[%s9173_s7 + $0xc0] sm:$0xff]   ;;  %v7500_v56 = vld [vmem:[%s9173_s7 + $0xd0] sm:$0xff]  }
 0x464   : > { %v6226_v18 = vpack.c.bf16 %v4327_v11, %v4327_v11  ;;  %4311 = vst [vmem:[#allocation6] sm:$0xc] %v4310_v10  ;;  %v7501_v11 = vld [vmem:[%s9173_s7 + $0xd8] sm:$0xff]   ;;  %v7502_v10 = vld [vmem:[%s9173_s7 + $0xe0] sm:$0xff]  }
 0x466   : > { %v4333_v55 = vshrl.u32 %v6226_v18, 16  ;;  %v4336_v14 = vshll.u32 %v6226_v18, 16 }
 0x468   : > { %v4335_v38 = vrot.slane %v4333_v55, 7 }
 0x46a   : > { %v4338_v28 = vor.u32 %v4336_v14, %v4335_v38  ;;  %v4923_v38 = vld [vmem:[#allocation6 + $0x8] sm:$0x1]  ;;  %v7503_v14 = vld [vmem:[%s9173_s7 + $0xe8] sm:$0xff]  }
 0x46b   : > { %v4346_v42 = vld [vmem:[#allocation6] sm:$0xf] }
 0x46c   : > { %v4344_v19 = vsel %vm4342_vm4, %v4338_v28, %v4343_v30  ;;  %v4511_v36 = vld [vmem:[#allocation6] sm:$0xe] }
 0x46d   : > { %4345 = vst [vmem:[#allocation6 + $0x4] sm:$0x3] %v4344_v19  ;;  %v4592_v60 = vld [vmem:[#allocation6] sm:$0xc] }
 0x46e   : > { %v4764_v9 = vld [vmem:[#allocation6] sm:$0x8] }
 0x46f   : > { %v7504_v28 = vld [vmem:[%s9173_s7 + $0xf0] sm:$0xff]  }
 0x474   : > { %v4355_v57 = vld [vmem:[#allocation6 + $0x4] sm:$0x1] }
 0x475   : > { %v6099_v12 = vcombine.low %v4346_v42, %v4355_v57  ;;  %v6110_v24 = vcombine.low %v4511_v36, %v4355_v57  ;;  %v4593_v37 = vld [vmem:[#allocation6 + $0x4] sm:$0x3] }
 0x476   : > { %v6116_v32 = vcombine.low %v4592_v60, %v4593_v37  ;;  %v4676_v23 = vld [vmem:[#allocation6 + $0x4] sm:$0x7] }
 0x477   : > { %v4372_v29 = vshll.u32 %v6099_v12, 16  ;;  %v4370_v21 = vshrl.u32 %v6099_v12, 16  ;;  %v4523_v25 = vrot.slane %v6110_v24, 1  ;;  %v6122_v35 = vcombine.low %v4592_v60, %v4676_v23  ;;  %v4845_v18 = vld [vmem:[#allocation6 + $0x4] sm:$0xf] }
 0x478   : > { %v4607_v16 = vrot.slane %v6116_v32, 2  ;;  %v6128_v48 = vcombine.low %v4764_v9, %v4676_v23  ;;  %v4922_v55 = vld [vmem:[#allocation6 + $0x4] sm:$0xf]  ;;  %v7538_v9 = vld [vmem:[%s9176_s10 + $0x60] ss:$16 sps:$4 sm:$0xff] (%p72_p0)  }
 0x479   : > { %v4374_v51 = vrot.slane %v4372_v29, 1  ;;  %v4689_v53 = vshrl.u32 %v6122_v35, 16  ;;  %v4692_v44 = vshll.u32 %v6122_v35, 16  ;;  %v6139_v30 = vcombine.low %v4922_v55, %v4923_v38  ;;  %v7507_v29 = vld [vmem:[%s9173_s7 + $0x100] sm:$0xff]   ;;  %v7551_v55 = vld [vmem:[%s9176_s10 + $0xa8] ss:$16 sps:$4 sm:$0xff] (%p72_p0)  }
 0x47a   : > { %v4776_v7 = vrot.slane %v6128_v48, 3  ;;  %v7539_v48 = vld [vmem:[%s9176_s10 + $0x68] ss:$16 sps:$4 sm:$0xff] (%p72_p0)  }
 0x47b   : > { %v4375_v61 = vor.u32 %v4374_v51, %v4370_v21  ;;  %v4691_v43 = vrot.slane %v4689_v53, 2  ;;  %v4694_v31 = vrot.slane %v4692_v44, 3  ;;  %v4940_v19 = vshll.u32 %v6139_v30, 16  ;;  %v7508_v51 = vld [vmem:[%s9173_s7 + $0x108] sm:$0xff]  }
 0x47c   : > { %v4938_v12 = vshrl.u32 %v6139_v30, 16  ;;  %v7556_v30 = vld [vmem:[%s9176_s10 + $0xc0] ss:$16 sps:$4 sm:$0xff] (%p72_p0)  }
 0x47d   : > { %6919 = vmatmul.mubr.msk.bf16.vlgmr.msra.gmra.mrb[72].mxu1 %vm4400_vm9, %v4375_v61  ;;  %v4695_v63 = vor.u32 %v4694_v31, %v4691_v43  ;;  %v4942_v57 = vrot.slane %v4940_v19, 1  ;;  %v5012_v61 = vld [vmem:[#allocation6 + $0x4] sm:$0xe]  ;;  %v7516_v43 = vld [vmem:[%s9176_s10 + $0x4] ss:$16 sps:$4 sm:$0xff] (%p72_p0)  }
 0x47e   : > { %6923 = vmatpush3.bf16.msra.mxu1 %v7474_v58  ;;  %6930 = vmatprep.mubr.msk.bf16.mxu1 %vm7655_vm7, %v7654_v13  ;;  %v7509_v58 = vld [vmem:[%s9173_s7 + $0x110] sm:$0xff]   ;;  %v7518_v31 = vld [vmem:[%s9176_s10 + $0xc] ss:$16 sps:$4 sm:$0xff] (%p72_p0)  }
 0x47f   : > { %6924 = vmatprep.subr.bf16.mxu1 %v7654_v13  ;;  %v4943_v21 = vor.u32 %v4942_v57, %v4938_v12  ;;  %5345 = vmatprep.subr.bf16.mxu0 (%p72_p0), %v7516_v43  ;;  %v7558_v19 = vld [vmem:[%s9176_s10 + $0xe4] ss:$16 sps:$4 sm:$0xff] (%p72_p0)   ;;  %v7562_v57 = vld [vmem:[%s9176_s10 + $0xe0] ss:$16 sps:$4 sm:$0xff] (%p72_p0)   ;;  %v7563_v12 = vld [vmem:[%s9176_s10 + $0xe8] ss:$16 sps:$4 sm:$0xff] (%p72_p0)  }
 0x480   :  { %v7594_v43 = vld [vmem:[%s9178_s12 + $0x38] sm:$0xff] (%p72_p0)  }
 0x482   : > { %6925 = vmatpush3.bf16.msra.mxu1 %v7475_v47  ;;  %v7510_v47 = vld [vmem:[%s9173_s7 + $0x118] sm:$0xff]  }
 0x483   : > { %6926 = vmatprep.subr.bf16.mxu1 %v7654_v13 }
 0x486   : > { %6927 = vmatpush3.bf16.msra.mxu1 %v7476_v34  ;;  %v6145_v34 = vcombine.low %v5012_v61, %v4923_v38  ;;  %v7552_v38 = vld [vmem:[%s9176_s10 + $0xc4] ss:$16 sps:$4 sm:$0xff] (%p72_p0)  }
 0x487   : > { %6928 = vmatprep.subr.bf16.mxu1 %v7654_v13 }
 0x48a   : > { %6929 = vmatpush3.bf16.msra.mxu1 %v7477_v59  ;;  %v5024_v59 = vrot.slane %v6145_v34, 1  ;;  %v7568_v34 = vld [vmem:[%s9178_s12 + $0x48] sm:$0xff] (%p72_p0)  }
 0x48b   : > { %6934 = vmatprep.subr.bf16.mxu1 %v7654_v13 }
 0x48d   : > { %6931 = vmatmul.mubr.msk.bf16.vlgmr.msra.gmra.mrb[72].mxu1 %vm4400_vm9, %v4346_v42  ;;  %v7505_v42 = vld [vmem:[%s9173_s7 + $0xf8] sm:$0xff]  }
 0x48e   : > { %6935 = vmatpush3.bf16.msra.mxu1 %v7478_v20  ;;  %6942 = vmatprep.mubr.msk.bf16.mxu1 %vm7655_vm7, %v7654_v13 }
 0x48f   : > { %6936 = vmatprep.subr.bf16.mxu1 %v7654_v13 }
 0x492   : > { %6937 = vmatpush3.bf16.msra.mxu1 %v7479_v62 }
 0x493   : > { %6938 = vmatprep.subr.bf16.mxu1 %v7654_v13 }
 0x496   : > { %6939 = vmatpush3.bf16.msra.mxu1 %v7480_v45 }
 0x497   : > { %6940 = vmatprep.subr.bf16.mxu1 %v7654_v13 }
 0x49a   : > { %6941 = vmatpush3.bf16.msra.mxu1 %v7481_v22 }
 0x49b   : > { %6946 = vmatprep.subr.bf16.mxu1 %v7654_v13 }
 0x49d   : > { %6943 = vmatmul.mubr.msk.bf16.vlgmr.msra.gmra.mrb[72].mxu1 %vm4400_vm9, %v4523_v25 }
 0x49e   : > { %6947 = vmatpush3.bf16.msra.mxu1 %v7483_v15  ;;  %6954 = vmatprep.mubr.msk.bf16.mxu1 %vm7655_vm7, %v7654_v13 }
 0x49f   : > { %6948 = vmatprep.subr.bf16.mxu1 %v7654_v13 }
 0x4a2   : > { %6949 = vmatpush3.bf16.msra.mxu1 %v7484_v52 }
 0x4a3   : > { %6950 = vmatprep.subr.bf16.mxu1 %v7654_v13 }
 0x4a6   : > { %6951 = vmatpush3.bf16.msra.mxu1 %v7485_v39 }
 0x4a7   : > { %6952 = vmatprep.subr.bf16.mxu1 %v7654_v13 }
 0x4aa   : > { %6953 = vmatpush3.bf16.msra.mxu1 %v7486_v49 }
 0x4ab   : > { %6958 = vmatprep.subr.bf16.mxu1 %v7654_v13 }
 0x4ad   : > { %6955 = vmatmul.mubr.msk.bf16.vlgmr.msra.gmra.mrb[72].mxu1 %vm4400_vm9, %v4607_v16 }
 0x4ae   : > { %6959 = vmatpush3.bf16.msra.mxu1 %v7489_v41  ;;  %6966 = vmatprep.mubr.msk.bf16.mxu1 %vm7655_vm7, %v7654_v13 }
 0x4af   : > { %6960 = vmatprep.subr.bf16.mxu1 %v7654_v13 }
 0x4b2   : > { %6961 = vmatpush3.bf16.msra.mxu1 %v7490_v8 }
 0x4b3   : > { %6962 = vmatprep.subr.bf16.mxu1 %v7654_v13 }
 0x4b6   : > { %6963 = vmatpush3.bf16.msra.mxu1 %v7491_v50 }
 0x4b7   : > { %6964 = vmatprep.subr.bf16.mxu1 %v7654_v13 }
 0x4ba   : > { %6965 = vmatpush3.bf16.msra.mxu1 %v7492_v40 }
 0x4bb   : > { %6970 = vmatprep.subr.bf16.mxu1 %v7654_v13 }
 0x4bd   : > { %6967 = vmatmul.mubr.msk.bf16.vlgmr.msra.gmra.mrb[72].mxu1 %vm4400_vm9, %v4695_v63  ;;  %v7532_v63 = vld [vmem:[%s9176_s10 + $0x40] ss:$16 sps:$4 sm:$0xff] (%p72_p0)  }
 0x4be   : > { %6971 = vmatpush3.bf16.msra.mxu1 %v7493_v54  ;;  %6978 = vmatprep.mubr.msk.bf16.mxu1 %vm7655_vm7, %v7654_v13  ;;  %v7520_v54 = vld [vmem:[%s9176_s10] ss:$16 sps:$4 sm:$0xff] (%p72_p0)  }
 0x4bf   : > { %6972 = vmatprep.subr.bf16.mxu1 %v7654_v13  ;;  %5346 = vmatpush1.bf16.msra.mxu0 (%p72_p0), %v7520_v54  ;;  %v5165_v54 = vlaneseq (%p72_p0) }
 0x4c0   :  { %5347 = vmatprep.subr.bf16.mxu0 (%p72_p0), %v7522_v1 }
 0x4c2   : > { %6973 = vmatpush3.bf16.msra.mxu1 %v7494_v27  ;;  %v7533_v27 = vld [vmem:[%s9176_s10 + $0x48] ss:$16 sps:$4 sm:$0xff] (%p72_p0)  }
 0x4c3   : > { %6974 = vmatprep.subr.bf16.mxu1 %v7654_v13  ;;  %5348 = vmatpush1.bf16.msra.mxu0 (%p72_p0), %v7526_v3  ;;  %v5163_v3 = vld [vmem:[%s9177_s11] sm:$0xf] (%p72_p0)  ;;  %s7656_s11 = smov (%p72_p0), [#allocation9]  }
 0x4c6   : > { %6975 = vmatpush3.bf16.msra.mxu1 %v7495_v26  ;;  %v7534_v26 = vld [vmem:[%s9176_s10 + $0x64] ss:$16 sps:$4 sm:$0xff] (%p72_p0)  }
 0x4c7   : > { %6976 = vmatprep.subr.bf16.mxu1 %v7654_v13 }
 0x4ca   : > { %6977 = vmatpush3.bf16.msra.mxu1 %v7496_v33  ;;  %v7536_v33 = vld [vmem:[%s9176_s10 + $0x6c] ss:$16 sps:$4 sm:$0xff] (%p72_p0)  }
 0x4cb   : > { %6982 = vmatprep.subr.bf16.mxu1 %v7654_v13 }
 0x4cd   : > { %6979 = vmatmul.mubr.msk.bf16.vlgmr.msra.gmra.mrb[72].mxu1 %vm4400_vm9, %v4776_v7  ;;  %v7542_v7 = vld [vmem:[%s9176_s10 + $0x8c] ss:$16 sps:$4 sm:$0xff] (%p72_p0)  }
 0x4ce   : > { %6983 = vmatpush3.bf16.msra.mxu1 %v7498_v46  ;;  %6990 = vmatprep.mubr.msk.bf16.mxu1 %vm7655_vm7, %v7654_v13  ;;  %v7540_v46 = vld [vmem:[%s9176_s10 + $0x84] ss:$16 sps:$4 sm:$0xff] (%p72_p0)  }
 0x4cf   : > { %6984 = vmatprep.subr.bf16.mxu1 %v7654_v13 }
 0x4d2   : > { %6985 = vmatpush3.bf16.msra.mxu1 %v7499_v17  ;;  %v7544_v17 = vld [vmem:[%s9176_s10 + $0x80] ss:$16 sps:$4 sm:$0xff] (%p72_p0)  }
 0x4d3   : > { %6986 = vmatprep.subr.bf16.mxu1 %v7654_v13 }
 0x4d6   : > { %6987 = vmatpush3.bf16.msra.mxu1 %v7500_v56  ;;  %v7545_v56 = vld [vmem:[%s9176_s10 + $0x88] ss:$16 sps:$4 sm:$0xff] (%p72_p0)  }
 0x4d7   : > { %6988 = vmatprep.subr.bf16.mxu1 %v7654_v13 }
 0x4da   : > { %6989 = vmatpush3.bf16.msra.mxu1 %v7501_v11  ;;  %v7546_v11 = vld [vmem:[%s9176_s10 + $0xa4] ss:$16 sps:$4 sm:$0xff] (%p72_p0)  }
 0x4db   : > { %6994 = vmatprep.subr.bf16.mxu1 %v7654_v13 }
 0x4dd   : > { %6991 = vmatmul.mubr.msk.bf16.vlgmr.msra.gmra.mrb[72].mxu1 %vm4400_vm9, %v4845_v18  ;;  %v7550_v18 = vld [vmem:[%s9176_s10 + $0xa0] ss:$16 sps:$4 sm:$0xff] (%p72_p0)  }
 0x4de   : > { %6995 = vmatpush3.bf16.msra.mxu1 %v7502_v10  ;;  %7002 = vmatprep.mubr.msk.bf16.mxu1 %vm7655_vm7, %v7654_v13  ;;  %v7548_v10 = vld [vmem:[%s9176_s10 + $0xac] ss:$16 sps:$4 sm:$0xff] (%p72_p0)  }
 0x4df   : > { %6996 = vmatprep.subr.bf16.mxu1 %v7654_v13 }
 0x4e2   : > { %6997 = vmatpush3.bf16.msra.mxu1 %v7503_v14  ;;  %v7554_v14 = vld [vmem:[%s9176_s10 + $0xcc] ss:$16 sps:$4 sm:$0xff] (%p72_p0)  }
 0x4e3   : > { %6998 = vmatprep.subr.bf16.mxu1 %v7654_v13 }
 0x4e6   : > { %6999 = vmatpush3.bf16.msra.mxu1 %v7504_v28  ;;  %v7557_v28 = vld [vmem:[%s9176_s10 + $0xc8] ss:$16 sps:$4 sm:$0xff] (%p72_p0)  }
 0x4e7   : > { %7000 = vmatprep.subr.bf16.mxu1 %v7654_v13 }
 0x4ea   : > { %7001 = vmatpush3.bf16.msra.mxu1 %v7505_v42  ;;  %v7560_v42 = vld [vmem:[%s9176_s10 + $0xec] ss:$16 sps:$4 sm:$0xff] (%p72_p0)  }
 0x4eb   : > { %7006 = vmatprep.subr.bf16.mxu1 %v7654_v13 }
 0x4ed   : > { %7003 = vmatmul.mubr.msk.bf16.vlgmr.msra.gmra.mrb[72].mxu1 %vm4400_vm9, %v4943_v21  ;;  %v7564_v21 = vld [vmem:[%s9178_s12 + $0x40] sm:$0xff] (%p72_p0)  }
 0x4ee   : > { %7007 = vmatpush3.bf16.msra.mxu1 %v7507_v29  ;;  %7014 = vmatprep.mubr.msk.bf16.mxu1 %vm7655_vm7, %v7654_v13 }
 0x4ef   : > { %7008 = vmatprep.subr.bf16.mxu1 %v7654_v13 }
 0x4f2   : > { %7009 = vmatpush3.bf16.msra.mxu1 %v7508_v51  ;;  %v7565_v51 = vld [vmem:[%s9178_s12 + $0xc0] sm:$0xff] (%p72_p0)  }
 0x4f3   : > { %7010 = vmatprep.subr.bf16.mxu1 %v7654_v13 }
 0x4f6   : > { %7011 = vmatpush3.bf16.msra.mxu1 %v7509_v58  ;;  %v7566_v58 = vld [vmem:[%s9178_s12] sm:$0xff] (%p72_p0)  }
 0x4f7   : > { %7012 = vmatprep.subr.bf16.mxu1 %v7654_v13 }
 0x4fa   : > { %7013 = vmatpush3.bf16.msra.mxu1 %v7510_v47  ;;  %v7567_v47 = vld [vmem:[%s9178_s12 + $0x80] sm:$0xff] (%p72_p0)  }
 0x4fb   :  { %5386 = vmatprep.subr.bf16.mxu1 (%p72_p0), %v7518_v31  ;;  %v7595_v31 = vld [vmem:[%s9178_s12 + $0xb8] sm:$0xff] (%p72_p0)  }
 0x4fd   : > { %7015 = vmatmul.mubr.msk.bf16.vlgmr.msra.gmra.mrb[72].mxu1 %vm4400_vm9, %v5024_v59  ;;  %v7569_v59 = vld [vmem:[%s9178_s12 + $0xc8] sm:$0xff] (%p72_p0)  }
 0x4fe   :  { %5418 = vmatprep.mubr.bf16.mxu1 (%p72_p0), %v7652_v6  ;;  %5387 = vmatpush1.bf16.msra.mxu1 (%p72_p0), %v7521_v0  ;;  %v7530_v6 = vld [vmem:[%s9176_s10 + $0x4c] ss:$16 sps:$4 sm:$0xff] (%p72_p0)   ;;  %v5166_v0 = vshrl.u32 (%p72_p0), %v5165_v54, 7 }
 0x4ff   :  { %5388 = vmatprep.subr.bf16.mxu1 (%p72_p0), %v7524_v2 }
 0x500   :  { %v5167_v1 = vsub.s32 (%p72_p0), 0, %v5166_v0  ;;  %v5175_v2 = vsub.s32 (%p72_p0), 2, %v5166_v0 }
 0x5d0   : > { %v5086_v20 = vpop.f32.mrb[72].mxu1 }
 0x5d1   : > { %v5099_v62 = vmul.f32 %v7761_v4, %v5086_v20  ;;  %v7016_v45 = vpop.f32.mrb[73].mxu1  ;;  %v7527_v4 = vld [vmem:[%s9176_s10 + $0x28] ss:$16 sps:$4 sm:$0xff] (%p72_p0)  }
 0x5d2   : > { %v5089_v22 = vpop.f32.mrb[74].mxu1  ;;  %5389 = vmatpush1.bf16.msra.mxu1 (%p72_p0), %v7527_v4  ;;  %v7570_v20 = vld [vmem:[%s9178_s12 + $0x8] sm:$0xff] (%p72_p0)   ;;  %v7572_v45 = vld [vmem:[%s9178_s12 + $0x50] sm:$0xff] (%p72_p0)   ;;  %v5171_v4 = vsub.s32 (%p72_p0), 1, %v5166_v0 }
 0x5d3   : > { %v5106_v36 = vadd.f32 %v7766_v5, %v5099_v62  ;;  %v7017_v24 = vpop.f32.mrb[75].mxu1  ;;  %v7528_v5 = vld [vmem:[%s9176_s10 + $0x44] ss:$16 sps:$4 sm:$0xff] (%p72_p0)   ;;  %5390 = vmatprep.subr.bf16.mxu1 (%p72_p0), %v7530_v6  ;;  %v7571_v62 = vld [vmem:[%s9178_s12 + $0x88] sm:$0xff] (%p72_p0)   ;;  %v5168_v6 = vrot.slane (%p72_p0), %v5163_v3, %v5167_v1 }
 0x5d4   :  { %5349 = vmatprep.subr.bf16.mxu0 (%p72_p0), %v7528_v5  ;;  %v7573_v22 = vld [vmem:[%s9178_s12 + $0xd0] sm:$0xff] (%p72_p0)   ;;  %v5179_v5 = vsub.s32 (%p72_p0), 3, %v5166_v0 }
 0x5d5   : > { %v5107_v15 = vmax.f32 %v5106_v36, 0.0  ;;  %5350 = vmatpush1.bf16.msra.mxu0 (%p72_p0), %v7532_v63  ;;  %v7574_v36 = vld [vmem:[%s9178_s12 + $0x10] sm:$0xff] (%p72_p0)   ;;  %v5176_v63 = vrot.slane (%p72_p0), %v5163_v3, %v5175_v2 }
 0x5d6   :  { %5391 = vmatpush1.bf16.msra.mxu1 (%p72_p0), %v7533_v27  ;;  %5351 = vmatprep.subr.bf16.mxu0 (%p72_p0), %v7534_v26  ;;  %v7575_v24 = vld [vmem:[%s9178_s12 + $0x90] sm:$0xff] (%p72_p0)   ;;  %v5172_v27 = vrot.slane (%p72_p0), %v5163_v3, %v5171_v4  ;;  %v5180_v26 = vrot.slane (%p72_p0), %v5163_v3, %v5179_v5 }
 0x5d7   : > { %v5108_v25 = vsel %vm355_vm3, %v5107_v15, 0.0  ;;  %v5116_v52 = vrot.slane %v5107_v15, 4  ;;  %5392 = vmatprep.subr.bf16.mxu1 (%p72_p0), %v7536_v33  ;;  %v7576_v15 = vld [vmem:[%s9178_s12 + $0x58] sm:$0xff] (%p72_p0)  }
 0x5d8   : > { %v5109_v39 = vrot.slane %v5108_v25, 4 }
 0x5d9   : > { %v5118_v13 = vsel %vm355_vm3, %v5116_v52, 0.0  ;;  %5352 = vmatpush1.bf16.msra.mxu0 (%p72_p0), %v7538_v9  ;;  %v7578_v52 = vld [vmem:[%s9178_s12 + $0x18] sm:$0xff] (%p72_p0)  }
 0x5da   : > { %v5110_v37 = vadd.f32 %v5109_v39, %v5108_v25  ;;  %v5119_v49 = vrot.slane %v5118_v13, 4  ;;  %5393 = vmatpush1.bf16.msra.mxu1 (%p72_p0), %v7539_v48  ;;  %5353 = vmatprep.subr.bf16.mxu0 (%p72_p0), %v7540_v46  ;;  %v7577_v25 = vld [vmem:[%s9178_s12 + $0xd8] sm:$0xff] (%p72_p0)  }
 0x5db   :  { %5394 = vmatprep.subr.bf16.mxu1 (%p72_p0), %v7542_v7  ;;  %v7579_v39 = vld [vmem:[%s9178_s12 + $0x98] sm:$0xff] (%p72_p0)  }
 0x5dc   : > { %v5111_v60 = vrot.slane %v5110_v37, 2  ;;  %v5120_v32 = vadd.f32 %v5119_v49, %v5118_v13  ;;  %v7580_v13 = vld [vmem:[%s9178_s12 + $0x60] sm:$0xff] (%p72_p0)  }
 0x5dd   :  { %5354 = vmatpush1.bf16.msra.mxu0 (%p72_p0), %v7544_v17  ;;  %v7582_v49 = vld [vmem:[%s9178_s12 + $0x20] sm:$0xff] (%p72_p0)  }
 0x5de   : > { %v5112_v41 = vadd.f32 %v5111_v60, %v5110_v37  ;;  %v5121_v16 = vrot.slane %v5120_v32, 2  ;;  %5395 = vmatpush1.bf16.msra.mxu1 (%p72_p0), %v7545_v56  ;;  %5355 = vmatprep.subr.bf16.mxu0 (%p72_p0), %v7546_v11  ;;  %v7581_v37 = vld [vmem:[%s9178_s12 + $0xe0] sm:$0xff] (%p72_p0)  }
 0x5df   :  { %5396 = vmatprep.subr.bf16.mxu1 (%p72_p0), %v7548_v10  ;;  %v7583_v60 = vld [vmem:[%s9178_s12 + $0xa0] sm:$0xff] (%p72_p0)  }
 0x5e0   : > { %v5113_v23 = vrot.slane %v5112_v41, 1  ;;  %v5122_v8 = vadd.f32 %v5121_v16, %v5120_v32  ;;  %v7584_v32 = vld [vmem:[%s9178_s12 + $0x68] sm:$0xff] (%p72_p0)  }
 0x5e1   :  { %5356 = vmatpush1.bf16.msra.mxu0 (%p72_p0), %v7550_v18  ;;  %v7586_v16 = vld [vmem:[%s9178_s12 + $0x28] sm:$0xff] (%p72_p0)  }
 0x5e2   : > { %v5123_v35 = vrot.slane %v5122_v8, 1  ;;  %v5114_v50 = vadd.f32 %v5113_v23, %v5112_v41  ;;  %5397 = vmatpush1.bf16.msra.mxu1 (%p72_p0), %v7551_v55  ;;  %5357 = vmatprep.subr.bf16.mxu0 (%p72_p0), %v7552_v38  ;;  %v7585_v41 = vld [vmem:[%s9178_s12 + $0xe8] sm:$0xff] (%p72_p0)  }
 0x5e3   :  { %5398 = vmatprep.subr.bf16.mxu1 (%p72_p0), %v7554_v14  ;;  %v7587_v23 = vld [vmem:[%s9178_s12 + $0xa8] sm:$0xff] (%p72_p0)  }
 0x5e4   : > { %v5124_v53 = vadd.f32 %v5123_v35, %v5122_v8  ;;  %74 = sbr.rel (!%p72_p0) target bundleno = 9 (0x9), region = 95  ;;  %v7588_v8 = vld [vmem:[%s9178_s12 + $0x70] sm:$0xff] (%p72_p0)  }
 0x5e5   :  { %5358 = vmatpush1.bf16.msra.mxu0 (%p72_p0), %v7556_v30  ;;  %v7589_v35 = vld [vmem:[%s9178_s12 + $0xf0] sm:$0xff] (%p72_p0)  }
 0x5e6   : > { %v5125_v44 = vadd.f32 %v5124_v53, %v5114_v50  ;;  %5399 = vmatpush1.bf16.msra.mxu1 (%p72_p0), %v7557_v28  ;;  %5359 = vmatprep.subr.bf16.mxu0 (%p72_p0), %v7558_v19  ;;  %v7590_v50 = vld [vmem:[%s9178_s12 + $0x30] sm:$0xff] (%p72_p0)  }
 0x5e7   :  { %5400 = vmatprep.subr.bf16.mxu1 (%p72_p0), %v7560_v42  ;;  %v7591_v53 = vld [vmem:[%s9178_s12 + $0xb0] sm:$0xff] (%p72_p0)  }
 0x5e8   : > { %v5126_v40 = vmul.f32 0.25, %v5125_v44  ;;  %v7592_v44 = vld [vmem:[%s9178_s12 + $0x78] sm:$0xff] (%p72_p0)  }
 0x5e9   :  { %5360 = vmatpush1.bf16.msra.mxu0 (%p72_p0), %v7562_v57 }
 0x5ea   : > { %5128 = vst [vmem:[%s5127_s20] sm:$0x1] %v5126_v40  ;;  %5401 = vmatpush1.bf16.msra.mxu1 (%p72_p0), %v7563_v12  ;;  %6452 = vmatprep.subr.bf16.mxu0 (%p72_p0), %v7564_v21  ;;  %v7593_v40 = vld [vmem:[%s9178_s12 + $0xf8] sm:$0xff] (%p72_p0)   ;;  %s5795_s12 = sshll.u32 (%p72_p0), %s7656_s11, 4  ;;  %s5796_s12 = int_to_ptr.vmem [resolvable:$true] %s5795_s12 }
 0x5eb   :  { %6474 = vmatprep.subr.bf16.mxu1 %v7565_v51  ;;  %s7596_s23 = scalar_lea.vmem %s5796_s12, 32  ;;  %p7601_p2 = scmp.lt.s32.totalorder %s5796_s12, %s5796_s12 }
 0x5ec   :  { %p7597_p1 = scmp.ne.s32.totalorder %s5796_s12, %s7596_s23  ;;  %p7602_p3 = scmp.lt.s32.totalorder %s7596_s23, %s7596_s23 }
 0x5ee   :  { %p7603_p4 = por %p7602_p3, %p7601_p2 }
 0x5f0   :  { %p7604_p5 = pnand %p7603_p4, %p7597_p1 }
 0x5f1   :  { %v5129_v29 = vld [vmem:[#allocation9] sm:$0x3] }
 0x5f2   :  { %v5130_v61 = vpack.c.bf16 %v5129_v29, %v5129_v29 }
 0x5f4   :  { %5378 = vmatmul.mubr.bf16.vlgmr.msra.gmra.mrb[0].mxu0 %v5130_v61  ;;  %5419 = vmatmul.mubr.bf16.vlgmr.msra.gmra.mrb[0].mxu1 %v5130_v61 }
 0x5f5   :  { %6453 = vmatpush3.bf16.msra.mxu0 %v7566_v58  ;;  %6475 = vmatpush3.bf16.msra.mxu1 %v7567_v47 }
 0x5f6   :  { %6454 = vmatprep.subr.bf16.mxu0 %v7568_v34  ;;  %6476 = vmatprep.subr.bf16.mxu1 %v7569_v59 }
 0x5f9   :  { %6455 = vmatpush3.bf16.msra.mxu0 %v7570_v20  ;;  %6477 = vmatpush3.bf16.msra.mxu1 %v7571_v62 }
 0x5fa   :  { %6456 = vmatprep.subr.bf16.mxu0 %v7572_v45  ;;  %6478 = vmatprep.subr.bf16.mxu1 %v7573_v22 }
 0x5fd   :  { %6457 = vmatpush3.bf16.msra.mxu0 %v7574_v36  ;;  %6479 = vmatpush3.bf16.msra.mxu1 %v7575_v24 }
 0x5fe   :  { %6458 = vmatprep.subr.bf16.mxu0 %v7576_v15  ;;  %6480 = vmatprep.subr.bf16.mxu1 %v7577_v25 }
 0x601   :  { %6459 = vmatpush3.bf16.msra.mxu0 %v7578_v52  ;;  %6481 = vmatpush3.bf16.msra.mxu1 %v7579_v39 }
 0x602   :  { %6460 = vmatprep.subr.bf16.mxu0 %v7580_v13  ;;  %6482 = vmatprep.subr.bf16.mxu1 %v7581_v37 }
 0x605   :  { %6461 = vmatpush3.bf16.msra.mxu0 %v7582_v49  ;;  %6483 = vmatpush3.bf16.msra.mxu1 %v7583_v60 }
 0x606   :  { %6462 = vmatprep.subr.bf16.mxu0 %v7584_v32  ;;  %6484 = vmatprep.subr.bf16.mxu1 %v7585_v41 }
 0x609   :  { %6463 = vmatpush3.bf16.msra.mxu0 %v7586_v16  ;;  %6485 = vmatpush3.bf16.msra.mxu1 %v7587_v23 }
 0x60a   :  { %6464 = vmatprep.subr.bf16.mxu0 %v7588_v8  ;;  %6486 = vmatprep.subr.bf16.mxu1 %v7589_v35 }
 0x60d   :  { %6465 = vmatpush3.bf16.msra.mxu0 %v7590_v50  ;;  %6487 = vmatpush3.bf16.msra.mxu1 %v7591_v53 }
 0x60e   :  { %6466 = vmatprep.subr.bf16.mxu0 %v7592_v44  ;;  %6488 = vmatprep.subr.bf16.mxu1 %v7593_v40 }
 0x611   :  { %6467 = vmatpush3.bf16.msra.mxu0 %v7594_v43  ;;  %6489 = vmatpush3.bf16.msra.mxu1 %v7595_v31 }
 0x6c7   :  { %v5379_v33 = vpop.f32.mrb[0].mxu0  ;;  %v5420_v9 = vpop.f32.mrb[0].mxu1 }
 0x6c8   :  { %v5380_v48 = vadd.f32 %v5379_v33, %v5168_v6  ;;  %v5421_v46 = vadd.f32 %v5420_v9, %v5176_v63  ;;  %v5381_v7 = vpop.f32.mrb[1].mxu0  ;;  %v5422_v17 = vpop.f32.mrb[1].mxu1 }
 0x6c9   :  { %v5382_v56 = vadd.f32 %v5381_v7, %v5172_v27  ;;  %v5423_v11 = vadd.f32 %v5422_v17, %v5180_v26  ;;  %v5383_v10 = vpop.f32.mrb[2].mxu0  ;;  %v5424_v18 = vpop.f32.mrb[2].mxu1 }
 0x6ca   :  { %v5427_v55 = vmax.f32 %v5380_v48, 0.0  ;;  %v5429_v38 = vmax.f32 %v5421_v46, 0.0  ;;  %v5384_v14 = vpop.f32.mrb[3].mxu0  ;;  %v5425_v30 = vpop.f32.mrb[3].mxu1 }
 0x6cb   :  { %v5428_v28 = vmax.f32 %v5382_v56, 0.0  ;;  %v5430_v19 = vmax.f32 %v5423_v11, 0.0 }
 0x6cc   :  { %v5433_v42 = vpack.c.bf16 %v5429_v38, %v5429_v38  ;;  %v5431_v29 = vpack.c.bf16 %v5427_v55, %v5427_v55 }
 0x6cd   :  { %v5432_v57 = vpack.c.bf16 %v5428_v28, %v5428_v28  ;;  %v5434_v12 = vpack.c.bf16 %v5430_v19, %v5430_v19 }
 0x6cf   :  { %5730 = vmatprep.mubr.bf16.mxu0 %v5432_v57  ;;  %5770 = vmatprep.mubr.bf16.mxu1 %v5434_v12 }
 0x6d0   :  { %5731 = vmatmul.mubr.bf16.vlgmr.msra.gmra.mrb[4].mxu0 %v5431_v29  ;;  %5771 = vmatmul.mubr.bf16.vlgmr.msra.gmra.mrb[4].mxu1 %v5433_v42 }
 0x6d1   :  { %7607 = shalt.err (!%p7604_p5)
}
 0x6d2   :  { %s7608_s26 = scalar_lea.hbm %s9181_s15, 32 }
 0x6d3   :  { %p7609_p6 = scmp.ne.s32.totalorder %s9181_s15, %s7608_s26  ;;  %p7612_p7 = scmp.lt.u32.totalorder %s7608_s26, %s9181_s15 }
 0x6d5   :  { %p7614_p8 = pnand %p7612_p7, %p7609_p6 }
 0x6d7   :  { %7617 = shalt.err (!%p7614_p8)
}
 0x6d8   :  { %5798 = dma.vmem_to_hbm [thread:$0]  %s5796_s12, 32, %s9181_s15, [#allocation10]   ;;  %v6185_v58 = vld [vmem:[%s9179_s13] ss:$0 sm:$0xff] }
 0x6d9   :  { %s7657_s5 = smov [#allocation7]  }
 0x6da   :  { %s5785_s6 = sshll.u32 %s7657_s5, 4  ;;  %s5786_s6 = int_to_ptr.vmem [resolvable:$true] %s5785_s6 }
 0x6db   :  { %s7618_s15 = scalar_lea.vmem %s5786_s6, 32  ;;  %p7623_p10 = scmp.lt.s32.totalorder %s5786_s6, %s5786_s6 }
 0x6dc   :  { %p7619_p9 = scmp.ne.s32.totalorder %s5786_s6, %s7618_s15  ;;  %p7624_p11 = scmp.lt.s32.totalorder %s7618_s15, %s7618_s15 }
 0x6de   :  { %p7625_p12 = por %p7624_p11, %p7623_p10 }
 0x6e0   :  { %p7626_p13 = pnand %p7625_p12, %p7619_p9 }
 0x7a3   :  { %v6468_v21 = vpop.f32.mrb[4].mxu0  ;;  %v6490_v51 = vpop.f32.mrb[4].mxu1 }
 0x7a4   :  { %v6469_v61 = vpop.f32.mrb[5].mxu0  ;;  %v6491_v47 = vpop.f32.mrb[5].mxu1 }
 0x7a5   :  { %v6470_v34 = vadd.f32 %v6469_v61, %v6468_v21  ;;  %v6492_v59 = vadd.f32 %v6491_v47, %v6490_v51  ;;  %v6471_v20 = vpop.f32.mrb[6].mxu0  ;;  %v6493_v62 = vpop.f32.mrb[6].mxu1 }
 0x7a6   :  { %v6472_v45 = vpop.f32.mrb[7].mxu0  ;;  %v6494_v22 = vpop.f32.mrb[7].mxu1 }
 0x7a7   :  { %v5733_v36 = vadd.f32 %v6470_v34, %v6185_v58 }
 0x7a9   :  { %v5773_v24 = vadd.f32 %v6492_v59, %v5733_v36 }
 0x7ab   :  { %5778 = vst [vmem:[#allocation7] sm:$0x3] %v5773_v24 }
 0x7ac   :  { %7629 = shalt.err (!%p7626_p13)
}
 0x7ad   :  { %s7630_s9 = scalar_lea.hbm %s9180_s14, 32 }
 0x7ae   :  { %p7631_p0 = scmp.ne.s32.totalorder %s9180_s14, %s7630_s9  ;;  %p7634_p1 = scmp.lt.u32.totalorder %s7630_s9, %s9180_s14 }
 0x7b0   :  { %p7636_p2 = pnand %p7634_p1, %p7631_p0 }
 0x7b2   :  { %7639 = shalt.err (!%p7636_p2)
}
 0x7b3   :  { %5788 = dma.vmem_to_hbm [thread:$0]  %s5786_s6, 32, %s9180_s14, [#allocation8]  }
 0x7b4   :  { %7644 = dma.done.wait [#allocation8], 32  }
 0x7b5   :  { %7645 = vsyncadd [#allocation8], 4294967264 }
 0x7b6   :  { %7646 = dma.done.wait [#allocation10], 32  }
 0x7b7   :  { %7647 = vsyncadd [#allocation10], 4294967264 }
 0x7b8   :  { %5805 = vsyncpa [#allocation8], 1 }
 0x7b9   :  { %5806 = vsyncpa [#allocation10], 1 }

</bundles_post_ra>
